<compile_context>
chip_gen: v7x
topology: tpu7x:2x2x1
jax: 0.10.0
libtpu: 0.0.40
codegen_flags: <defaults>
</compile_context>

<pallas_src>
import functools

import jax
import jax.numpy as jnp
from jax.experimental import pallas as pl
from jax.experimental.pallas import tpu as pltpu

EPS = 1e-5
_MXU_DTYPE = jnp.bfloat16  # set to jnp.float32 for bit-tighter (slower) matmuls


def _conv_kernel(x_ref, w_ref, b_ref, scale_ref, shift_ref, a_ref,
                 y_ref, stats_ref, *, H, W, apply_pre):
    """Per-sample fused [prev-BN affine + PReLU] -> 3x3 SAME conv (3 accumulated dots).

    x_ref:     (1, L, Cin)      f32   previous-stage conv output (or the concat input)
    w_ref:     (3, 3*Cin, Cout) bf16  conv weight grouped by ky, rows ordered (kx, cin)
    b_ref:     (1, Cout)        f32   conv bias
    scale_ref: (1, Cin)         f32   folded BN scale of the previous stage
    shift_ref: (1, Cin)         f32   folded BN shift of the previous stage
    a_ref:     (1,)  SMEM       f32   PReLU slope of the pre-activation
    y_ref:     (1, L, Cout)     f32   raw conv output (pre-BN)
    stats_ref: (1, 2, Cout)     f32   per-sample [sum, sum_of_squares] of y
    """
    L = H * W
    Cin = x_ref.shape[-1]
    Cout = y_ref.shape[-1]

    u = x_ref[0]
    if apply_pre:
        u = u * scale_ref[...] + shift_ref[...]
        a = a_ref[0]
        u = jnp.where(u >= 0, u, a * u)                    # PReLU

    # Horizontal (+-1 column) taps: one-row shift of the flattened image, with an
    # (L, 1) column mask handling the left/right borders and the row wrap-around.
    col = jax.lax.broadcasted_iota(jnp.int32, (L, 1), 0) % W
    zrow = jnp.zeros((1, Cin), jnp.float32)
    u_l = jnp.where(col >= 1, jnp.concatenate([zrow, u[:L - 1]], axis=0), 0.0)
    u_r = jnp.where(col <= W - 2, jnp.concatenate([u[1:], zrow], axis=0), 0.0)
    # Single (L, 3*Cin) operand, cast once to the MXU dtype (accumulation stays f32).
    uh = jnp.concatenate([u_l, u, u_r], axis=1).astype(_MXU_DTYPE)

    # ky = 1 (same row): full-length dot + bias.
    y = jnp.dot(uh, w_ref[1], preferred_element_type=jnp.float32) + b_ref[...]
    # ky = 0 (row above): source rows [0, H-2] feed output rows [1, H-1].
    top = jnp.dot(uh[:L - W], w_ref[0], preferred_element_type=jnp.float32)
    y = y + jnp.concatenate([jnp.zeros((W, Cout), jnp.float32), top], axis=0)
    # ky = 2 (row below): source rows [1, H-1] feed output rows [0, H-2].
    bot = jnp.dot(uh[W:], w_ref[2], preferred_element_type=jnp.float32)
    y = y + jnp.concatenate([bot, jnp.zeros((W, Cout), jnp.float32)], axis=0)

    y_ref[0] = y
    # Single-pass partial sums for the global (training-mode) BatchNorm statistics.
    s = jnp.sum(y, axis=0, keepdims=True)
    sq = jnp.sum(y * y, axis=0, keepdims=True)
    stats_ref[0] = jnp.concatenate([s, sq], axis=0)


def _bn_act_kernel(y_ref, scale_ref, shift_ref, a_ref, o_ref):
    """Final BN affine + PReLU (the 2x nearest upsample is one XLA broadcast pass)."""
    a = a_ref[0]
    v = y_ref[0] * scale_ref[...] + shift_ref[...]
    o_ref[0] = jnp.where(v >= 0, v, a * v)


def _tile_bytes(r, c, itemsize=4):
    """VMEM footprint of an (r, c) array after (8, 128) tile padding."""
    return itemsize * (-(-r // 8) * 8) * (-(-c // 128) * 128)


def _vmem_limit(est_bytes):
    """Scoped-VMEM request: tight estimate + headroom, capped at 75% of capacity."""
    try:
        cap = int(getattr(pltpu.get_tpu_info(), "vmem_capacity_bytes", 0)) or (128 << 20)
    except Exception:  # pragma: no cover - conservative fallback
        cap = 64 << 20
    return int(min(max(int(1.5 * est_bytes), 32 << 20), (cap * 3) // 4))


def _conv_stage(x_flat, w3d, b, scale, shift, a_pre, H, W, apply_pre):
    N, L, Cin = x_flat.shape
    Cout = w3d.shape[-1]

    est = (2 * _tile_bytes(L, Cin)               # input block (double-buffered)
           + 2 * _tile_bytes(L, Cout)            # output block (double-buffered)
           + 2 * _tile_bytes(2, Cout)            # stats block
           + 3 * _tile_bytes(3 * Cin, Cout, 2)   # bf16 weights
           + 4 * _tile_bytes(L, Cin)             # u / u_l / u_r / temps (f32)
           + _tile_bytes(L, 3 * Cin, 2)          # bf16 matmul operand
           + 3 * _tile_bytes(L, Cout))           # f32 accumulator / partial strips

    cost = pl.CostEstimate(
        flops=2 * N * L * 9 * Cin * Cout + 4 * N * L * Cin,
        transcendentals=0,
        bytes_accessed=4 * (N * L * Cin + N * L * Cout + 2 * N * Cout
                            + 2 * Cin + Cout) + 2 * 9 * Cin * Cout)

    kernel = functools.partial(_conv_kernel, H=H, W=W, apply_pre=apply_pre)
    y, stats = pl.pallas_call(
        kernel,
        grid=(N,),
        in_specs=[
            pl.BlockSpec((1, L, Cin), lambda n: (n, 0, 0)),
            pl.BlockSpec((3, 3 * Cin, Cout), lambda n: (0, 0, 0)),
            pl.BlockSpec((1, Cout), lambda n: (0, 0)),
            pl.BlockSpec((1, Cin), lambda n: (0, 0)),
            pl.BlockSpec((1, Cin), lambda n: (0, 0)),
            pl.BlockSpec(memory_space=pltpu.MemorySpace.SMEM),
        ],
        out_specs=(
            pl.BlockSpec((1, L, Cout), lambda n: (n, 0, 0)),
            pl.BlockSpec((1, 2, Cout), lambda n: (n, 0, 0)),
        ),
        out_shape=(
            jax.ShapeDtypeStruct((N, L, Cout), jnp.float32),
            jax.ShapeDtypeStruct((N, 2, Cout), jnp.float32),
        ),
        compiler_params=pltpu.CompilerParams(
            dimension_semantics=("parallel",),
            vmem_limit_bytes=_vmem_limit(est)),
        cost_estimate=cost,
    )(x_flat, w3d, b.reshape(1, Cout), scale, shift, a_pre)
    return y, stats


def _bn_act_stage(y_flat, scale, shift, a_arr):
    N, L, C = y_flat.shape
    est = 4 * _tile_bytes(L, C) + 2 * _tile_bytes(1, C)
    return pl.pallas_call(
        _bn_act_kernel,
        grid=(N,),
        in_specs=[
            pl.BlockSpec((1, L, C), lambda n: (n, 0, 0)),
            pl.BlockSpec((1, C), lambda n: (0, 0)),
            pl.BlockSpec((1, C), lambda n: (0, 0)),
            pl.BlockSpec(memory_space=pltpu.MemorySpace.SMEM),
        ],
        out_specs=pl.BlockSpec((1, L, C), lambda n: (n, 0, 0)),
        out_shape=jax.ShapeDtypeStruct((N, L, C), jnp.float32),
        compiler_params=pltpu.CompilerParams(
            dimension_semantics=("parallel",),
            vmem_limit_bytes=_vmem_limit(est)),
    )(y_flat, scale, shift, a_arr)


def _fold_bn(stats, gamma, beta, count):
    """Reduce per-sample [sum, sum_sq] and fold BN into a per-channel affine."""
    tot = jnp.sum(stats, axis=0)                 # (2, C)
    mean = tot[0] / count
    var = tot[1] / count - mean * mean           # biased variance (PyTorch train mode)
    scale = gamma / jnp.sqrt(var + EPS)
    shift = beta - mean * scale
    return scale.reshape(1, -1), shift.reshape(1, -1)


@jax.jit
def unet_up_block(prev_fm, x, w1, b1, g1, be1, w2, b2, g2, be2, w3, b3, g3, be3, a):
    """prev_fm: (N, Cp, H, W), x: (N, Cx, H, W) float32 -> (N, Cout, 2H, 2W).

    Conv weights wk are (3, 3, Cin, Cout) (= torch weight.permute(2, 3, 1, 0))."""
    N, Cx, H, W = x.shape
    Cp = prev_fm.shape[1]
    Cin = Cx + Cp
    L = H * W
    C1, C2, C3 = w1.shape[3], w2.shape[3], w3.shape[3]
    count = float(N * L)

    # torch.cat((x, prev_feature_map), dim=1), moved to channels-last and flattened.
    xin = jnp.concatenate([jnp.transpose(x, (0, 2, 3, 1)),
                           jnp.transpose(prev_fm, (0, 2, 3, 1))], axis=-1)
    xin = xin.reshape(N, L, Cin)

    a_arr = jnp.reshape(a.astype(jnp.float32), (1,))
    id_scale = jnp.ones((1, Cin), jnp.float32)
    id_shift = jnp.zeros((1, Cin), jnp.float32)

    def wprep(w, cin, cout):  # (3,3,cin,cout) -> (ky, kx*cin, cout) in the MXU dtype
        return w.reshape(3, 3 * cin, cout).astype(_MXU_DTYPE)

    # stage 1: conv1 on the raw concat input (no pre-activation)
    y1, s1 = _conv_stage(xin, wprep(w1, Cin, C1), b1, id_scale, id_shift, a_arr,
                         H, W, apply_pre=False)
    sc1, sh1 = _fold_bn(s1, g1, be1, count)
    # stage 2: BN1 + PReLU folded into conv2's input path
    y2, s2 = _conv_stage(y1, wprep(w2, C1, C2), b2, sc1, sh1, a_arr,
                         H, W, apply_pre=True)
    sc2, sh2 = _fold_bn(s2, g2, be2, count)
    # stage 3: BN2 + PReLU folded into conv3's input path
    y3, s3 = _conv_stage(y2, wprep(w3, C2, C3), b3, sc2, sh2, a_arr,
                         H, W, apply_pre=True)
    sc3, sh3 = _fold_bn(s3, g3, be3, count)
    # BN3 + PReLU
    act = _bn_act_stage(y3, sc3, sh3, a_arr).reshape(N, H, W, C3)

    # nn.Upsample(scale_factor=2) default mode == 'nearest':
    # NHWC -> NCHW transpose on the 1x tensor, then a single broadcast +
    # trivially-merging reshape writes the 4x output in one XLA pass.
    u = jnp.transpose(act, (0, 3, 1, 2))                       # (N, C3, H, W)
    up = jnp.broadcast_to(u[:, :, :, None, :, None],
                          (N, C3, H, 2, W, 2)).reshape(N, C3, 2 * H, 2 * W)
    return up


def reference(prev_fm, x, w1, b1, g1, be1, w2, b2, g2, be2, w3, b3, g3, be3, a):
    """Pure-JAX f32 reference in NCHW with HWIO weights (matches the PyTorch forward)."""
    def conv(z, w, b):
        y = jax.lax.conv_general_dilated(
            z, w, (1, 1), "SAME", dimension_numbers=("NCHW", "HWIO", "NCHW"))
        return y + b.reshape(1, -1, 1, 1)

    def bn(y, g, be):
        m = y.mean(axis=(0, 2, 3), keepdims=True)
        v = ((y - m) ** 2).mean(axis=(0, 2, 3), keepdims=True)
        return (y - m) / jnp.sqrt(v + EPS) * g.reshape(1, -1, 1, 1) + be.reshape(1, -1, 1, 1)

    def act(y):
        return jnp.where(y >= 0, y, a * y)

    z = jnp.concatenate([x, prev_fm], axis=1)
    z = act(bn(conv(z, w1, b1), g1, be1))
    z = act(bn(conv(z, w2, b2), g2, be2))
    z = act(bn(conv(z, w3, b3), g3, be3))
    return jnp.repeat(jnp.repeat(z, 2, axis=2), 2, axis=3)   # nearest 2x


if __name__ == "__main__":
    N, Cp, Cx, Cout, H, W = 2, 4, 4, 4, 16, 16
    key = jax.random.PRNGKey(0)
    ks = jax.random.split(key, 14)

    prev_fm = jax.random.normal(ks[0], (N, Cp, H, W), jnp.float32)
    x = jax.random.normal(ks[1], (N, Cx, H, W), jnp.float32)

    Cin = Cp + Cx
    # conv weights in (kH, kW, Cin, Cout); torch layout would be (Cout, Cin, kH, kW)
    w1 = 0.1 * jax.random.normal(ks[2], (3, 3, Cin, Cout), jnp.float32)
    b1 = 0.1 * jax.random.normal(ks[3], (Cout,), jnp.float32)
    w2 = 0.1 * jax.random.normal(ks[4], (3, 3, Cout, Cout), jnp.float32)
    b2 = 0.1 * jax.random.normal(ks[5], (Cout,), jnp.float32)
    w3 = 0.1 * jax.random.normal(ks[6], (3, 3, Cout, Cout), jnp.float32)
    b3 = 0.1 * jax.random.normal(ks[7], (Cout,), jnp.float32)

    g1 = 1.0 + 0.1 * jax.random.normal(ks[8], (Cout,), jnp.float32)
    be1 = 0.1 * jax.random.normal(ks[9], (Cout,), jnp.float32)
    g2 = 1.0 + 0.1 * jax.random.normal(ks[10], (Cout,), jnp.float32)
    be2 = 0.1 * jax.random.normal(ks[11], (Cout,), jnp.float32)
    g3 = 1.0 + 0.1 * jax.random.normal(ks[12], (Cout,), jnp.float32)
    be3 = 0.1 * jax.random.normal(ks[13], (Cout,), jnp.float32)

    a = jnp.float32(0.25)  # nn.PReLU() default single shared parameter

    out = unet_up_block(prev_fm, x, w1, b1, g1, be1, w2, b2, g2, be2,
                        w3, b3, g3, be3, a)
    out = jax.block_until_ready(out)

    ref = reference(prev_fm, x, w1, b1, g1, be1, w2, b2, g2, be2, w3, b3, g3, be3, a)
    assert out.shape == (N, Cout, 2 * H, 2 * W), out.shape
    # Tolerances account for bf16 MXU operands across 3 conv+BN stages (f32 accum).
    max_err = float(jnp.max(jnp.abs(out - ref)))
    mean_err = float(jnp.mean(jnp.abs(out - ref)))
    assert jnp.allclose(out, ref, atol=1e-1, rtol=1e-1), (max_err, mean_err)
    assert mean_err < 2e-2, (max_err, mean_err)

    print("KERNEL_OK")
</pallas_src>

<mosaic_0001>
module attributes {stable_mosaic.version = 11 : i64} {
  func.func @_conv_kernel(%arg0: i32, %arg1: memref<1x256x8xf32, #tpu.memory_space<vmem>>, %arg2: memref<3x24x4xbf16, #tpu.memory_space<vmem>>, %arg3: memref<1x4xf32, #tpu.memory_space<vmem>>, %arg4: memref<1x8xf32, #tpu.memory_space<vmem>>, %arg5: memref<1x8xf32, #tpu.memory_space<vmem>>, %arg6: memref<1xf32, #tpu.memory_space<smem>>, %arg7: memref<1x256x4xf32, #tpu.memory_space<vmem>>, %arg8: memref<1x2x4xf32, #tpu.memory_space<vmem>>) attributes {dimension_semantics = [#tpu.dimension_semantics<parallel>], iteration_bounds = array<i64: 2>, scalar_prefetch = 0 : i64, scratch_operands = 0 : i64, tpu.core_type = #tpu.core_type<tc>, window_params = [{transform_indices = @transform_0, window_bounds = array<i64: 1, 256, 8>}, {pipeline_mode = #tpu.pipeline_mode<synchronous>, transform_indices = @transform_1, window_bounds = array<i64: 3, 24, 4>}, {pipeline_mode = #tpu.pipeline_mode<synchronous>, transform_indices = @transform_2, window_bounds = array<i64: 1, 4>}, {pipeline_mode = #tpu.pipeline_mode<synchronous>, transform_indices = @transform_3, window_bounds = array<i64: 1, 8>}, {pipeline_mode = #tpu.pipeline_mode<synchronous>, transform_indices = @transform_4, window_bounds = array<i64: 1, 8>}, {transform_indices = @transform_5, window_bounds = array<i64: 1>}, {transform_indices = @transform_6, window_bounds = array<i64: 1, 256, 4>}, {transform_indices = @transform_7, window_bounds = array<i64: 1, 2, 4>}]} {
    %c0 = arith.constant 0 : index
    %c0_0 = arith.constant 0 : index
    %c0_1 = arith.constant 0 : index
    %0 = vector.load %arg1[%c0, %c0_0, %c0_1] : memref<1x256x8xf32, #tpu.memory_space<vmem>>, vector<1x256x8xf32>
    %1 = vector.shape_cast %0 : vector<1x256x8xf32> to vector<256x8xf32>
    %2 = tpu.iota {dimensions = array<i32: 0>} : vector<256x1xi32>
    %c16_i32 = arith.constant 16 : i32
    %c0_i32 = arith.constant 0 : i32
    %3 = arith.cmpi eq, %c16_i32, %c0_i32 : i32
    %c1_i32 = arith.constant 1 : i32
    %4 = arith.select %3, %c1_i32, %c16_i32 : i32
    %5 = vector.broadcast %4 : i32 to vector<256x1xi32>
    %6 = arith.remsi %2, %5 : vector<256x1xi32>
    %c0_i32_2 = arith.constant 0 : i32
    %7 = vector.broadcast %c0_i32_2 : i32 to vector<256x1xi32>
    %8 = arith.cmpi ne, %6, %7 : vector<256x1xi32>
    %c0_i32_3 = arith.constant 0 : i32
    %9 = vector.broadcast %c0_i32_3 : i32 to vector<256x1xi32>
    %10 = arith.cmpi slt, %6, %9 : vector<256x1xi32>
    %c0_i32_4 = arith.constant 0 : i32
    %11 = arith.cmpi slt, %4, %c0_i32_4 : i32
    %12 = vector.broadcast %11 : i1 to vector<256x1xi1>
    %13 = vector.broadcast %12 : vector<256x1xi1> to vector<256x1xi1>
    %14 = arith.xori %10, %13 : vector<256x1xi1>
    %15 = arith.andi %14, %8 : vector<256x1xi1>
    %16 = vector.broadcast %4 : i32 to vector<256x1xi32>
    %17 = arith.addi %6, %16 : vector<256x1xi32>
    %18 = arith.select %15, %17, %6 : vector<256x1xi1>, vector<256x1xi32>
    %cst = arith.constant 0.000000e+00 : f32
    %19 = vector.broadcast %cst : f32 to vector<1x8xf32>
    %c1_i32_5 = arith.constant 1 : i32
    %20 = vector.broadcast %c1_i32_5 : i32 to vector<256x1xi32>
    %21 = arith.cmpi sge, %18, %20 : vector<256x1xi32>
    %22 = vector.extract_strided_slice %1 {offsets = [0, 0], sizes = [255, 8], strides = [1, 1]} : vector<256x8xf32> to vector<255x8xf32>
    %23 = tpu.concatenate %19, %22 in 0 : vector<1x8xf32>, vector<255x8xf32> -> vector<256x8xf32>
    %cst_6 = arith.constant 0.000000e+00 : f32
    %24 = vector.shape_cast %21 : vector<256x1xi1> to vector<256x1xi1>
    %25 = vector.broadcast %24 : vector<256x1xi1> to vector<256x8xi1>
    %26 = vector.broadcast %cst_6 : f32 to vector<256x8xf32>
    %27 = arith.select %25, %23, %26 : vector<256x8xi1>, vector<256x8xf32>
    %c14_i32 = arith.constant 14 : i32
    %28 = vector.broadcast %c14_i32 : i32 to vector<256x1xi32>
    %29 = arith.cmpi sle, %18, %28 : vector<256x1xi32>
    %30 = vector.extract_strided_slice %1 {offsets = [1, 0], sizes = [255, 8], strides = [1, 1]} : vector<256x8xf32> to vector<255x8xf32>
    %31 = tpu.concatenate %30, %19 in 0 : vector<255x8xf32>, vector<1x8xf32> -> vector<256x8xf32>
    %cst_7 = arith.constant 0.000000e+00 : f32
    %32 = vector.shape_cast %29 : vector<256x1xi1> to vector<256x1xi1>
    %33 = vector.broadcast %32 : vector<256x1xi1> to vector<256x8xi1>
    %34 = vector.broadcast %cst_7 : f32 to vector<256x8xf32>
    %35 = arith.select %33, %31, %34 : vector<256x8xi1>, vector<256x8xf32>
    %36 = tpu.concatenate %27, %1, %35 in 1 : vector<256x8xf32>, vector<256x8xf32>, vector<256x8xf32> -> vector<256x24xf32>
    %37 = arith.truncf %36 : vector<256x24xf32> to vector<256x24xbf16>
    %c1 = arith.constant 1 : index
    %c0_8 = arith.constant 0 : index
    %c0_9 = arith.constant 0 : index
    %38 = vector.load %arg2[%c1, %c0_8, %c0_9] : memref<3x24x4xbf16, #tpu.memory_space<vmem>>, vector<1x24x4xbf16>
    %39 = vector.shape_cast %38 : vector<1x24x4xbf16> to vector<24x4xbf16>
    %cst_10 = arith.constant dense<0.000000e+00> : vector<256x4xf32>
    %40 = tpu.matmul %37, %39, %cst_10 {dimension_numbers = #tpu.dot_dimension_numbers<[1], [0], [0], [1], [0, 0, 1, 1], [], []>} : vector<256x24xbf16>, vector<24x4xbf16>, vector<256x4xf32> -> vector<256x4xf32>
    %c0_11 = arith.constant 0 : index
    %c0_12 = arith.constant 0 : index
    %41 = vector.load %arg3[%c0_11, %c0_12] : memref<1x4xf32, #tpu.memory_space<vmem>>, vector<1x4xf32>
    %42 = vector.broadcast %41 : vector<1x4xf32> to vector<256x4xf32>
    %43 = arith.addf %40, %42 : vector<256x4xf32>
    %44 = vector.extract_strided_slice %37 {offsets = [0, 0], sizes = [240, 24], strides = [1, 1]} : vector<256x24xbf16> to vector<240x24xbf16>
    %c0_13 = arith.constant 0 : index
    %c0_14 = arith.constant 0 : index
    %c0_15 = arith.constant 0 : index
    %45 = vector.load %arg2[%c0_13, %c0_14, %c0_15] : memref<3x24x4xbf16, #tpu.memory_space<vmem>>, vector<1x24x4xbf16>
    %46 = vector.shape_cast %45 : vector<1x24x4xbf16> to vector<24x4xbf16>
    %cst_16 = arith.constant dense<0.000000e+00> : vector<240x4xf32>
    %47 = tpu.matmul %44, %46, %cst_16 {dimension_numbers = #tpu.dot_dimension_numbers<[1], [0], [0], [1], [0, 0, 1, 1], [], []>} : vector<240x24xbf16>, vector<24x4xbf16>, vector<240x4xf32> -> vector<240x4xf32>
    %cst_17 = arith.constant 0.000000e+00 : f32
    %48 = vector.broadcast %cst_17 : f32 to vector<16x4xf32>
    %49 = tpu.concatenate %48, %47 in 0 : vector<16x4xf32>, vector<240x4xf32> -> vector<256x4xf32>
    %50 = arith.addf %43, %49 : vector<256x4xf32>
    %51 = vector.extract_strided_slice %37 {offsets = [16, 0], sizes = [240, 24], strides = [1, 1]} : vector<256x24xbf16> to vector<240x24xbf16>
    %c2 = arith.constant 2 : index
    %c0_18 = arith.constant 0 : index
    %c0_19 = arith.constant 0 : index
    %52 = vector.load %arg2[%c2, %c0_18, %c0_19] : memref<3x24x4xbf16, #tpu.memory_space<vmem>>, vector<1x24x4xbf16>
    %53 = vector.shape_cast %52 : vector<1x24x4xbf16> to vector<24x4xbf16>
    %cst_20 = arith.constant dense<0.000000e+00> : vector<240x4xf32>
    %54 = tpu.matmul %51, %53, %cst_20 {dimension_numbers = #tpu.dot_dimension_numbers<[1], [0], [0], [1], [0, 0, 1, 1], [], []>} : vector<240x24xbf16>, vector<24x4xbf16>, vector<240x4xf32> -> vector<240x4xf32>
    %cst_21 = arith.constant 0.000000e+00 : f32
    %55 = vector.broadcast %cst_21 : f32 to vector<16x4xf32>
    %56 = tpu.concatenate %54, %55 in 0 : vector<240x4xf32>, vector<16x4xf32> -> vector<256x4xf32>
    %57 = arith.addf %50, %56 : vector<256x4xf32>
    %c0_22 = arith.constant 0 : index
    %c0_23 = arith.constant 0 : index
    %c0_24 = arith.constant 0 : index
    %58 = vector.load %arg7[%c0_22, %c0_23, %c0_24] : memref<1x256x4xf32, #tpu.memory_space<vmem>>, vector<1x256x4xf32>
    %59 = vector.shape_cast %58 : vector<1x256x4xf32> to vector<256x4xf32>
    %60 = vector.shape_cast %57 : vector<256x4xf32> to vector<1x256x4xf32>
    tpu.vector_store %arg7[%c0_22, %c0_23, %c0_24], %60 {strides = array<i32>} : memref<1x256x4xf32, #tpu.memory_space<vmem>>, vector<1x256x4xf32>,
    %cst_25 = arith.constant dense<0.000000e+00> : vector<4xf32>
    %61 = vector.multi_reduction <add>, %57, %cst_25 [0] : vector<256x4xf32> to vector<4xf32>
    %62 = vector.shape_cast %61 : vector<4xf32> to vector<1x4xf32>
    %63 = arith.mulf %57, %57 : vector<256x4xf32>
    %cst_26 = arith.constant dense<0.000000e+00> : vector<4xf32>
    %64 = vector.multi_reduction <add>, %63, %cst_26 [0] : vector<256x4xf32> to vector<4xf32>
    %65 = vector.shape_cast %64 : vector<4xf32> to vector<1x4xf32>
    %66 = tpu.concatenate %62, %65 in 0 : vector<1x4xf32>, vector<1x4xf32> -> vector<2x4xf32>
    %c0_27 = arith.constant 0 : index
    %c0_28 = arith.constant 0 : index
    %c0_29 = arith.constant 0 : index
    %67 = vector.load %arg8[%c0_27, %c0_28, %c0_29] : memref<1x2x4xf32, #tpu.memory_space<vmem>>, vector<1x2x4xf32>
    %68 = vector.shape_cast %67 : vector<1x2x4xf32> to vector<2x4xf32>
    %69 = vector.shape_cast %66 : vector<2x4xf32> to vector<1x2x4xf32>
    tpu.vector_store %arg8[%c0_27, %c0_28, %c0_29], %69 {strides = array<i32>} : memref<1x2x4xf32, #tpu.memory_space<vmem>>, vector<1x2x4xf32>,
    return
  }
  func.func @transform_0(%arg0: i32) -> (i32, i32, i32) {
    %c0_i32 = arith.constant 0 : i32
    %c0_i32_0 = arith.constant 0 : i32
    %c0_i32_1 = arith.constant 0 : i32
    return %arg0, %c0_i32, %c0_i32_0 : i32, i32, i32
  }
  func.func @transform_1(%arg0: i32) -> (i32, i32, i32) {
    %c0_i32 = arith.constant 0 : i32
    %c0_i32_0 = arith.constant 0 : i32
    %c0_i32_1 = arith.constant 0 : i32
    %c0_i32_2 = arith.constant 0 : i32
    return %c0_i32, %c0_i32_0, %c0_i32_1 : i32, i32, i32
  }
  func.func @transform_2(%arg0: i32) -> (i32, i32) {
    %c0_i32 = arith.constant 0 : i32
    %c0_i32_0 = arith.constant 0 : i32
    %c0_i32_1 = arith.constant 0 : i32
    return %c0_i32, %c0_i32_0 : i32, i32
  }
  func.func @transform_3(%arg0: i32) -> (i32, i32) {
    %c0_i32 = arith.constant 0 : i32
    %c0_i32_0 = arith.constant 0 : i32
    %c0_i32_1 = arith.constant 0 : i32
    return %c0_i32, %c0_i32_0 : i32, i32
  }
  func.func @transform_4(%arg0: i32) -> (i32, i32) {
    %c0_i32 = arith.constant 0 : i32
    %c0_i32_0 = arith.constant 0 : i32
    %c0_i32_1 = arith.constant 0 : i32
    return %c0_i32, %c0_i32_0 : i32, i32
  }
  func.func @transform_5(%arg0: i32) -> i32 {
    %c0_i32 = arith.constant 0 : i32
    %c0_i32_0 = arith.constant 0 : i32
    return %c0_i32 : i32
  }
  func.func @transform_6(%arg0: i32) -> (i32, i32, i32) {
    %c0_i32 = arith.constant 0 : i32
    %c0_i32_0 = arith.constant 0 : i32
    %c0_i32_1 = arith.constant 0 : i32
    return %arg0, %c0_i32, %c0_i32_0 : i32, i32, i32
  }
  func.func @transform_7(%arg0: i32) -> (i32, i32, i32) {
    %c0_i32 = arith.constant 0 : i32
    %c0_i32_0 = arith.constant 0 : i32
    %c0_i32_1 = arith.constant 0 : i32
    return %arg0, %c0_i32, %c0_i32_0 : i32, i32, i32
  }
}

module attributes {stable_mosaic.version = 11 : i64} {
  func.func @_bn_act_kernel(%arg0: i32, %arg1: memref<1x256x4xf32, #tpu.memory_space<vmem>>, %arg2: memref<1x4xf32, #tpu.memory_space<vmem>>, %arg3: memref<1x4xf32, #tpu.memory_space<vmem>>, %arg4: memref<1xf32, #tpu.memory_space<smem>>, %arg5: memref<1x256x4xf32, #tpu.memory_space<vmem>>) attributes {dimension_semantics = [#tpu.dimension_semantics<parallel>], iteration_bounds = array<i64: 2>, scalar_prefetch = 0 : i64, scratch_operands = 0 : i64, tpu.core_type = #tpu.core_type<tc>, window_params = [{transform_indices = @transform_0, window_bounds = array<i64: 1, 256, 4>}, {pipeline_mode = #tpu.pipeline_mode<synchronous>, transform_indices = @transform_1, window_bounds = array<i64: 1, 4>}, {pipeline_mode = #tpu.pipeline_mode<synchronous>, transform_indices = @transform_2, window_bounds = array<i64: 1, 4>}, {transform_indices = @transform_3, window_bounds = array<i64: 1>}, {transform_indices = @transform_4, window_bounds = array<i64: 1, 256, 4>}]} {
    %c0 = arith.constant 0 : index
    %0 = memref.load %arg4[%c0] : memref<1xf32, #tpu.memory_space<smem>>
    %c0_0 = arith.constant 0 : index
    %c0_1 = arith.constant 0 : index
    %c0_2 = arith.constant 0 : index
    %1 = vector.load %arg1[%c0_0, %c0_1, %c0_2] : memref<1x256x4xf32, #tpu.memory_space<vmem>>, vector<1x256x4xf32>
    %2 = vector.shape_cast %1 : vector<1x256x4xf32> to vector<256x4xf32>
    %c0_3 = arith.constant 0 : index
    %c0_4 = arith.constant 0 : index
    %3 = vector.load %arg2[%c0_3, %c0_4] : memref<1x4xf32, #tpu.memory_space<vmem>>, vector<1x4xf32>
    %4 = vector.broadcast %3 : vector<1x4xf32> to vector<256x4xf32>
    %5 = arith.mulf %2, %4 : vector<256x4xf32>
    %c0_5 = arith.constant 0 : index
    %c0_6 = arith.constant 0 : index
    %6 = vector.load %arg3[%c0_5, %c0_6] : memref<1x4xf32, #tpu.memory_space<vmem>>, vector<1x4xf32>
    %7 = vector.broadcast %6 : vector<1x4xf32> to vector<256x4xf32>
    %8 = arith.addf %5, %7 : vector<256x4xf32>
    %cst = arith.constant 0.000000e+00 : f32
    %9 = vector.broadcast %cst : f32 to vector<256x4xf32>
    %10 = arith.cmpf oge, %8, %9 : vector<256x4xf32>
    %11 = vector.broadcast %0 : f32 to vector<256x4xf32>
    %12 = arith.mulf %11, %8 : vector<256x4xf32>
    %13 = arith.select %10, %8, %12 : vector<256x4xi1>, vector<256x4xf32>
    %c0_7 = arith.constant 0 : index
    %c0_8 = arith.constant 0 : index
    %c0_9 = arith.constant 0 : index
    %14 = vector.load %arg5[%c0_7, %c0_8, %c0_9] : memref<1x256x4xf32, #tpu.memory_space<vmem>>, vector<1x256x4xf32>
    %15 = vector.shape_cast %14 : vector<1x256x4xf32> to vector<256x4xf32>
    %16 = vector.shape_cast %13 : vector<256x4xf32> to vector<1x256x4xf32>
    tpu.vector_store %arg5[%c0_7, %c0_8, %c0_9], %16 {strides = array<i32>} : memref<1x256x4xf32, #tpu.memory_space<vmem>>, vector<1x256x4xf32>,
    return
  }
  func.func @transform_0(%arg0: i32) -> (i32, i32, i32) {
    %c0_i32 = arith.constant 0 : i32
    %c0_i32_0 = arith.constant 0 : i32
    %c0_i32_1 = arith.constant 0 : i32
    return %arg0, %c0_i32, %c0_i32_0 : i32, i32, i32
  }
  func.func @transform_1(%arg0: i32) -> (i32, i32) {
    %c0_i32 = arith.constant 0 : i32
    %c0_i32_0 = arith.constant 0 : i32
    %c0_i32_1 = arith.constant 0 : i32
    return %c0_i32, %c0_i32_0 : i32, i32
  }
  func.func @transform_2(%arg0: i32) -> (i32, i32) {
    %c0_i32 = arith.constant 0 : i32
    %c0_i32_0 = arith.constant 0 : i32
    %c0_i32_1 = arith.constant 0 : i32
    return %c0_i32, %c0_i32_0 : i32, i32
  }
  func.func @transform_3(%arg0: i32) -> i32 {
    %c0_i32 = arith.constant 0 : i32
    %c0_i32_0 = arith.constant 0 : i32
    return %c0_i32 : i32
  }
  func.func @transform_4(%arg0: i32) -> (i32, i32, i32) {
    %c0_i32 = arith.constant 0 : i32
    %c0_i32_0 = arith.constant 0 : i32
    %c0_i32_1 = arith.constant 0 : i32
    return %arg0, %c0_i32, %c0_i32_0 : i32, i32, i32
  }
}

module attributes {stable_mosaic.version = 11 : i64} {
  func.func @_conv_kernel(%arg0: i32, %arg1: memref<1x256x4xf32, #tpu.memory_space<vmem>>, %arg2: memref<3x12x4xbf16, #tpu.memory_space<vmem>>, %arg3: memref<1x4xf32, #tpu.memory_space<vmem>>, %arg4: memref<1x4xf32, #tpu.memory_space<vmem>>, %arg5: memref<1x4xf32, #tpu.memory_space<vmem>>, %arg6: memref<1xf32, #tpu.memory_space<smem>>, %arg7: memref<1x256x4xf32, #tpu.memory_space<vmem>>, %arg8: memref<1x2x4xf32, #tpu.memory_space<vmem>>) attributes {dimension_semantics = [#tpu.dimension_semantics<parallel>], iteration_bounds = array<i64: 2>, scalar_prefetch = 0 : i64, scratch_operands = 0 : i64, tpu.core_type = #tpu.core_type<tc>, window_params = [{transform_indices = @transform_0, window_bounds = array<i64: 1, 256, 4>}, {pipeline_mode = #tpu.pipeline_mode<synchronous>, transform_indices = @transform_1, window_bounds = array<i64: 3, 12, 4>}, {pipeline_mode = #tpu.pipeline_mode<synchronous>, transform_indices = @transform_2, window_bounds = array<i64: 1, 4>}, {pipeline_mode = #tpu.pipeline_mode<synchronous>, transform_indices = @transform_3, window_bounds = array<i64: 1, 4>}, {pipeline_mode = #tpu.pipeline_mode<synchronous>, transform_indices = @transform_4, window_bounds = array<i64: 1, 4>}, {transform_indices = @transform_5, window_bounds = array<i64: 1>}, {transform_indices = @transform_6, window_bounds = array<i64: 1, 256, 4>}, {transform_indices = @transform_7, window_bounds = array<i64: 1, 2, 4>}]} {
    %c0 = arith.constant 0 : index
    %c0_0 = arith.constant 0 : index
    %c0_1 = arith.constant 0 : index
    %0 = vector.load %arg1[%c0, %c0_0, %c0_1] : memref<1x256x4xf32, #tpu.memory_space<vmem>>, vector<1x256x4xf32>
    %1 = vector.shape_cast %0 : vector<1x256x4xf32> to vector<256x4xf32>
    %c0_2 = arith.constant 0 : index
    %c0_3 = arith.constant 0 : index
    %2 = vector.load %arg4[%c0_2, %c0_3] : memref<1x4xf32, #tpu.memory_space<vmem>>, vector<1x4xf32>
    %3 = vector.broadcast %2 : vector<1x4xf32> to vector<256x4xf32>
    %4 = arith.mulf %1, %3 : vector<256x4xf32>
    %c0_4 = arith.constant 0 : index
    %c0_5 = arith.constant 0 : index
    %5 = vector.load %arg5[%c0_4, %c0_5] : memref<1x4xf32, #tpu.memory_space<vmem>>, vector<1x4xf32>
    %6 = vector.broadcast %5 : vector<1x4xf32> to vector<256x4xf32>
    %7 = arith.addf %4, %6 : vector<256x4xf32>
    %c0_6 = arith.constant 0 : index
    %8 = memref.load %arg6[%c0_6] : memref<1xf32, #tpu.memory_space<smem>>
    %cst = arith.constant 0.000000e+00 : f32
    %9 = vector.broadcast %cst : f32 to vector<256x4xf32>
    %10 = arith.cmpf oge, %7, %9 : vector<256x4xf32>
    %11 = vector.broadcast %8 : f32 to vector<256x4xf32>
    %12 = arith.mulf %11, %7 : vector<256x4xf32>
    %13 = arith.select %10, %7, %12 : vector<256x4xi1>, vector<256x4xf32>
    %14 = tpu.iota {dimensions = array<i32: 0>} : vector<256x1xi32>
    %c16_i32 = arith.constant 16 : i32
    %c0_i32 = arith.constant 0 : i32
    %15 = arith.cmpi eq, %c16_i32, %c0_i32 : i32
    %c1_i32 = arith.constant 1 : i32
    %16 = arith.select %15, %c1_i32, %c16_i32 : i32
    %17 = vector.broadcast %16 : i32 to vector<256x1xi32>
    %18 = arith.remsi %14, %17 : vector<256x1xi32>
    %c0_i32_7 = arith.constant 0 : i32
    %19 = vector.broadcast %c0_i32_7 : i32 to vector<256x1xi32>
    %20 = arith.cmpi ne, %18, %19 : vector<256x1xi32>
    %c0_i32_8 = arith.constant 0 : i32
    %21 = vector.broadcast %c0_i32_8 : i32 to vector<256x1xi32>
    %22 = arith.cmpi slt, %18, %21 : vector<256x1xi32>
    %c0_i32_9 = arith.constant 0 : i32
    %23 = arith.cmpi slt, %16, %c0_i32_9 : i32
    %24 = vector.broadcast %23 : i1 to vector<256x1xi1>
    %25 = vector.broadcast %24 : vector<256x1xi1> to vector<256x1xi1>
    %26 = arith.xori %22, %25 : vector<256x1xi1>
    %27 = arith.andi %26, %20 : vector<256x1xi1>
    %28 = vector.broadcast %16 : i32 to vector<256x1xi32>
    %29 = arith.addi %18, %28 : vector<256x1xi32>
    %30 = arith.select %27, %29, %18 : vector<256x1xi1>, vector<256x1xi32>
    %cst_10 = arith.constant 0.000000e+00 : f32
    %31 = vector.broadcast %cst_10 : f32 to vector<1x4xf32>
    %c1_i32_11 = arith.constant 1 : i32
    %32 = vector.broadcast %c1_i32_11 : i32 to vector<256x1xi32>
    %33 = arith.cmpi sge, %30, %32 : vector<256x1xi32>
    %34 = vector.extract_strided_slice %13 {offsets = [0, 0], sizes = [255, 4], strides = [1, 1]} : vector<256x4xf32> to vector<255x4xf32>
    %35 = tpu.concatenate %31, %34 in 0 : vector<1x4xf32>, vector<255x4xf32> -> vector<256x4xf32>
    %cst_12 = arith.constant 0.000000e+00 : f32
    %36 = vector.shape_cast %33 : vector<256x1xi1> to vector<256x1xi1>
    %37 = vector.broadcast %36 : vector<256x1xi1> to vector<256x4xi1>
    %38 = vector.broadcast %cst_12 : f32 to vector<256x4xf32>
    %39 = arith.select %37, %35, %38 : vector<256x4xi1>, vector<256x4xf32>
    %c14_i32 = arith.constant 14 : i32
    %40 = vector.broadcast %c14_i32 : i32 to vector<256x1xi32>
    %41 = arith.cmpi sle, %30, %40 : vector<256x1xi32>
    %42 = vector.extract_strided_slice %13 {offsets = [1, 0], sizes = [255, 4], strides = [1, 1]} : vector<256x4xf32> to vector<255x4xf32>
    %43 = tpu.concatenate %42, %31 in 0 : vector<255x4xf32>, vector<1x4xf32> -> vector<256x4xf32>
    %cst_13 = arith.constant 0.000000e+00 : f32
    %44 = vector.shape_cast %41 : vector<256x1xi1> to vector<256x1xi1>
    %45 = vector.broadcast %44 : vector<256x1xi1> to vector<256x4xi1>
    %46 = vector.broadcast %cst_13 : f32 to vector<256x4xf32>
    %47 = arith.select %45, %43, %46 : vector<256x4xi1>, vector<256x4xf32>
    %48 = tpu.concatenate %39, %13, %47 in 1 : vector<256x4xf32>, vector<256x4xf32>, vector<256x4xf32> -> vector<256x12xf32>
    %49 = arith.truncf %48 : vector<256x12xf32> to vector<256x12xbf16>
    %c1 = arith.constant 1 : index
    %c0_14 = arith.constant 0 : index
    %c0_15 = arith.constant 0 : index
    %50 = vector.load %arg2[%c1, %c0_14, %c0_15] : memref<3x12x4xbf16, #tpu.memory_space<vmem>>, vector<1x12x4xbf16>
    %51 = vector.shape_cast %50 : vector<1x12x4xbf16> to vector<12x4xbf16>
    %cst_16 = arith.constant dense<0.000000e+00> : vector<256x4xf32>
    %52 = tpu.matmul %49, %51, %cst_16 {dimension_numbers = #tpu.dot_dimension_numbers<[1], [0], [0], [1], [0, 0, 1, 1], [], []>} : vector<256x12xbf16>, vector<12x4xbf16>, vector<256x4xf32> -> vector<256x4xf32>
    %c0_17 = arith.constant 0 : index
    %c0_18 = arith.constant 0 : index
    %53 = vector.load %arg3[%c0_17, %c0_18] : memref<1x4xf32, #tpu.memory_space<vmem>>, vector<1x4xf32>
    %54 = vector.broadcast %53 : vector<1x4xf32> to vector<256x4xf32>
    %55 = arith.addf %52, %54 : vector<256x4xf32>
    %56 = vector.extract_strided_slice %49 {offsets = [0, 0], sizes = [240, 12], strides = [1, 1]} : vector<256x12xbf16> to vector<240x12xbf16>
    %c0_19 = arith.constant 0 : index
    %c0_20 = arith.constant 0 : index
    %c0_21 = arith.constant 0 : index
    %57 = vector.load %arg2[%c0_19, %c0_20, %c0_21] : memref<3x12x4xbf16, #tpu.memory_space<vmem>>, vector<1x12x4xbf16>
    %58 = vector.shape_cast %57 : vector<1x12x4xbf16> to vector<12x4xbf16>
    %cst_22 = arith.constant dense<0.000000e+00> : vector<240x4xf32>
    %59 = tpu.matmul %56, %58, %cst_22 {dimension_numbers = #tpu.dot_dimension_numbers<[1], [0], [0], [1], [0, 0, 1, 1], [], []>} : vector<240x12xbf16>, vector<12x4xbf16>, vector<240x4xf32> -> vector<240x4xf32>
    %cst_23 = arith.constant 0.000000e+00 : f32
    %60 = vector.broadcast %cst_23 : f32 to vector<16x4xf32>
    %61 = tpu.concatenate %60, %59 in 0 : vector<16x4xf32>, vector<240x4xf32> -> vector<256x4xf32>
    %62 = arith.addf %55, %61 : vector<256x4xf32>
    %63 = vector.extract_strided_slice %49 {offsets = [16, 0], sizes = [240, 12], strides = [1, 1]} : vector<256x12xbf16> to vector<240x12xbf16>
    %c2 = arith.constant 2 : index
    %c0_24 = arith.constant 0 : index
    %c0_25 = arith.constant 0 : index
    %64 = vector.load %arg2[%c2, %c0_24, %c0_25] : memref<3x12x4xbf16, #tpu.memory_space<vmem>>, vector<1x12x4xbf16>
    %65 = vector.shape_cast %64 : vector<1x12x4xbf16> to vector<12x4xbf16>
    %cst_26 = arith.constant dense<0.000000e+00> : vector<240x4xf32>
    %66 = tpu.matmul %63, %65, %cst_26 {dimension_numbers = #tpu.dot_dimension_numbers<[1], [0], [0], [1], [0, 0, 1, 1], [], []>} : vector<240x12xbf16>, vector<12x4xbf16>, vector<240x4xf32> -> vector<240x4xf32>
    %cst_27 = arith.constant 0.000000e+00 : f32
    %67 = vector.broadcast %cst_27 : f32 to vector<16x4xf32>
    %68 = tpu.concatenate %66, %67 in 0 : vector<240x4xf32>, vector<16x4xf32> -> vector<256x4xf32>
    %69 = arith.addf %62, %68 : vector<256x4xf32>
    %c0_28 = arith.constant 0 : index
    %c0_29 = arith.constant 0 : index
    %c0_30 = arith.constant 0 : index
    %70 = vector.load %arg7[%c0_28, %c0_29, %c0_30] : memref<1x256x4xf32, #tpu.memory_space<vmem>>, vector<1x256x4xf32>
    %71 = vector.shape_cast %70 : vector<1x256x4xf32> to vector<256x4xf32>
    %72 = vector.shape_cast %69 : vector<256x4xf32> to vector<1x256x4xf32>
    tpu.vector_store %arg7[%c0_28, %c0_29, %c0_30], %72 {strides = array<i32>} : memref<1x256x4xf32, #tpu.memory_space<vmem>>, vector<1x256x4xf32>,
    %cst_31 = arith.constant dense<0.000000e+00> : vector<4xf32>
    %73 = vector.multi_reduction <add>, %69, %cst_31 [0] : vector<256x4xf32> to vector<4xf32>
    %74 = vector.shape_cast %73 : vector<4xf32> to vector<1x4xf32>
    %75 = arith.mulf %69, %69 : vector<256x4xf32>
    %cst_32 = arith.constant dense<0.000000e+00> : vector<4xf32>
    %76 = vector.multi_reduction <add>, %75, %cst_32 [0] : vector<256x4xf32> to vector<4xf32>
    %77 = vector.shape_cast %76 : vector<4xf32> to vector<1x4xf32>
    %78 = tpu.concatenate %74, %77 in 0 : vector<1x4xf32>, vector<1x4xf32> -> vector<2x4xf32>
    %c0_33 = arith.constant 0 : index
    %c0_34 = arith.constant 0 : index
    %c0_35 = arith.constant 0 : index
    %79 = vector.load %arg8[%c0_33, %c0_34, %c0_35] : memref<1x2x4xf32, #tpu.memory_space<vmem>>, vector<1x2x4xf32>
    %80 = vector.shape_cast %79 : vector<1x2x4xf32> to vector<2x4xf32>
    %81 = vector.shape_cast %78 : vector<2x4xf32> to vector<1x2x4xf32>
    tpu.vector_store %arg8[%c0_33, %c0_34, %c0_35], %81 {strides = array<i32>} : memref<1x2x4xf32, #tpu.memory_space<vmem>>, vector<1x2x4xf32>,
    return
  }
  func.func @transform_0(%arg0: i32) -> (i32, i32, i32) {
    %c0_i32 = arith.constant 0 : i32
    %c0_i32_0 = arith.constant 0 : i32
    %c0_i32_1 = arith.constant 0 : i32
    return %arg0, %c0_i32, %c0_i32_0 : i32, i32, i32
  }
  func.func @transform_1(%arg0: i32) -> (i32, i32, i32) {
    %c0_i32 = arith.constant 0 : i32
    %c0_i32_0 = arith.constant 0 : i32
    %c0_i32_1 = arith.constant 0 : i32
    %c0_i32_2 = arith.constant 0 : i32
    return %c0_i32, %c0_i32_0, %c0_i32_1 : i32, i32, i32
  }
  func.func @transform_2(%arg0: i32) -> (i32, i32) {
    %c0_i32 = arith.constant 0 : i32
    %c0_i32_0 = arith.constant 0 : i32
    %c0_i32_1 = arith.constant 0 : i32
    return %c0_i32, %c0_i32_0 : i32, i32
  }
  func.func @transform_3(%arg0: i32) -> (i32, i32) {
    %c0_i32 = arith.constant 0 : i32
    %c0_i32_0 = arith.constant 0 : i32
    %c0_i32_1 = arith.constant 0 : i32
    return %c0_i32, %c0_i32_0 : i32, i32
  }
  func.func @transform_4(%arg0: i32) -> (i32, i32) {
    %c0_i32 = arith.constant 0 : i32
    %c0_i32_0 = arith.constant 0 : i32
    %c0_i32_1 = arith.constant 0 : i32
    return %c0_i32, %c0_i32_0 : i32, i32
  }
  func.func @transform_5(%arg0: i32) -> i32 {
    %c0_i32 = arith.constant 0 : i32
    %c0_i32_0 = arith.constant 0 : i32
    return %c0_i32 : i32
  }
  func.func @transform_6(%arg0: i32) -> (i32, i32, i32) {
    %c0_i32 = arith.constant 0 : i32
    %c0_i32_0 = arith.constant 0 : i32
    %c0_i32_1 = arith.constant 0 : i32
    return %arg0, %c0_i32, %c0_i32_0 : i32, i32, i32
  }
  func.func @transform_7(%arg0: i32) -> (i32, i32, i32) {
    %c0_i32 = arith.constant 0 : i32
    %c0_i32_0 = arith.constant 0 : i32
    %c0_i32_1 = arith.constant 0 : i32
    return %arg0, %c0_i32, %c0_i32_0 : i32, i32, i32
  }
}

</mosaic_0001>

<bundles_post_ra>
// kernel: unet_up_block.7
= control target key start
LH: loop header
LB: loop body
LE: loop exit
PB: predicated region body
PF: predicated region fallthrough
CT: control target
= control target key end

     0   :  { %s554_s17 = smov 0   ;;  %s782_s0 = inlined_call_operand.vmem [shape: f32[2,256,4], index: 0, kind: input, shape index: {}]   ;;  %s783_s1 = inlined_call_operand.vmem [shape: f32[1,4], index: 1, kind: input, shape index: {}]   ;;  %s784_s2 = inlined_call_operand.vmem [shape: f32[1,4], index: 2, kind: input, shape index: {}]   ;;  %s785_s3 = inlined_call_operand.<no memory space> [shape: f32[1], index: 3, kind: input, shape index: {}]   ;;  %s786_s4 = inlined_call_operand.vmem [shape: f32[2,256,4], index: 4, kind: output, shape index: {}]  }
   0x1   :  { %9 = sst [smem:[#allocation2]] %s785_s3 }
   0x2 LB: > { %s495_s18 = sadd.s32 4294967295, %s524_s17   ;;  %p499_p0 = scmp.ge.s32.totalorder %s524_s17, 1  ;;  %s524_s17 = sphi %s554_s17, %s15_s17  }
   0x3   : > { %p163_p1 = scmp.lt.s32.totalorder %s524_s17, 3 }
   0x5   : > { %p164_p2 = pnand %p499_p0, %p163_p1 }
   0x6   : > { %p189_p3 = scmp.lt.s32.totalorder (!%p164_p2), %s495_s18, 1  ;;  %s199_s19 = sld [smem:[#allocation2]] (!%p164_p2)  ;;  %v568_v0 = vld [vmem:[%s783_s1] ss:$0 sm:$0xff] (!%p164_p2)  ;;  %vm407_vm0 = vcmask (!%p164_p2), 31744  }
   0x7   : > { %167 = sbr.rel (%p164_p2) target bundleno = 63 (0x3f), region = 36  ;;  %v578_v1 = vld [vmem:[%s784_s2] ss:$0 sm:$0xff] (!%p164_p2) }
   0xc   : > { %v589_v11 = vstv (!%p164_p2), %s199_s19 }
   0xe   : > { %s788_s18 = smov (!%p189_p3, %s495_s18), 1 }
   0xf   : > { %s508_s3 = sshll.u32 %s788_s18, 8 }
  0x10   : > { %s573_s24 = scalar_lea.vmem %s782_s0, %s508_s3  ;;  %s607_s29 = scalar_lea.vmem %s786_s4, %s508_s3 }
  0x11   : > { %v200_v2 = vld [vmem:[%s573_s24] sm:$0xff]  ;;  %v201_v3 = vld [vmem:[%s573_s24 + $0x8] sm:$0xff]  ;;  %v202_v4 = vld [vmem:[%s573_s24 + $0x10] sm:$0xff] }
  0x12   : > { %v239_v5 = vmul.f32 %v568_v0, %v200_v2  ;;  %v240_v6 = vmul.f32 %v568_v0, %v201_v3  ;;  %v241_v7 = vmul.f32 %v568_v0, %v202_v4  ;;  %v203_v8 = vld [vmem:[%s573_s24 + $0x18] sm:$0xff]  ;;  %v204_v9 = vld [vmem:[%s573_s24 + $0x20] sm:$0xff]  ;;  %v205_v10 = vld [vmem:[%s573_s24 + $0x28] sm:$0xff] }
  0x13   : > { %v242_v12 = vmul.f32 %v568_v0, %v203_v8  ;;  %v243_v13 = vmul.f32 %v568_v0, %v204_v9  ;;  %v244_v14 = vmul.f32 %v568_v0, %v205_v10  ;;  %v206_v15 = vld [vmem:[%s573_s24 + $0x30] sm:$0xff]  ;;  %v207_v16 = vld [vmem:[%s573_s24 + $0x38] sm:$0xff]  ;;  %v208_v29 = vld [vmem:[%s573_s24 + $0x40] sm:$0xff] }
  0x14   : > { %v278_v17 = vadd.f32 %v578_v1, %v239_v5  ;;  %v279_v18 = vadd.f32 %v578_v1, %v240_v6  ;;  %v280_v19 = vadd.f32 %v578_v1, %v241_v7  ;;  %v245_v20 = vmul.f32 %v568_v0, %v206_v15  ;;  %v209_v33 = vld [vmem:[%s573_s24 + $0x48] sm:$0xff]  ;;  %v210_v34 = vld [vmem:[%s573_s24 + $0x50] sm:$0xff]  ;;  %v211_v35 = vld [vmem:[%s573_s24 + $0x58] sm:$0xff] }
  0x15   : > { %v281_v21 = vadd.f32 %v578_v1, %v242_v12  ;;  %v282_v22 = vadd.f32 %v578_v1, %v243_v13  ;;  %v283_v23 = vadd.f32 %v578_v1, %v244_v14  ;;  %v246_v24 = vmul.f32 %v568_v0, %v207_v16  ;;  %v212_v47 = vld [vmem:[%s573_s24 + $0x60] sm:$0xff]  ;;  %v213_v48 = vld [vmem:[%s573_s24 + $0x68] sm:$0xff]  ;;  %v214_v61 = vld [vmem:[%s573_s24 + $0x70] sm:$0xff] }
  0x16   : > { %vm310_vm1 = vcmp.ge.f32.partialorder %v278_v17, 0.0  ;;  %v343_v25 = vmul.f32 %v589_v11, %v278_v17  ;;  %vm311_vm2 = vcmp.ge.f32.partialorder %v279_v18, 0.0  ;;  %v344_v26 = vmul.f32 %v589_v11, %v279_v18  ;;  %v215_v62 = vld [vmem:[%s573_s24 + $0x78] sm:$0xff]  ;;  %v216_v7 = vld [vmem:[%s573_s24 + $0x80] sm:$0xff]  ;;  %v217_v8 = vld [vmem:[%s573_s24 + $0x88] sm:$0xff] }
  0x17   : > { %vm312_vm3 = vcmp.ge.f32.partialorder %v280_v19, 0.0  ;;  %v345_v27 = vmul.f32 %v589_v11, %v280_v19  ;;  %vm313_vm4 = vcmp.ge.f32.partialorder %v281_v21, 0.0  ;;  %v346_v28 = vmul.f32 %v589_v11, %v281_v21  ;;  %v218_v14 = vld [vmem:[%s573_s24 + $0x90] sm:$0xff]  ;;  %v219_v15 = vld [vmem:[%s573_s24 + $0x98] sm:$0xff] }
  0x18   : > { %v375_v30 = vsel %vm310_vm1, %v278_v17, %v343_v25  ;;  %v376_v31 = vsel %vm311_vm2, %v279_v18, %v344_v26  ;;  %vm314_vm5 = vcmp.ge.f32.partialorder %v282_v22, 0.0  ;;  %v347_v32 = vmul.f32 %v589_v11, %v282_v22  ;;  %v220_v26 = vld [vmem:[%s573_s24 + $0xa0] sm:$0xff] }
  0x19   : > { %408 = vst.msk [vmem:[%s607_s29] sm:$0xff] %vm407_vm0, %v375_v30  ;;  %409 = vst.msk [vmem:[%s607_s29 + $0x8] sm:$0xff] %vm407_vm0, %v376_v31  ;;  %v377_v36 = vsel %vm312_vm3, %v280_v19, %v345_v27  ;;  %v378_v37 = vsel %vm313_vm4, %v281_v21, %v346_v28  ;;  %vm315_vm6 = vcmp.ge.f32.partialorder %v283_v23, 0.0  ;;  %v348_v38 = vmul.f32 %v589_v11, %v283_v23  ;;  %v221_v27 = vld [vmem:[%s573_s24 + $0xa8] sm:$0xff] }
  0x1a   : > { %410 = vst.msk [vmem:[%s607_s29 + $0x10] sm:$0xff] %vm407_vm0, %v377_v36  ;;  %411 = vst.msk [vmem:[%s607_s29 + $0x18] sm:$0xff] %vm407_vm0, %v378_v37  ;;  %v379_v39 = vsel %vm314_vm5, %v282_v22, %v347_v32  ;;  %v284_v40 = vadd.f32 %v578_v1, %v245_v20  ;;  %v285_v41 = vadd.f32 %v578_v1, %v246_v24 }
  0x1b   : > { %v247_v42 = vmul.f32 %v568_v0, %v208_v29  ;;  %412 = vst.msk [vmem:[%s607_s29 + $0x20] sm:$0xff] %vm407_vm0, %v379_v39  ;;  %v380_v43 = vsel %vm315_vm6, %v283_v23, %v348_v38  ;;  %v248_v44 = vmul.f32 %v568_v0, %v209_v33  ;;  %v249_v45 = vmul.f32 %v568_v0, %v210_v34 }
  0x1c   : > { %v250_v46 = vmul.f32 %v568_v0, %v211_v35  ;;  %413 = vst.msk [vmem:[%s607_s29 + $0x28] sm:$0xff] %vm407_vm0, %v380_v43  ;;  %vm316_vm7 = vcmp.ge.f32.partialorder %v284_v40, 0.0  ;;  %v349_v49 = vmul.f32 %v589_v11, %v284_v40  ;;  %vm317_vm8 = vcmp.ge.f32.partialorder %v285_v41, 0.0 }
  0x1d   : > { %v350_v50 = vmul.f32 %v589_v11, %v285_v41  ;;  %v286_v51 = vadd.f32 %v578_v1, %v247_v42  ;;  %v287_v52 = vadd.f32 %v578_v1, %v248_v44  ;;  %v288_v53 = vadd.f32 %v578_v1, %v249_v45 }
  0x1e   : > { %v289_v54 = vadd.f32 %v578_v1, %v250_v46  ;;  %v381_v55 = vsel %vm316_vm7, %v284_v40, %v349_v49  ;;  %v251_v57 = vmul.f32 %v568_v0, %v212_v47  ;;  %v252_v58 = vmul.f32 %v568_v0, %v213_v48  ;;  %v222_v40 = vld [vmem:[%s573_s24 + $0xb0] sm:$0xff]  ;;  %v224_v48 = vld [vmem:[%s573_s24 + $0xc0] sm:$0xff]  ;;  %v225_v49 = vld [vmem:[%s573_s24 + $0xc8] sm:$0xff] }
  0x1f   : > { %v382_v56 = vsel %vm317_vm8, %v285_v41, %v350_v50  ;;  %414 = vst.msk [vmem:[%s607_s29 + $0x30] sm:$0xff] %vm407_vm0, %v381_v55  ;;  %vm318_vm9 = vcmp.ge.f32.partialorder %v286_v51, 0.0  ;;  %v351_v59 = vmul.f32 %v589_v11, %v286_v51  ;;  %vm319_vm10 = vcmp.ge.f32.partialorder %v287_v52, 0.0  ;;  %v223_v41 = vld [vmem:[%s573_s24 + $0xb8] sm:$0xff] }
  0x20   : > { %415 = vst.msk [vmem:[%s607_s29 + $0x38] sm:$0xff] %vm407_vm0, %v382_v56  ;;  %v352_v60 = vmul.f32 %v589_v11, %v287_v52  ;;  %vm320_vm11 = vcmp.ge.f32.partialorder %v288_v53, 0.0  ;;  %v353_v63 = vmul.f32 %v589_v11, %v288_v53  ;;  %vm321_vm12 = vcmp.ge.f32.partialorder %v289_v54, 0.0  ;;  %v227_v55 = vld [vmem:[%s573_s24 + $0xd8] sm:$0xff] }
  0x21   : > { %v354_v2 = vmul.f32 %v589_v11, %v289_v54  ;;  %v383_v3 = vsel %vm318_vm9, %v286_v51, %v351_v59  ;;  %v290_v5 = vadd.f32 %v578_v1, %v251_v57  ;;  %v291_v6 = vadd.f32 %v578_v1, %v252_v58 }
  0x22   : > { %v384_v4 = vsel %vm319_vm10, %v287_v52, %v352_v60  ;;  %416 = vst.msk [vmem:[%s607_s29 + $0x40] sm:$0xff] %vm407_vm0, %v383_v3  ;;  %v385_v9 = vsel %vm320_vm11, %v288_v53, %v353_v63  ;;  %v253_v12 = vmul.f32 %v568_v0, %v214_v61  ;;  %v254_v13 = vmul.f32 %v568_v0, %v215_v62 }
  0x23   : > { %417 = vst.msk [vmem:[%s607_s29 + $0x48] sm:$0xff] %vm407_vm0, %v384_v4  ;;  %v386_v10 = vsel %vm321_vm12, %v289_v54, %v354_v2  ;;  %418 = vst.msk [vmem:[%s607_s29 + $0x50] sm:$0xff] %vm407_vm0, %v385_v9  ;;  %vm322_vm13 = vcmp.ge.f32.partialorder %v290_v5, 0.0  ;;  %v355_v16 = vmul.f32 %v589_v11, %v290_v5  ;;  %vm323_vm14 = vcmp.ge.f32.partialorder %v291_v6, 0.0  ;;  %v226_v54 = vld [vmem:[%s573_s24 + $0xd0] sm:$0xff]  ;;  %v228_v4 = vld [vmem:[%s573_s24 + $0xe0] sm:$0xff] }
  0x24   : > { %419 = vst.msk [vmem:[%s607_s29 + $0x58] sm:$0xff] %vm407_vm0, %v386_v10  ;;  %v356_v17 = vmul.f32 %v589_v11, %v291_v6  ;;  %v292_v18 = vadd.f32 %v578_v1, %v253_v12  ;;  %v293_v19 = vadd.f32 %v578_v1, %v254_v13  ;;  %v255_v20 = vmul.f32 %v568_v0, %v216_v7 }
  0x25   : > { %v256_v21 = vmul.f32 %v568_v0, %v217_v8  ;;  %v387_v22 = vsel %vm322_vm13, %v290_v5, %v355_v16  ;;  %v257_v24 = vmul.f32 %v568_v0, %v218_v14  ;;  %v258_v25 = vmul.f32 %v568_v0, %v219_v15  ;;  %v229_v5 = vld [vmem:[%s573_s24 + $0xe8] sm:$0xff] }
  0x26   : > { %v388_v23 = vsel %vm323_vm14, %v291_v6, %v356_v17  ;;  %420 = vst.msk [vmem:[%s607_s29 + $0x60] sm:$0xff] %vm407_vm0, %v387_v22  ;;  %vm324_vm15 = vcmp.ge.f32.partialorder %v292_v18, 0.0  ;;  %v357_v28 = vmul.f32 %v589_v11, %v292_v18  ;;  %vm325_vm1 = vcmp.ge.f32.partialorder %v293_v19, 0.0 }
  0x27   : > { %421 = vst.msk [vmem:[%s607_s29 + $0x68] sm:$0xff] %vm407_vm0, %v388_v23  ;;  %v358_v29 = vmul.f32 %v589_v11, %v293_v19  ;;  %v294_v30 = vadd.f32 %v578_v1, %v255_v20  ;;  %v295_v31 = vadd.f32 %v578_v1, %v256_v21  ;;  %v296_v32 = vadd.f32 %v578_v1, %v257_v24  ;;  %v231_v20 = vld [vmem:[%s573_s24 + $0xf8] sm:$0xff] }
  0x28   : > { %v297_v33 = vadd.f32 %v578_v1, %v258_v25  ;;  %v389_v34 = vsel %vm324_vm15, %v292_v18, %v357_v28  ;;  %v259_v36 = vmul.f32 %v568_v0, %v220_v26  ;;  %v260_v37 = vmul.f32 %v568_v0, %v221_v27 }
  0x29   : > { %v390_v35 = vsel %vm325_vm1, %v293_v19, %v358_v29  ;;  %422 = vst.msk [vmem:[%s607_s29 + $0x70] sm:$0xff] %vm407_vm0, %v389_v34  ;;  %vm326_vm2 = vcmp.ge.f32.partialorder %v294_v30, 0.0  ;;  %v359_v38 = vmul.f32 %v589_v11, %v294_v30  ;;  %vm327_vm3 = vcmp.ge.f32.partialorder %v295_v31, 0.0  ;;  %v230_v19 = vld [vmem:[%s573_s24 + $0xf0] sm:$0xff] }
  0x2a   : > { %423 = vst.msk [vmem:[%s607_s29 + $0x78] sm:$0xff] %vm407_vm0, %v390_v35  ;;  %v360_v39 = vmul.f32 %v589_v11, %v295_v31  ;;  %vm328_vm4 = vcmp.ge.f32.partialorder %v296_v32, 0.0  ;;  %v361_v42 = vmul.f32 %v589_v11, %v296_v32  ;;  %vm329_vm5 = vcmp.ge.f32.partialorder %v297_v33, 0.0 }
  0x2b   : > { %v362_v43 = vmul.f32 %v589_v11, %v297_v33  ;;  %v391_v44 = vsel %vm326_vm2, %v294_v30, %v359_v38  ;;  %v298_v46 = vadd.f32 %v578_v1, %v259_v36  ;;  %v299_v47 = vadd.f32 %v578_v1, %v260_v37 }
  0x2c   : > { %v392_v45 = vsel %vm327_vm3, %v295_v31, %v360_v39  ;;  %424 = vst.msk [vmem:[%s607_s29 + $0x80] sm:$0xff] %vm407_vm0, %v391_v44  ;;  %v393_v50 = vsel %vm328_vm4, %v296_v32, %v361_v42  ;;  %v261_v52 = vmul.f32 %v568_v0, %v222_v40  ;;  %v262_v53 = vmul.f32 %v568_v0, %v223_v41 }
  0x2d   : > { %425 = vst.msk [vmem:[%s607_s29 + $0x88] sm:$0xff] %vm407_vm0, %v392_v45  ;;  %v394_v51 = vsel %vm329_vm5, %v297_v33, %v362_v43  ;;  %426 = vst.msk [vmem:[%s607_s29 + $0x90] sm:$0xff] %vm407_vm0, %v393_v50  ;;  %vm330_vm6 = vcmp.ge.f32.partialorder %v298_v46, 0.0  ;;  %v363_v56 = vmul.f32 %v589_v11, %v298_v46  ;;  %vm331_vm7 = vcmp.ge.f32.partialorder %v299_v47, 0.0 }
  0x2e   : > { %427 = vst.msk [vmem:[%s607_s29 + $0x98] sm:$0xff] %vm407_vm0, %v394_v51  ;;  %v364_v57 = vmul.f32 %v589_v11, %v299_v47  ;;  %v300_v58 = vadd.f32 %v578_v1, %v261_v52  ;;  %v301_v59 = vadd.f32 %v578_v1, %v262_v53  ;;  %v263_v60 = vmul.f32 %v568_v0, %v224_v48 }
  0x2f   : > { %v264_v61 = vmul.f32 %v568_v0, %v225_v49  ;;  %v395_v62 = vsel %vm330_vm6, %v298_v46, %v363_v56  ;;  %v265_v2 = vmul.f32 %v568_v0, %v226_v54  ;;  %v266_v3 = vmul.f32 %v568_v0, %v227_v55 }
  0x30   : > { %v396_v63 = vsel %vm331_vm7, %v299_v47, %v364_v57  ;;  %428 = vst.msk [vmem:[%s607_s29 + $0xa0] sm:$0xff] %vm407_vm0, %v395_v62  ;;  %vm332_vm8 = vcmp.ge.f32.partialorder %v300_v58, 0.0  ;;  %v365_v6 = vmul.f32 %v589_v11, %v300_v58  ;;  %vm333_vm9 = vcmp.ge.f32.partialorder %v301_v59, 0.0 }
  0x31   : > { %429 = vst.msk [vmem:[%s607_s29 + $0xa8] sm:$0xff] %vm407_vm0, %v396_v63  ;;  %v366_v7 = vmul.f32 %v589_v11, %v301_v59  ;;  %v302_v8 = vadd.f32 %v578_v1, %v263_v60  ;;  %v303_v9 = vadd.f32 %v578_v1, %v264_v61  ;;  %v304_v10 = vadd.f32 %v578_v1, %v265_v2 }
  0x32   : > { %v305_v12 = vadd.f32 %v578_v1, %v266_v3  ;;  %v397_v13 = vsel %vm332_vm8, %v300_v58, %v365_v6  ;;  %v267_v15 = vmul.f32 %v568_v0, %v228_v4  ;;  %v268_v16 = vmul.f32 %v568_v0, %v229_v5 }
  0x33   : > { %v398_v14 = vsel %vm333_vm9, %v301_v59, %v366_v7  ;;  %430 = vst.msk [vmem:[%s607_s29 + $0xb0] sm:$0xff] %vm407_vm0, %v397_v13  ;;  %vm334_vm10 = vcmp.ge.f32.partialorder %v302_v8, 0.0  ;;  %v367_v17 = vmul.f32 %v589_v11, %v302_v8  ;;  %vm335_vm11 = vcmp.ge.f32.partialorder %v303_v9, 0.0 }
  0x34   : > { %431 = vst.msk [vmem:[%s607_s29 + $0xb8] sm:$0xff] %vm407_vm0, %v398_v14  ;;  %v368_v18 = vmul.f32 %v589_v11, %v303_v9  ;;  %vm336_vm12 = vcmp.ge.f32.partialorder %v304_v10, 0.0  ;;  %v369_v21 = vmul.f32 %v589_v11, %v304_v10  ;;  %vm337_vm13 = vcmp.ge.f32.partialorder %v305_v12, 0.0 }
  0x35   : > { %v370_v22 = vmul.f32 %v589_v11, %v305_v12  ;;  %v399_v23 = vsel %vm334_vm10, %v302_v8, %v367_v17  ;;  %v306_v25 = vadd.f32 %v578_v1, %v267_v15  ;;  %v307_v26 = vadd.f32 %v578_v1, %v268_v16 }
  0x36   : > { %v400_v24 = vsel %vm335_vm11, %v303_v9, %v368_v18  ;;  %432 = vst.msk [vmem:[%s607_s29 + $0xc0] sm:$0xff] %vm407_vm0, %v399_v23  ;;  %v401_v27 = vsel %vm336_vm12, %v304_v10, %v369_v21  ;;  %v269_v29 = vmul.f32 %v568_v0, %v230_v19  ;;  %v270_v30 = vmul.f32 %v568_v0, %v231_v20 }
  0x37   : > { %433 = vst.msk [vmem:[%s607_s29 + $0xc8] sm:$0xff] %vm407_vm0, %v400_v24  ;;  %v402_v28 = vsel %vm337_vm13, %v305_v12, %v370_v22  ;;  %434 = vst.msk [vmem:[%s607_s29 + $0xd0] sm:$0xff] %vm407_vm0, %v401_v27  ;;  %vm338_vm14 = vcmp.ge.f32.partialorder %v306_v25, 0.0  ;;  %v371_v31 = vmul.f32 %v589_v11, %v306_v25  ;;  %vm339_vm15 = vcmp.ge.f32.partialorder %v307_v26, 0.0 }
  0x38   : > { %435 = vst.msk [vmem:[%s607_s29 + $0xd8] sm:$0xff] %vm407_vm0, %v402_v28  ;;  %v372_v32 = vmul.f32 %v589_v11, %v307_v26  ;;  %v308_v33 = vadd.f32 %v578_v1, %v269_v29  ;;  %v309_v34 = vadd.f32 %v578_v1, %v270_v30 }
  0x39   : > { %v403_v35 = vsel %vm338_vm14, %v306_v25, %v371_v31 }
  0x3a   : > { %v404_v36 = vsel %vm339_vm15, %v307_v26, %v372_v32  ;;  %436 = vst.msk [vmem:[%s607_s29 + $0xe0] sm:$0xff] %vm407_vm0, %v403_v35  ;;  %vm340_vm1 = vcmp.ge.f32.partialorder %v308_v33, 0.0  ;;  %v373_v0 = vmul.f32 %v589_v11, %v308_v33  ;;  %vm341_vm2 = vcmp.ge.f32.partialorder %v309_v34, 0.0 }
  0x3b   : > { %437 = vst.msk [vmem:[%s607_s29 + $0xe8] sm:$0xff] %vm407_vm0, %v404_v36  ;;  %v374_v37 = vmul.f32 %v589_v11, %v309_v34 }
  0x3c   : > { %v405_v38 = vsel %vm340_vm1, %v308_v33, %v373_v0 }
  0x3d   : > { %v406_v39 = vsel %vm341_vm2, %v309_v34, %v374_v37  ;;  %438 = vst.msk [vmem:[%s607_s29 + $0xf0] sm:$0xff] %vm407_vm0, %v405_v38 }
  0x3e   : > { %439 = vst.msk [vmem:[%s607_s29 + $0xf8] sm:$0xff] %vm407_vm0, %v406_v39 }
  0x3f PF: > { %s15_s17 = sadd.s32 1, %s524_s17  }
  0x40   : > { %p12_p4 = scmp.ge.s32.totalorder %s15_s17, 4  }
  0x42   :  { %14 = sbr.rel (!%p12_p4) target bundleno = 2 (0x2), region = 66 }

// kernel: unet_up_block.4
= control target key start
LH: loop header
LB: loop body
LE: loop exit
PB: predicated region body
PF: predicated region fallthrough
CT: control target
= control target key end

     0   :  { %s2981_s24 = smov 0   ;;  %s4198_s0 = inlined_call_operand.vmem [shape: f32[2,256,8], index: 0, kind: input, shape index: {}]   ;;  %s4199_s1 = inlined_call_operand.vmem [shape: bf16[3,24,4], index: 1, kind: input, shape index: {}]   ;;  %s4200_s2 = inlined_call_operand.vmem [shape: f32[1,4], index: 2, kind: input, shape index: {}]   ;;  %s4201_s3 = inlined_call_operand.vmem [shape: f32[1,8], index: 3, kind: input, shape index: {}]   ;;  %s4202_s4 = inlined_call_operand.vmem [shape: f32[1,8], index: 4, kind: input, shape index: {}]   ;;  %s4203_s5 = inlined_call_operand.<no memory space> [shape: f32[1], index: 5, kind: input, shape index: {}]   ;;  %s4204_s6 = inlined_call_operand.vmem [shape: f32[2,256,4], index: 6, kind: output, shape index: {0}]   ;;  %s4205_s7 = inlined_call_operand.vmem [shape: f32[2,2,4], index: 7, kind: output, shape index: {1}]  }
   0x1 LB: > { %s2456_s3 = sadd.s32 4294967295, %s2935_s24   ;;  %p2460_p0 = scmp.ge.s32.totalorder %s2935_s24, 1  ;;  %s2935_s24 = sphi %s2981_s24, %s19_s24  }
   0x2   : > { %p241_p1 = scmp.lt.s32.totalorder %s2935_s24, 3 }
   0x4   : > { %p242_p2 = pnand %p2460_p0, %p241_p1 }
   0x5   : > { %p277_p3 = scmp.lt.s32.totalorder (!%p242_p2), %s2456_s3, 1  ;;  %v324_v0 = vlaneseq (!%p242_p2)  ;;  %v2923_v2 = vld [vmem:[%s4199_s1 + $0xc] sm:$0xff] (!%p242_p2)   ;;  %vm1030_vm0 = vcmask (!%p242_p2), 1046528   ;;  %s2937_s29 = smov (!%p242_p2), 8   ;;  %vm805_vm11 = vcmask (!%p242_p2), 1040384  }
   0x6   : > { %245 = sbr.rel (%p242_p2) target bundleno = 556 (0x22c), region = 44  ;;  %2581 = vmatprep.subr.bf16.mxu0 (!%p242_p2), %v2923_v2  ;;  %2745 = vmatprep.subr.bf16.mxu1 (!%p242_p2), %v2923_v2  ;;  %s2938_s30 = smov (!%p242_p2), 16  }
   0x7   : > { %v2991_v1 = vshrl.u32 (!%p242_p2), %v324_v0, 7  ;;  %2582 = vmatpush3.bf16.msra.mxu0 (!%p242_p2), %v2923_v2  ;;  %2747 = vmatpush3.bf16.msra.mxu1 (!%p242_p2), %v2923_v2 }
   0x9   : > { %v326_v3 = vadd.s32 (!%p242_p2), 8, %v2991_v1  ;;  %v328_v4 = vadd.s32 (!%p242_p2), 24, %v2991_v1  ;;  %v342_v5 = vadd.s32 (!%p242_p2), 136, %v2991_v1  ;;  %v344_v17 = vadd.s32 (!%p242_p2), 152, %v2991_v1 }
   0xa   : > { %v330_v29 = vadd.s32 (!%p242_p2), 40, %v2991_v1  ;;  %v332_v51 = vadd.s32 (!%p242_p2), 56, %v2991_v1 }
   0xb   : > { %v368_v9 = vand.u32 (!%p242_p2), 15, %v326_v3  ;;  %v382_v21 = vand.u32 (!%p242_p2), 15, %v328_v4  ;;  %v480_v22 = vand.u32 (!%p242_p2), 15, %v342_v5  ;;  %v494_v42 = vand.u32 (!%p242_p2), 15, %v344_v17 }
   0xc   : > { %v396_v61 = vand.u32 (!%p242_p2), 15, %v330_v29  ;;  %v410_v63 = vand.u32 (!%p242_p2), 15, %v332_v51  ;;  %v348_v17 = vadd.s32 (!%p242_p2), 184, %v2991_v1 }
   0xd   : > { %s4271_s3 = smov (!%p277_p3, %s2456_s3), 1  ;;  %vm999_vm1 = vcmp.le.s32.totalorder %v368_v9, 14  ;;  %vm3059_vm2 = vcmp.le.s32.totalorder %v382_v21, 14  ;;  %vm3064_vm3 = vcmp.le.s32.totalorder %v480_v22, 14  ;;  %vm1017_vm4 = vcmp.le.s32.totalorder %v494_v42, 14 }
   0xe   : > { %s2527_s25 = sshll.u32 %s4271_s3, 8  ;;  %vm3102_vm5 = vcmp.le.s32.totalorder %v396_v61, 14  ;;  %v346_v9 = vadd.s32 168, %v2991_v1  ;;  %vm3117_vm6 = vcmp.le.s32.totalorder %v410_v63, 14  ;;  %s2465_s23 = sshll.u32 %s4271_s3, 1 }
   0xf   : > { %s3003_s28 = scalar_lea.vmem %s4198_s0, %s2527_s25  ;;  %s4003_s22 = scalar_lea.vmem %s4204_s6, %s2527_s25 }
  0x10   : > { %v3008_v6 = vld [vmem:[%s3003_s28 + $0x90] sm:$0xff]  ;;  %v3011_v7 = vld [vmem:[%s3003_s28 + $0x98] sm:$0xff]  ;;  %v3014_v8 = vld [vmem:[%s3003_s28] sm:$0xff]  ;;  %v508_v29 = vand.u32 15, %v346_v9  ;;  %s290_s25 = scalar_lea.vmem %s4205_s7, %s2465_s23 }
  0x11   : > { %v2778_v10 = vpack.i.bf16 %v3011_v7, %v3008_v6  ;;  %v3019_v11 = vld [vmem:[%s3003_s28 + $0x8] sm:$0xff]  ;;  %v3022_v12 = vld [vmem:[%s3003_s28 + $0x10] sm:$0xff]  ;;  %v3025_v13 = vld [vmem:[%s3003_s28 + $0x18] sm:$0xff]  ;;  %v1066_v18 = vrot.slane %v3008_v6, 1  ;;  %v1031_v19 = vrot.slane %v3014_v8, 1  ;;  %v1068_v30 = vrot.slane %v3011_v7, 1 }
  0x12   : > { %v1032_v14 = vrot.slane %v3019_v11, 1  ;;  %v2763_v15 = vpack.i.bf16 %v3019_v11, %v3014_v8  ;;  %v3031_v16 = vld [vmem:[%s3003_s28 + $0x88] sm:$0xff]  ;;  %v3038_v20 = vld [vmem:[%s3003_s28 + $0x80] sm:$0xff]  ;;  %v1036_v23 = vrot.slane %v3025_v13, 1  ;;  %v2768_v24 = vpack.i.bf16 %v3025_v13, %v3022_v12  ;;  %v3082_v48 = vld [vmem:[%s3003_s28 + $0x38] sm:$0xff] }
  0x13   : > { %2779 = vrot.lane.b32.xlu1 %v2778_v10, %s2937_s29  ;;  %v1034_v25 = vrot.slane %v3022_v12, 1  ;;  %v3046_v26 = vld [vmem:[%s3003_s28 + $0x20] sm:$0xff]  ;;  %v1064_v28 = vrot.slane %v3031_v16, 1  ;;  %v2773_v32 = vpack.i.bf16 %v3031_v16, %v3038_v20  ;;  %v1062_v33 = vrot.slane %v3038_v20, 1  ;;  %v3072_v43 = vld [vmem:[%s3003_s28 + $0x28] sm:$0xff]  ;;  %v3088_v50 = vld [vmem:[%s3003_s28 + $0x30] sm:$0xff] }
  0x14   : > { %2764 = vrot.lane.b32.xlu0 %v2763_v15, %s2937_s29  ;;  %v1033_v27 = vsel %vm1030_vm0, %v1031_v19, %v1032_v14  ;;  %v3057_v34 = vld [vmem:[%s3003_s28 + $0xa0] sm:$0xff]  ;;  %v1038_v37 = vrot.slane %v3046_v26, 1  ;;  %v1069_v53 = vsel %vm1030_vm0, %v1066_v18, %v1068_v30  ;;  %v1040_v55 = vrot.slane %v3072_v43, 1  ;;  %v3108_v4 = vld [vmem:[%s3003_s28 + $0xa8] sm:$0xff]  ;;  %v3111_v5 = vld [vmem:[%s3003_s28 + $0xb0] sm:$0xff] }
  0x15   : > { %v1035_v31 = vsel %vm1030_vm0, %v1032_v14, %v1034_v25  ;;  %v1037_v40 = vsel %vm1030_vm0, %v1034_v25, %v1036_v23  ;;  %v1067_v41 = vsel %vm1030_vm0, %v1064_v28, %v1066_v18  ;;  %v1065_v45 = vsel %vm1030_vm0, %v1062_v33, %v1064_v28  ;;  %v3095_v56 = vld [vmem:[%s3003_s28 + $0x40] sm:$0xff]  ;;  %v3129_v21 = vld [vmem:[%s3003_s28 + $0xb8] sm:$0xff]  ;;  %v3197_v14 = vld [vmem:[%s3003_s28 + $0xc8] sm:$0xff] }
  0x16   : > { %v1192_v35 = vsel %vm999_vm1, %v1035_v31, 0.0  ;;  %v1039_v44 = vsel %vm1030_vm0, %v1036_v23, %v1038_v37  ;;  %v1208_v46 = vsel %vm3064_vm3, %v1067_v41, 0.0  ;;  %v1070_v47 = vrot.slane %v3057_v34, 1  ;;  %v3132_v22 = vld [vmem:[%s3003_s28 + $0xc0] sm:$0xff]  ;;  %v3157_v41 = vld [vmem:[%s3003_s28 + $0x50] sm:$0xff] }
  0x17   : > { %v2783_v39 = vpack.i.bf16 %v1192_v35, %v1033_v27  ;;  %v1194_v49 = vsel %vm3059_vm2, %v1039_v44, 0.0  ;;  %v2793_v57 = vpack.i.bf16 %v1208_v46, %v1065_v45  ;;  %v1044_v59 = vrot.slane %v3082_v48, 1 }
  0x18   : > { %2769 = vrot.lane.b32.xlu0 %v2768_v24, %s2937_s29  ;;  %v2788_v52 = vpack.i.bf16 %v1194_v49, %v1037_v40  ;;  %v1071_v54 = vsel %vm1030_vm0, %v1068_v30, %v1070_v47  ;;  %v1042_v60 = vrot.slane %v3088_v50, 1  ;;  %v1046_v0 = vrot.slane %v3095_v56, 1  ;;  %v3154_v40 = vld [vmem:[%s3003_s28 + $0x48] sm:$0xff] }
  0x19   : > { %2784 = vrot.lane.b32.xlu1 %v2783_v39, %s2938_s30  ;;  %v1210_v58 = vsel %vm1017_vm4, %v1071_v54, 0.0  ;;  %v2803_v10 = vpack.i.bf16 %v3072_v43, %v3046_v26  ;;  %v1041_v18 = vsel %vm1030_vm0, %v1038_v37, %v1040_v55  ;;  %v2808_v23 = vpack.i.bf16 %v3082_v48, %v3088_v50 }
  0x1a   : > { %v2798_v62 = vpack.i.bf16 %v1210_v58, %v1069_v53  ;;  %v1043_v3 = vsel %vm1030_vm0, %v1040_v55, %v1042_v60  ;;  %v1047_v15 = vsel %vm1030_vm0, %v1044_v59, %v1046_v0  ;;  %v1072_v24 = vrot.slane %v3108_v4, 1  ;;  %v3176_v53 = vld [vmem:[%s3003_s28 + $0x60] sm:$0xff] }
  0x1b   : > { %v1196_v19 = vsel %vm3102_vm5, %v1043_v3, 0.0  ;;  %v1074_v25 = vrot.slane %v3111_v5, 1  ;;  %v1045_v27 = vsel %vm1030_vm0, %v1042_v60, %v1044_v59  ;;  %v1198_v28 = vsel %vm3117_vm6, %v1047_v15, 0.0  ;;  %v3200_v15 = vld [vmem:[%s3003_s28 + $0xd0] sm:$0xff]  ;;  %v3308_v3 = vld [vmem:[%s3003_s28 + $0xe8] sm:$0xff] }
  0x1c   : > { %2774 = vrot.lane.b32.xlu0 %v2773_v32, %s2937_s29  ;;  %v2813_v30 = vpack.i.bf16 %v1196_v19, %v1041_v18  ;;  %v1076_v31 = vrot.slane %v3129_v21, 1  ;;  %v522_v32 = vand.u32 15, %v348_v17  ;;  %v1078_v35 = vrot.slane %v3132_v22, 1 }
  0x1d   : > { %2789 = vrot.lane.b32.xlu1 %v2788_v52, %s2938_s30  ;;  %v2818_v36 = vpack.i.bf16 %v1198_v28, %v1045_v27  ;;  %vm3146_vm7 = vcmp.le.s32.totalorder %v508_v29, 14  ;;  %v1075_v38 = vsel %vm1030_vm0, %v1072_v24, %v1074_v25  ;;  %v2823_v39 = vpack.i.bf16 %v3108_v4, %v3057_v34  ;;  %v3173_v52 = vld [vmem:[%s3003_s28 + $0x58] sm:$0xff]  ;;  %v3223_v29 = vld [vmem:[%s3003_s28 + $0xe0] sm:$0xff] }
  0x1e   : > { %vm3160_vm8 = vcmp.le.s32.totalorder %v522_v32, 14  ;;  %v1079_v44 = vsel %vm1030_vm0, %v1076_v31, %v1078_v35  ;;  %v334_v45 = vadd.s32 72, %v2991_v1  ;;  %v336_v46 = vadd.s32 88, %v2991_v1  ;;  %v3220_v28 = vld [vmem:[%s3003_s28 + $0xd8] sm:$0xff] }
  0x1f   : > { %v1073_v49 = vsel %vm1030_vm0, %v1070_v47, %v1072_v24  ;;  %v1212_v51 = vsel %vm3146_vm7, %v1075_v38, 0.0  ;;  %v2828_v54 = vpack.i.bf16 %v3129_v21, %v3111_v5  ;;  %v1048_v55 = vrot.slane %v3154_v40, 1 }
  0x20   : > { %2794 = vrot.lane.b32.xlu0 %v2793_v57, %s2938_s30  ;;  %v1050_v57 = vrot.slane %v3157_v41, 1  ;;  %v424_v58 = vand.u32 15, %v334_v45  ;;  %v1077_v47 = vsel %vm1030_vm0, %v1074_v25, %v1076_v31  ;;  %v1214_v59 = vsel %vm3160_vm8, %v1079_v44, 0.0 }
  0x21   : > { %2799 = vrot.lane.b32.xlu1 %v2798_v62, %s2938_s30  ;;  %v2833_v60 = vpack.i.bf16 %v1212_v51, %v1073_v49  ;;  %v1052_v61 = vrot.slane %v3173_v52, 1  ;;  %v438_v62 = vand.u32 15, %v336_v46  ;;  %v1054_v63 = vrot.slane %v3176_v53, 1 }
  0x22   : > { %v2838_v2 = vpack.i.bf16 %v1214_v59, %v1077_v47  ;;  %vm3190_vm9 = vcmp.le.s32.totalorder %v424_v58, 14  ;;  %v1051_v9 = vsel %vm1030_vm0, %v1048_v55, %v1050_v57  ;;  %v2843_v17 = vpack.i.bf16 %v3154_v40, %v3095_v56  ;;  %v3250_v59 = vld [vmem:[%s3003_s28 + $0x68] sm:$0xff] }
  0x23   : > { %vm3205_vm10 = vcmp.le.s32.totalorder %v438_v62, 14  ;;  %v1055_v19 = vsel %vm1030_vm0, %v1052_v61, %v1054_v63  ;;  %v843_v24 = vrot.slane %v3011_v7, 7  ;;  %v1049_v25 = vsel %vm1030_vm0, %v1046_v0, %v1048_v55 }
  0x24   : > { %2804 = vrot.lane.b32.xlu0 %v2803_v10, %s2937_s29  ;;  %v350_v10 = vadd.s32 200, %v2991_v1  ;;  %v1200_v27 = vsel %vm3190_vm9, %v1051_v9, 0.0  ;;  %v1080_v31 = vrot.slane %v3197_v14, 1  ;;  %v1082_v32 = vrot.slane %v3200_v15, 1 }
  0x25   : > { %2809 = vrot.lane.b32.xlu1 %v2808_v23, %s2937_s29  ;;  %v352_v23 = vadd.s32 216, %v2991_v1  ;;  %v841_v0 = vrot.slane %v3008_v6, 7  ;;  %v807_v37 = vrot.slane %v3019_v11, 7  ;;  %v1053_v38 = vsel %vm1030_vm0, %v1050_v57, %v1052_v61 }
  0x26   : > { %v2853_v42 = vpack.i.bf16 %v1200_v27, %v1049_v25  ;;  %v1084_v44 = vrot.slane %v3220_v28, 1  ;;  %v1086_v46 = vrot.slane %v3223_v29, 1  ;;  %v806_v49 = vrot.slane %v3014_v8, 7 }
  0x27   : > { %v550_v45 = vand.u32 15, %v352_v23  ;;  %v811_v6 = vrot.slane %v3025_v13, 7  ;;  %v809_v51 = vrot.slane %v3022_v12, 7  ;;  %v839_v55 = vrot.slane %v3031_v16, 7 }
  0x28   : > { %2814 = vrot.lane.b32.xlu0 %v2813_v30, %s2938_s30  ;;  %v2848_v30 = vpack.i.bf16 %v3173_v52, %v3157_v41  ;;  %v1083_v47 = vsel %vm1030_vm0, %v1080_v31, %v1082_v32  ;;  %v837_v12 = vrot.slane %v3038_v20, 7  ;;  %v815_v61 = vrot.slane %v3072_v43, 7 }
  0x29   : > { %2819 = vrot.lane.b32.xlu1 %v2818_v36, %s2938_s30  ;;  %v536_v36 = vand.u32 15, %v350_v10  ;;  %v819_v16 = vrot.slane %v3082_v48, 7  ;;  %v2863_v62 = vpack.i.bf16 %v3197_v14, %v3132_v22  ;;  %vm3264_vm13 = vcmp.le.s32.totalorder %v550_v45, 14 }
  0x2a   : > { %v1087_v9 = vsel %vm1030_vm0, %v1084_v44, %v1086_v46  ;;  %v340_v10 = vadd.s32 120, %v2991_v1  ;;  %v1056_v18 = vrot.slane %v3250_v59, 1  ;;  %v817_v25 = vrot.slane %v3088_v50, 7 }
  0x2b   : > { %vm3244_vm12 = vcmp.le.s32.totalorder %v536_v36, 14  ;;  %v847_v27 = vrot.slane %v3108_v4, 7  ;;  %v1218_v36 = vsel %vm3264_vm13, %v1087_v9, 0.0  ;;  %v3294_v50 = vsel %vm805_vm11, %v841_v0, %v843_v24 }
  0x2c   : > { %2824 = vrot.lane.b32.xlu0 %v2823_v39, %s2937_s29  ;;  %v1202_v39 = vsel %vm3205_vm10, %v1055_v19, 0.0  ;;  %v3276_v19 = vld [vmem:[%s3003_s28 + $0x78] sm:$0xff]  ;;  %v466_v45 = vand.u32 15, %v340_v10  ;;  %v3322_v9 = vsel %vm805_vm11, %v809_v51, %v811_v6  ;;  %v2924_v10 = vld [vmem:[%s4199_s1 + $0x14] ss:$0 sps:$4 sm:$0xff]   ;;  %vm1598_vm1 = vcmask 1043456  }
  0x2d   : > { %2829 = vrot.lane.b32.xlu1 %v2828_v54, %s2937_s29  ;;  %v338_v54 = vadd.s32 104, %v2991_v1  ;;  %v2858_v57 = vpack.i.bf16 %v1202_v39, %v1053_v38  ;;  %v4206_v38 = vrot.slane %v3276_v19, 7  ;;  %v3289_v39 = vsel %vm805_vm11, %v839_v55, %v841_v0  ;;  %2749 = vmatprep.subr.msk.bf16.mxu0 %vm1598_vm1, %v2924_v10 }
  0x2e   : > { %vm3343_vm15 = vcmp.le.s32.totalorder %v466_v45, 14  ;;  %v827_v20 = vrot.slane %v3173_v52, 7  ;;  %v1600_v45 = vsel %vm1598_vm1, %v2924_v10, 0  ;;  %2750 = vmatprep.subr.msk.bf16.mxu1 %vm1598_vm1, %v2924_v10  ;;  %v859_v43 = vrot.slane %v3220_v28, 7 }
  0x2f   : > { %2584 = vmatpush3.bf16.msra.mxu0 %v1600_v45  ;;  %2748 = vmatpush3.bf16.msra.mxu1 %v1600_v45  ;;  %v831_v7 = vrot.slane %v3250_v59, 7  ;;  %v343_v52 = vadd.s32 144, %v2991_v1  ;;  %vm1447_vm6 = vcmask 64512   ;;  %vm1480_vm8 = vcmask 130048  }
  0x30   : > { %2834 = vrot.lane.b32.xlu0 %v2833_v60, %s2938_s30  ;;  %v3253_v60 = vld [vmem:[%s3003_s28 + $0x70] sm:$0xff]  ;;  %vm1549_vm9 = vcmask 195584  }
  0x31   : > { %2839 = vrot.lane.b32.xlu1 %v2838_v2, %s2938_s30  ;;  %v1081_v2 = vsel %vm1030_vm0, %v1078_v35, %v1080_v31  ;;  %v1058_v23 = vrot.slane %v3253_v60, 1  ;;  %v452_v35 = vand.u32 15, %v338_v54  ;;  %v1085_v31 = vsel %vm1030_vm0, %v1082_v32, %v1084_v44 }
  0x32   : > { %v1060_v44 = vrot.slane %v3276_v19, 1  ;;  %v849_v54 = vrot.slane %v3111_v5, 7  ;;  %v2878_v0 = vpack.i.bf16 %v1218_v36, %v1085_v31  ;;  %v3317_v5 = vsel %vm805_vm11, %v807_v37, %v809_v51 }
  0x33   : > { %vm3301_vm14 = vcmp.le.s32.totalorder %v452_v35, 14  ;;  %v1057_v35 = vsel %vm1030_vm0, %v1054_v63, %v1056_v18  ;;  %v3338_v31 = vsel %vm805_vm11, %v837_v12, %v839_v55 }
  0x34   : > { %2844 = vrot.lane.b32.xlu0 %v2843_v17, %s2937_s29  ;;  %v1216_v17 = vsel %vm3244_vm12, %v1083_v47, 0.0  ;;  %v1059_v47 = vsel %vm1030_vm0, %v1056_v18, %v1058_v23  ;;  %v1063_v63 = vsel %vm1030_vm0, %v1060_v44, %v1062_v33  ;;  %v356_v18 = vadd.s32 248, %v2991_v1 }
  0x35   : > { %2849 = vrot.lane.b32.xlu1 %v2848_v30, %s2937_s29  ;;  %v2868_v30 = vpack.i.bf16 %v3220_v28, %v3200_v15  ;;  %v2873_v32 = vpack.i.bf16 %v1216_v17, %v1081_v2  ;;  %v354_v2 = vadd.s32 232, %v2991_v1  ;;  %v2883_v17 = vpack.i.bf16 %v3250_v59, %v3176_v53 }
  0x36   : > { %v1204_v51 = vsel %vm3301_vm14, %v1059_v47, 0.0  ;;  %v2888_v33 = vpack.i.bf16 %v3276_v19, %v3253_v60  ;;  %v1061_v11 = vsel %vm1030_vm0, %v1058_v23, %v1060_v44  ;;  %v1206_v47 = vsel %vm3343_vm15, %v1063_v63, 0.0 }
  0x37   : > { %v2893_v58 = vpack.i.bf16 %v1204_v51, %v1057_v35  ;;  %v3379_v35 = vsel %vm805_vm11, %v815_v61, %v817_v25  ;;  %v3384_v23 = vsel %vm805_vm11, %v817_v25, %v819_v16  ;;  %v825_v44 = vrot.slane %v3157_v41, 7 }
  0x38   : > { %2854 = vrot.lane.b32.xlu0 %v2853_v42, %s2938_s30  ;;  %v851_v42 = vrot.slane %v3129_v21, 7  ;;  %v2898_v51 = vpack.i.bf16 %v1206_v47, %v1061_v11  ;;  %v845_v41 = vrot.slane %v3057_v34, 7  ;;  %v3407_v13 = vsel %vm805_vm11, %v847_v27, %v849_v54 }
  0x39   : > { %2859 = vrot.lane.b32.xlu1 %v2858_v57, %s2938_s30  ;;  %v3353_v57 = vld [vmem:[%s3003_s28 + $0xf8] sm:$0xff]  ;;  %v2939_v47 = vmov 0.0  }
  0x3a   : > { %v3416_v36 = vsel %vm805_vm11, %v849_v54, %v851_v42  ;;  %v3432_v28 = vsel %vm805_vm11, %v845_v41, %v847_v27  ;;  %v857_v54 = vrot.slane %v3200_v15, 7  ;;  %2681 = vmatprep.subr.bf16.mxu0 %v2939_v47  ;;  %2617 = vmatprep.subr.bf16.mxu1 %v2939_v47 }
  0x3c   : > { %2864 = vrot.lane.b32.xlu0 %v2863_v62, %s2937_s29  ;;  %v3311_v62 = vld [vmem:[%s3003_s28 + $0xf0] sm:$0xff] }
  0x3d   : > { %2869 = vrot.lane.b32.xlu1 %v2868_v30, %s2937_s29  ;;  %v3335_v30 = vsel %vm805_vm11, %v4206_v38, %v837_v12  ;;  %v1088_v38 = vrot.slane %v3308_v3, 1  ;;  %v1090_v55 = vrot.slane %v3311_v62, 1  ;;  %v3361_v12 = vsel %vm805_vm11, %v806_v49, %v807_v37 }
  0x3e   : > { %v813_v37 = vrot.slane %v3046_v26, 7  ;;  %v2908_v4 = vpack.i.bf16 %v3353_v57, %v3311_v62 }
  0x3f   : > { %v1091_v26 = vsel %vm1030_vm0, %v1088_v38, %v1090_v55 }
  0x40   : > { %2874 = vrot.lane.b32.xlu0 %v2873_v32, %s2938_s30  ;;  %v564_v32 = vand.u32 15, %v354_v2  ;;  %v1092_v2 = vrot.slane %v3353_v57, 1  ;;  %v3391_v10 = vsel %vm805_vm11, %v811_v6, %v813_v37  ;;  %v855_v6 = vrot.slane %v3197_v14, 7 }
  0x41   : > { %2879 = vrot.lane.b32.xlu1 %v2878_v0, %s2938_s30  ;;  %v578_v0 = vand.u32 15, %v356_v18  ;;  %v3427_v14 = vsel %vm805_vm11, %v843_v24, %v845_v41  ;;  %v1089_v18 = vsel %vm1030_vm0, %v1086_v46, %v1088_v38  ;;  %v4235_v24 = vrot.slane %v3154_v40, 7 }
  0x42   : > { %vm3399_vm2 = vcmp.le.s32.totalorder %v564_v32, 14  ;;  %v1126_v63 = vsel %vm1030_vm0, %v1092_v2, 0.0  ;;  %v821_v32 = vrot.slane %v3095_v56, 7  ;;  %v3453_v46 = vsel %vm805_vm11, %v825_v44, %v827_v20 }
  0x43   : > { %vm3419_vm3 = vcmp.le.s32.totalorder %v578_v0, 14  ;;  %v3448_v15 = vsel %vm805_vm11, %v4235_v24, %v825_v44  ;;  %v1093_v27 = vsel %vm1030_vm0, %v1090_v55, %v1092_v2  ;;  %v4236_v38 = vmov %v4235_v24 }
  0x44   : > { %2884 = vrot.lane.b32.xlu0 %v2883_v17, %s2937_s29  ;;  %v3396_v17 = vsel %vm805_vm11, %v813_v37, %v815_v61  ;;  %v2903_v61 = vpack.i.bf16 %v3308_v3, %v3223_v29  ;;  %v1222_v56 = vsel %vm3419_vm3, %v1126_v63, 0.0  ;;  %v3461_v59 = vsel %vm805_vm11, %v819_v16, %v821_v32 }
  0x45   : > { %2889 = vrot.lane.b32.xlu1 %v2888_v33, %s2937_s29  ;;  %v1220_v33 = vsel %vm3399_vm2, %v1091_v26, 0.0  ;;  %v3466_v45 = vsel %vm805_vm11, %v821_v32, %v4236_v38  ;;  %v853_v55 = vrot.slane %v3132_v22, 7  ;;  %v3473_v48 = vsel %vm805_vm11, %v855_v6, %v857_v54 }
  0x46   : > { %v2913_v11 = vpack.i.bf16 %v1220_v33, %v1089_v18  ;;  %v3476_v16 = vsel %vm805_vm11, %v857_v54, %v859_v43  ;;  %v2918_v40 = vpack.i.bf16 %v1222_v56, %v1093_v27  ;;  %v863_v37 = vrot.slane %v3308_v3, 7 }
  0x47   : > { %v3486_v22 = vsel %vm805_vm11, %v853_v55, %v855_v6  ;;  %v865_v0 = vrot.slane %v3311_v62, 7  ;;  %v829_v2 = vrot.slane %v3176_v53, 7  ;;  %v4237_v26 = vrot.slane %v3276_v19, 7 }
  0x48   : > { %2894 = vrot.lane.b32.xlu0 %v2893_v58, %s2938_s30  ;;  %v833_v58 = vrot.slane %v3253_v60, 7  ;;  %v3483_v60 = vsel %vm805_vm11, %v851_v42, %v853_v55  ;;  %v867_v42 = vrot.slane %v3353_v57, 7  ;;  %v861_v53 = vrot.slane %v3223_v29, 7 }
  0x49   : > { %2899 = vrot.lane.b32.xlu1 %v2898_v51, %s2938_s30  ;;  %v3505_v3 = vsel %vm805_vm11, %v827_v20, %v829_v2  ;;  %v3508_v62 = vsel %vm805_vm11, %v829_v2, %v831_v7  ;;  %v3512_v51 = vsel %vm805_vm11, %v863_v37, %v865_v0  ;;  %v327_v20 = vadd.s32 16, %v2991_v1 }
  0x4a   : > { %v3493_v44 = vsel %vm805_vm11, %v831_v7, %v833_v58  ;;  %v3498_v21 = vsel %vm805_vm11, %v833_v58, %v4237_v26  ;;  %v3515_v19 = vsel %vm805_vm11, %v859_v43, %v861_v53  ;;  %v3518_v57 = vsel %vm805_vm11, %v861_v53, %v863_v37 }
  0x4b   : > { %v3521_v25 = vsel %vm805_vm11, %v865_v0, %v867_v42  ;;  %v341_v41 = vadd.s32 128, %v2991_v1  ;;  %v361_v29 = vand.u32 15, %v2991_v1  ;;  %v487_v6 = vand.u32 15, %v343_v52 }
  0x4c   : > { %2904 = vrot.lane.b32.xlu0 %v2903_v61, %s2937_s29  ;;  %v375_v43 = vand.u32 15, %v327_v20  ;;  %v901_v18 = vsel %vm805_vm11, 0.0, %v806_v49  ;;  %v329_v38 = vadd.s32 32, %v2991_v1 }
  0x4d   : > { %2909 = vrot.lane.b32.xlu1 %v2908_v4, %s2937_s29  ;;  %v473_v63 = vand.u32 15, %v341_v41  ;;  %vm3529_vm0 = vcmp.ge.s32.totalorder %v361_v29, 1  ;;  %vm3536_vm4 = vcmp.ge.s32.totalorder %v487_v6, 1 }
  0x4e   : > { %vm3540_vm5 = vcmp.ge.s32.totalorder %v375_v43, 1  ;;  %v966_v27 = vsel %vm3529_vm0, %v901_v18, 0.0  ;;  %v984_v8 = vsel %vm3536_vm4, %v3289_v39, 0.0  ;;  %v389_v6 = vand.u32 15, %v329_v38 }
  0x4f   : > { %vm3549_vm7 = vcmp.ge.s32.totalorder %v473_v63, 1  ;;  %v968_v58 = vsel %vm3540_vm5, %v3317_v5, 0.0 }
  0x50   : > { %2914 = vrot.lane.b32.xlu0 %v2913_v11, %s2938_s30  ;;  %v982_v42 = vsel %vm3549_vm7, %v3335_v30, 0.0  ;;  %vm3586_vm10 = vcmp.ge.s32.totalorder %v389_v6, 1 }
  0x51   : > { %2919 = vrot.lane.b32.xlu1 %v2918_v40, %s2938_s30  ;;  %v331_v40 = vadd.s32 48, %v2991_v1 }
  0x53   : > { %v403_v63 = vand.u32 15, %v331_v40 }
  0x55   : > { %vm3605_vm12 = vcmp.ge.s32.totalorder %v403_v63, 1  ;;  %v2928_v63 = vld [vmem:[%s4199_s1 + $0x8] ss:$0 sps:$4 sm:$0xff]  }
  0x85   : > { %v3527_v61 = vpop.permute.xlu1 %2779 }
  0x86   : > { %v2765_v34 = vpop.permute.xlu0 %2764  ;;  %v2782_v54 = vunpack.i.h.bf16 %v3527_v61  ;;  %v2781_v30 = vunpack.i.l.bf16 %v3527_v61 }
  0x87   : > { %v2767_v32 = vunpack.i.h.bf16 %v2765_v34  ;;  %v2766_v7 = vunpack.i.l.bf16 %v2765_v34 }
  0x89   : > { %v1448_v39 = vsel %vm1447_vm6, %v966_v27, %v2766_v7  ;;  %v1449_v26 = vsel %vm1447_vm6, %v3361_v12, %v2767_v32  ;;  %v345_v12 = vadd.s32 160, %v2991_v1 }
  0x8a   : > { %v2770_v24 = vpop.permute.xlu0 %2769 }
  0x8b   : > { %v2785_v49 = vpop.permute.xlu1 %2784  ;;  %v2772_v37 = vunpack.i.h.bf16 %v2770_v24  ;;  %v2771_v0 = vunpack.i.l.bf16 %v2770_v24 }
  0x8c   : > { %v2787_v11 = vunpack.i.h.bf16 %v2785_v49  ;;  %v2786_v55 = vunpack.i.l.bf16 %v2785_v49  ;;  %v2925_v49 = vld [vmem:[%s4199_s1 + $0x18] sm:$0xff]  }
  0x8d   : > { %v1451_v18 = vsel %vm1447_vm6, %v3322_v9, %v2772_v37  ;;  %v1450_v33 = vsel %vm1447_vm6, %v968_v58, %v2771_v0 }
  0x8e   : > { %v2775_v2 = vpop.permute.xlu0 %2774  ;;  %v1481_v53 = vsel %vm1480_vm8, %v1448_v39, %v2786_v55  ;;  %v1482_v5 = vsel %vm1480_vm8, %v1449_v26, %v2787_v11  ;;  %v2927_v11 = vld [vmem:[%s4199_s1 + $0x20] ss:$0 sps:$4 sm:$0xff]  }
  0x8f   : > { %v2777_v52 = vunpack.i.h.bf16 %v2775_v2  ;;  %v2776_v20 = vunpack.i.l.bf16 %v2775_v2  ;;  %v2790_v41 = vpop.permute.xlu1 %2789  ;;  %v3566_v29 = vpack.c.bf16 %v1482_v5, %v1481_v53  ;;  %v1467_v2 = vsel %vm1447_vm6, %v3294_v50, %v2782_v54  ;;  %v2926_v50 = vld [vmem:[%s4199_s1] sm:$0xff]  }
  0x90   : > { %v2792_v34 = vunpack.i.h.bf16 %v2790_v41  ;;  %v2791_v43 = vunpack.i.l.bf16 %v2790_v41 }
  0x91   : > { %2585 = vmatprep.mubr.msk.bf16.mxu0 %vm1549_vm9, %v3566_v29  ;;  %v1465_v61 = vsel %vm1447_vm6, %v3338_v31, %v2777_v52  ;;  %v1464_v9 = vsel %vm1447_vm6, %v982_v42, %v2776_v20  ;;  %v1466_v31 = vsel %vm1447_vm6, %v984_v8, %v2781_v30  ;;  %v347_v42 = vadd.s32 176, %v2991_v1 }
  0x92   : > { %v2795_v32 = vpop.permute.xlu0 %2794  ;;  %v1484_v7 = vsel %vm1480_vm8, %v1451_v18, %v2792_v34  ;;  %v1483_v4 = vsel %vm1480_vm8, %v1450_v33, %v2791_v43  ;;  %v501_v8 = vand.u32 15, %v345_v12  ;;  %v1977_v43 = vsel %vm1598_vm1, %v2927_v11, 0 }
  0x93   : > { %v2797_v24 = vunpack.i.h.bf16 %v2795_v32  ;;  %v2796_v27 = vunpack.i.l.bf16 %v2795_v32  ;;  %v3584_v56 = vpack.c.bf16 %v1484_v7, %v1483_v4  ;;  %v2800_v38 = vpop.permute.xlu1 %2799  ;;  %v970_v12 = vsel %vm3586_vm10, %v3391_v10, 0.0 }
  0x94   : > { %v2802_v55 = vunpack.i.h.bf16 %v2800_v38  ;;  %v2801_v40 = vunpack.i.l.bf16 %v2800_v38  ;;  %v972_v33 = vsel %vm3605_vm12, %v3379_v35, 0.0  ;;  %v515_v4 = vand.u32 15, %v347_v42 }
  0x95   : > { %v1497_v37 = vsel %vm1480_vm8, %v1464_v9, %v2796_v27  ;;  %v1498_v0 = vsel %vm1480_vm8, %v1465_v61, %v2797_v24  ;;  %2586 = vmatmul.mubr.msk.bf16.vlgmr.msra.gmra.mrb[0].mxu0 %vm1549_vm9, %v3584_v56  ;;  %vm3632_vm13 = vcmp.ge.s32.totalorder %v501_v8, 1  ;;  %v1776_v61 = vsel %vm1598_vm1, %v2928_v63, 0 }
  0x96   : > { %v2805_v39 = vpop.permute.xlu0 %2804  ;;  %v3600_v26 = vpack.c.bf16 %v1498_v0, %v1497_v37  ;;  %v1500_v53 = vsel %vm1480_vm8, %v1467_v2, %v2802_v55  ;;  %v1499_v5 = vsel %vm1480_vm8, %v1466_v31, %v2801_v40  ;;  %2682 = vmatpush3.bf16.msra.mxu0 %v2925_v49  ;;  %v333_v37 = vadd.s32 64, %v2991_v1 }
  0x97   : > { %v3612_v20 = vpack.c.bf16 %v1500_v53, %v1499_v5  ;;  %v2807_v41 = vunpack.i.h.bf16 %v2805_v39  ;;  %v2806_v6 = vunpack.i.l.bf16 %v2805_v39  ;;  %v2810_v34 = vpop.permute.xlu1 %2809  ;;  %2683 = vmatprep.subr.bf16.mxu0 %v2939_v47  ;;  %v335_v2 = vadd.s32 80, %v2991_v1 }
  0x98   : > { %2601 = vmatprep.mubr.msk.bf16.mxu1 %vm1549_vm9, %v3600_v26  ;;  %v2812_v54 = vunpack.i.h.bf16 %v2810_v34  ;;  %v2811_v30 = vunpack.i.l.bf16 %v2810_v34  ;;  %vm3651_vm14 = vcmp.ge.s32.totalorder %v515_v4, 1  ;;  %v986_v52 = vsel %vm3632_vm13, %v3427_v14, 0.0 }
  0x99   : > { %2602 = vmatmul.mubr.msk.bf16.vlgmr.msra.gmra.mrb[0].mxu1 %vm1549_vm9, %v3612_v20  ;;  %v1453_v24 = vsel %vm1447_vm6, %v3396_v17, %v2807_v41  ;;  %v1452_v10 = vsel %vm1447_vm6, %v970_v12, %v2806_v6  ;;  %v417_v6 = vand.u32 15, %v333_v37  ;;  %v988_v34 = vsel %vm3651_vm14, %v3407_v13, 0.0 }
  0x9a   : > { %v2815_v18 = vpop.permute.xlu0 %2814  ;;  %2618 = vmatpush3.bf16.msra.mxu1 %v2926_v50  ;;  %2684 = vmatpush3.bf16.msra.mxu0 %v1977_v43  ;;  %v1455_v17 = vsel %vm1447_vm6, %v3384_v23, %v2812_v54  ;;  %v1454_v11 = vsel %vm1447_vm6, %v972_v33, %v2811_v30  ;;  %v431_v14 = vand.u32 15, %v335_v2  ;;  %vm2940_vm10 = vmmov 0  }
  0x9b   : > { %v2817_v32 = vunpack.i.h.bf16 %v2815_v18  ;;  %v2816_v7 = vunpack.i.l.bf16 %v2815_v18  ;;  %v2820_v27 = vpop.permute.xlu1 %2819  ;;  %2619 = vmatprep.subr.bf16.mxu1 %v2939_v47  ;;  %v349_v18 = vadd.s32 192, %v2991_v1  ;;  %vm3676_vm15 = vcmp.ge.s32.totalorder %v417_v6, 1 }
  0x9c   : > { %v2822_v38 = vunpack.i.h.bf16 %v2820_v27  ;;  %v2821_v58 = vunpack.i.l.bf16 %v2820_v27  ;;  %vm3685_vm1 = vcmp.ge.s32.totalorder %v431_v14, 1 }
  0x9d   : > { %v1485_v35 = vsel %vm1480_vm8, %v1452_v10, %v2816_v7  ;;  %v1486_v9 = vsel %vm1480_vm8, %v1453_v24, %v2817_v32  ;;  %v976_v2 = vsel %vm3685_vm1, %v3448_v15, 0.0 }
  0x9e   : > { %v3643_v55 = vpack.c.bf16 %v1486_v9, %v1485_v35  ;;  %v2825_v40 = vpop.permute.xlu0 %2824  ;;  %v1487_v0 = vsel %vm1480_vm8, %v1454_v11, %v2821_v58  ;;  %v1488_v31 = vsel %vm1480_vm8, %v1455_v17, %v2822_v38  ;;  %2620 = vmatpush3.bf16.msra.mxu1 %v1776_v61  ;;  %v351_v35 = vadd.s32 208, %v2991_v1 }
  0x9f   : > { %v3649_v39 = vpack.c.bf16 %v1488_v31, %v1487_v0  ;;  %v2827_v42 = vunpack.i.h.bf16 %v2825_v40  ;;  %v2826_v53 = vunpack.i.l.bf16 %v2825_v40  ;;  %v2830_v5 = vpop.permute.xlu1 %2829  ;;  %v974_v11 = vsel %vm3676_vm15, %v3461_v59, 0.0 }
  0xa0   : > { %2589 = vmatprep.mubr.msk.bf16.mxu0 %vm1549_vm9, %v3643_v55  ;;  %v2832_v8 = vunpack.i.h.bf16 %v2830_v5  ;;  %v2831_v50 = vunpack.i.l.bf16 %v2830_v5  ;;  %v529_v31 = vand.u32 15, %v349_v18  ;;  %v543_v23 = vand.u32 15, %v351_v35 }
  0xa1   : > { %2590 = vmatmul.mubr.msk.bf16.gmra.mrb[4].mxu0 %vm1549_vm9, %v3649_v39  ;;  %v1469_v12 = vsel %vm1447_vm6, %v3432_v28, %v2827_v42  ;;  %v1468_v54 = vsel %vm1447_vm6, %v986_v52, %v2826_v53  ;;  %v339_v18 = vadd.s32 112, %v2991_v1 }
  0xa2   : > { %v2835_v41 = vpop.permute.xlu0 %2834  ;;  %v1471_v13 = vsel %vm1447_vm6, %v3416_v36, %v2832_v8  ;;  %v1470_v24 = vsel %vm1447_vm6, %v988_v34, %v2831_v50  ;;  %v337_v8 = vadd.s32 96, %v2991_v1  ;;  %vm3710_vm2 = vcmp.ge.s32.totalorder %v529_v31, 1 }
  0xa3   : > { %v2837_v43 = vunpack.i.h.bf16 %v2835_v41  ;;  %v2836_v63 = vunpack.i.l.bf16 %v2835_v41  ;;  %v2840_v30 = vpop.permute.xlu1 %2839  ;;  %vm3716_vm3 = vcmp.ge.s32.totalorder %v543_v23, 1 }
  0xa4   : > { %v2842_v7 = vunpack.i.h.bf16 %v2840_v30  ;;  %v2841_v4 = vunpack.i.l.bf16 %v2840_v30 }
  0xa5   : > { %v1501_v33 = vsel %vm1480_vm8, %v1468_v54, %v2836_v63  ;;  %v1502_v32 = vsel %vm1480_vm8, %v1469_v12, %v2837_v43 }
  0xa6   : > { %v3674_v10 = vpack.c.bf16 %v1502_v32, %v1501_v33  ;;  %v2845_v27 = vpop.permute.xlu0 %2844  ;;  %v1503_v49 = vsel %vm1480_vm8, %v1470_v24, %v2841_v4  ;;  %v1504_v61 = vsel %vm1480_vm8, %v1471_v13, %v2842_v7  ;;  %v445_v4 = vand.u32 15, %v337_v8 }
  0xa7   : > { %v3683_v9 = vpack.c.bf16 %v1504_v61, %v1503_v49  ;;  %v2847_v38 = vunpack.i.h.bf16 %v2845_v27  ;;  %v2846_v58 = vunpack.i.l.bf16 %v2845_v27  ;;  %v2850_v17 = vpop.permute.xlu1 %2849  ;;  %v990_v13 = vsel %vm3710_vm2, %v3483_v60, 0.0 }
  0xa8   : > { %2605 = vmatprep.mubr.msk.bf16.mxu1 %vm1549_vm9, %v3674_v10  ;;  %v2852_v40 = vunpack.i.h.bf16 %v2850_v17  ;;  %v2851_v37 = vunpack.i.l.bf16 %v2850_v17  ;;  %v992_v49 = vsel %vm3716_vm3, %v3473_v48, 0.0  ;;  %vm3736_vm0 = vcmp.ge.s32.totalorder %v445_v4, 1 }
  0xa9   : > { %2606 = vmatmul.mubr.msk.bf16.gmra.mrb[4].mxu1 %vm1549_vm9, %v3683_v9  ;;  %v1457_v5 = vsel %vm1447_vm6, %v3466_v45, %v2847_v38  ;;  %v1456_v52 = vsel %vm1447_vm6, %v974_v11, %v2846_v58  ;;  %v459_v38 = vand.u32 15, %v339_v18 }
  0xaa   : > { %v2855_v0 = vpop.permute.xlu0 %2854  ;;  %v1459_v15 = vsel %vm1447_vm6, %v3453_v46, %v2852_v40  ;;  %v1458_v43 = vsel %vm1447_vm6, %v976_v2, %v2851_v37 }
  0xab   : > { %v2857_v42 = vunpack.i.h.bf16 %v2855_v0  ;;  %v2856_v53 = vunpack.i.l.bf16 %v2855_v0  ;;  %v2860_v59 = vpop.permute.xlu1 %2859  ;;  %vm3750_vm4 = vcmp.ge.s32.totalorder %v459_v38, 1 }
  0xac   : > { %v2862_v6 = vunpack.i.h.bf16 %v2860_v59  ;;  %v2861_v34 = vunpack.i.l.bf16 %v2860_v59  ;;  %v980_v45 = vsel %vm3750_vm4, %v3493_v44, 0.0 }
  0xad   : > { %v1489_v50 = vsel %vm1480_vm8, %v1456_v52, %v2856_v53  ;;  %v1490_v41 = vsel %vm1480_vm8, %v1457_v5, %v2857_v42  ;;  %v353_v42 = vadd.s32 224, %v2991_v1 }
  0xae   : > { %v3708_v63 = vpack.c.bf16 %v1490_v41, %v1489_v50  ;;  %v2865_v12 = vpop.permute.xlu0 %2864  ;;  %v1491_v54 = vsel %vm1480_vm8, %v1458_v43, %v2861_v34  ;;  %v1492_v30 = vsel %vm1480_vm8, %v1459_v15, %v2862_v6  ;;  %v355_v50 = vadd.s32 240, %v2991_v1 }
  0xaf   : > { %v3721_v46 = vpack.c.bf16 %v1492_v30, %v1491_v54  ;;  %v2867_v33 = vunpack.i.h.bf16 %v2865_v12  ;;  %v2866_v32 = vunpack.i.l.bf16 %v2865_v12  ;;  %v2870_v7 = vpop.permute.xlu1 %2869  ;;  %v978_v41 = vsel %vm3736_vm0, %v3505_v3, 0.0 }
  0xb0   : > { %2593 = vmatprep.mubr.msk.bf16.mxu0 %vm1549_vm9, %v3708_v63  ;;  %v2872_v24 = vunpack.i.h.bf16 %v2870_v7  ;;  %v2871_v28 = vunpack.i.l.bf16 %v2870_v7  ;;  %v557_v43 = vand.u32 15, %v353_v42  ;;  %v571_v3 = vand.u32 15, %v355_v50 }
  0xb1   : > { %2594 = vmatmul.mubr.msk.bf16.gmra.mrb[8].mxu0 %vm1549_vm9, %v3721_v46  ;;  %v1473_v58 = vsel %vm1447_vm6, %v3486_v22, %v2867_v33  ;;  %v1472_v36 = vsel %vm1447_vm6, %v990_v13, %v2866_v32 }
  0xb2   : > { %v2875_v27 = vpop.permute.xlu0 %2874  ;;  %v1475_v48 = vsel %vm1447_vm6, %v3476_v16, %v2872_v24  ;;  %v1474_v31 = vsel %vm1447_vm6, %v992_v49, %v2871_v28  ;;  %vm3777_vm5 = vcmp.ge.s32.totalorder %v557_v43, 1  ;;  %vm3783_vm7 = vcmp.ge.s32.totalorder %v571_v3, 1 }
  0xb3   : > { %v2877_v61 = vunpack.i.h.bf16 %v2875_v27  ;;  %v2876_v35 = vunpack.i.l.bf16 %v2875_v27  ;;  %v2880_v17 = vpop.permute.xlu1 %2879 }
  0xb4   : > { %v2882_v37 = vunpack.i.h.bf16 %v2880_v17  ;;  %v2881_v0 = vunpack.i.l.bf16 %v2880_v17 }
  0xb5   : > { %v1505_v11 = vsel %vm1480_vm8, %v1472_v36, %v2876_v35  ;;  %v1506_v40 = vsel %vm1480_vm8, %v1473_v58, %v2877_v61  ;;  %v994_v58 = vsel %vm3777_vm5, %v3515_v19, 0.0 }
  0xb6   : > { %v3745_v2 = vpack.c.bf16 %v1506_v40, %v1505_v11  ;;  %v2885_v22 = vpop.permute.xlu0 %2884  ;;  %v1507_v53 = vsel %vm1480_vm8, %v1474_v31, %v2881_v0  ;;  %v1508_v23 = vsel %vm1480_vm8, %v1475_v48, %v2882_v37  ;;  %v996_v11 = vsel %vm3783_vm7, %v3512_v51, 0.0 }
  0xb7   : > { %v3754_v52 = vpack.c.bf16 %v1508_v23, %v1507_v53  ;;  %v2887_v59 = vunpack.i.h.bf16 %v2885_v22  ;;  %v2886_v8 = vunpack.i.l.bf16 %v2885_v22  ;;  %v2890_v16 = vpop.permute.xlu1 %2889 }
  0xb8   : > { %2609 = vmatprep.mubr.msk.bf16.mxu1 %vm1549_vm9, %v3745_v2  ;;  %v2892_v6 = vunpack.i.h.bf16 %v2890_v16  ;;  %v2891_v34 = vunpack.i.l.bf16 %v2890_v16 }
  0xb9   : > { %2610 = vmatmul.mubr.msk.bf16.gmra.mrb[8].mxu1 %vm1549_vm9, %v3754_v52  ;;  %v1461_v1 = vsel %vm1447_vm6, %v3508_v62, %v2887_v59  ;;  %v1460_v30 = vsel %vm1447_vm6, %v978_v41, %v2886_v8 }
  0xba   : > { %v2895_v15 = vpop.permute.xlu0 %2894  ;;  %v1463_v4 = vsel %vm1447_vm6, %v3498_v21, %v2892_v6  ;;  %v1462_v44 = vsel %vm1447_vm6, %v980_v45, %v2891_v34 }
  0xbb   : > { %v2897_v12 = vunpack.i.h.bf16 %v2895_v15  ;;  %v2896_v54 = vunpack.i.l.bf16 %v2895_v15  ;;  %v2900_v14 = vpop.permute.xlu1 %2899 }
  0xbc   : > { %v2902_v32 = vunpack.i.h.bf16 %v2900_v14  ;;  %v2901_v7 = vunpack.i.l.bf16 %v2900_v14 }
  0xbd   : > { %v1493_v18 = vsel %vm1480_vm8, %v1460_v30, %v2896_v54  ;;  %v1494_v33 = vsel %vm1480_vm8, %v1461_v1, %v2897_v12 }
  0xbe   : > { %v3775_v13 = vpack.c.bf16 %v1494_v33, %v1493_v18  ;;  %v2905_v62 = vpop.permute.xlu0 %2904  ;;  %v1495_v28 = vsel %vm1480_vm8, %v1462_v44, %v2901_v7  ;;  %v1496_v27 = vsel %vm1480_vm8, %v1463_v4, %v2902_v32 }
  0xbf   : > { %v1520_v49 = vpack.c.bf16 %v1496_v27, %v1495_v28  ;;  %v2907_v61 = vunpack.i.h.bf16 %v2905_v62  ;;  %v2906_v35 = vunpack.i.l.bf16 %v2905_v62  ;;  %v2910_v21 = vpop.permute.xlu1 %2909 }
  0xc0   : > { %2597 = vmatprep.mubr.msk.bf16.mxu0 %vm1549_vm9, %v3775_v13  ;;  %v2912_v36 = vunpack.i.h.bf16 %v2910_v21  ;;  %v2911_v17 = vunpack.i.l.bf16 %v2910_v21 }
  0xc1   : > { %2598 = vmatmul.mubr.msk.bf16.gmra.mrb[12].mxu0 %vm1549_vm9, %v1520_v49  ;;  %v1477_v0 = vsel %vm1447_vm6, %v3518_v57, %v2907_v61  ;;  %v1476_v19 = vsel %vm1447_vm6, %v994_v58, %v2906_v35 }
  0xc2   : > { %v2915_v60 = vpop.permute.xlu0 %2914  ;;  %2685 = vmatprep.mubr.msk.bf16.mxu0 %vm2940_vm10, %v2939_v47  ;;  %v1479_v51 = vsel %vm1447_vm6, %v3521_v25, %v2912_v36  ;;  %v1478_v23 = vsel %vm1447_vm6, %v996_v11, %v2911_v17  ;;  %vm2164_vm6 = vcmask 31744  }
  0xc3   : > { %v2917_v40 = vunpack.i.h.bf16 %v2915_v60  ;;  %v2916_v37 = vunpack.i.l.bf16 %v2915_v60  ;;  %v2920_v48 = vpop.permute.xlu1 %2919 }
  0xc4   : > { %v2922_v42 = vunpack.i.h.bf16 %v2920_v48  ;;  %v2921_v53 = vunpack.i.l.bf16 %v2920_v48 }
  0xc5   : > { %v1509_v31 = vsel %vm1480_vm8, %v1476_v19, %v2916_v37  ;;  %v1510_v22 = vsel %vm1480_vm8, %v1477_v0, %v2917_v40 }
  0xc6   : > { %v3806_v5 = vpack.c.bf16 %v1510_v22, %v1509_v31  ;;  %v1511_v59 = vsel %vm1480_vm8, %v1478_v23, %v2921_v53  ;;  %v1512_v57 = vsel %vm1480_vm8, %v1479_v51, %v2922_v42  ;;  %vm2368_vm8 = vcmask 25600  }
  0xc7   : > { %v1528_v8 = vpack.c.bf16 %v1512_v57, %v1511_v59 }
  0xc8   : > { %2613 = vmatprep.mubr.msk.bf16.mxu1 %vm1549_vm9, %v3806_v5 }
  0xc9   : > { %2614 = vmatmul.mubr.msk.bf16.gmra.mrb[12].mxu1 %vm1549_vm9, %v1528_v8  ;;  %2686 = vmatmul.mubr.msk.bf16.vlgmr.msra.gmra.mrb[16].mxu0 %vm1549_vm9, %v3584_v56 }
  0xca   : > { %2621 = vmatprep.mubr.msk.bf16.mxu1 %vm2940_vm10, %v2939_v47  ;;  %2689 = vmatprep.mubr.msk.bf16.mxu0 %vm2940_vm10, %v2939_v47 }
  0xd1   : > { %2622 = vmatmul.mubr.msk.bf16.vlgmr.msra.gmra.mrb[16].mxu1 %vm1549_vm9, %v3566_v29  ;;  %2690 = vmatmul.mubr.msk.bf16.gmra.mrb[20].mxu0 %vm1549_vm9, %v3643_v55 }
  0xd2   : > { %2625 = vmatprep.mubr.msk.bf16.mxu1 %vm2940_vm10, %v2939_v47  ;;  %2693 = vmatprep.mubr.msk.bf16.mxu0 %vm2940_vm10, %v2939_v47 }
  0xd9   : > { %2626 = vmatmul.mubr.msk.bf16.gmra.mrb[20].mxu1 %vm1549_vm9, %v3584_v56  ;;  %2694 = vmatmul.mubr.msk.bf16.gmra.mrb[24].mxu0 %vm1549_vm9, %v3649_v39 }
  0xda   : > { %2629 = vmatprep.mubr.msk.bf16.mxu1 %vm2940_vm10, %v2939_v47  ;;  %2697 = vmatprep.mubr.msk.bf16.mxu0 %vm2940_vm10, %v2939_v47 }
  0xe1   : > { %2630 = vmatmul.mubr.msk.bf16.gmra.mrb[24].mxu1 %vm1549_vm9, %v3643_v55  ;;  %2698 = vmatmul.mubr.msk.bf16.gmra.mrb[28].mxu0 %vm1549_vm9, %v3708_v63 }
  0xe2   : > { %2633 = vmatprep.mubr.msk.bf16.mxu1 %vm2940_vm10, %v2939_v47  ;;  %2701 = vmatprep.mubr.msk.bf16.mxu0 %vm2940_vm10, %v2939_v47 }
  0xe9   : > { %2634 = vmatmul.mubr.msk.bf16.gmra.mrb[28].mxu1 %vm1549_vm9, %v3649_v39  ;;  %2702 = vmatmul.mubr.msk.bf16.gmra.mrb[32].mxu0 %vm1549_vm9, %v3721_v46 }
  0xea   : > { %2637 = vmatprep.mubr.msk.bf16.mxu1 %vm2940_vm10, %v2939_v47  ;;  %2705 = vmatprep.mubr.msk.bf16.mxu0 %vm2940_vm10, %v2939_v47 }
  0xf1   : > { %2638 = vmatmul.mubr.msk.bf16.gmra.mrb[32].mxu1 %vm1549_vm9, %v3708_v63  ;;  %2706 = vmatmul.mubr.msk.bf16.gmra.mrb[36].mxu0 %vm1549_vm9, %v3775_v13 }
  0xf2   : > { %2641 = vmatprep.mubr.msk.bf16.mxu1 %vm2940_vm10, %v2939_v47  ;;  %2709 = vmatprep.mubr.msk.bf16.mxu0 %vm2940_vm10, %v2939_v47 }
  0xf9   : > { %2642 = vmatmul.mubr.msk.bf16.gmra.mrb[36].mxu1 %vm1549_vm9, %v3721_v46  ;;  %2710 = vmatmul.mubr.msk.bf16.gmra.mrb[40].mxu0 %vm1549_vm9, %v1520_v49 }
  0xfa   : > { %2645 = vmatprep.mubr.msk.bf16.mxu1 %vm2940_vm10, %v2939_v47  ;;  %2713 = vmatprep.mubr.msk.bf16.mxu0 %vm2940_vm10, %v2939_v47 }
 0x101   : > { %2646 = vmatmul.mubr.msk.bf16.gmra.mrb[40].mxu1 %vm1549_vm9, %v3775_v13  ;;  %2714 = vmatmul.mubr.msk.bf16.gmra.mrb[44].mxu0 %vm1549_vm9, %v3600_v26 }
 0x102   : > { %2649 = vmatprep.mubr.msk.bf16.mxu1 %vm2940_vm10, %v2939_v47  ;;  %2717 = vmatprep.mubr.msk.bf16.mxu0 %vm2940_vm10, %v2939_v47 }
 0x109   : > { %2650 = vmatmul.mubr.msk.bf16.gmra.mrb[44].mxu1 %vm1549_vm9, %v1520_v49  ;;  %2718 = vmatmul.mubr.msk.bf16.gmra.mrb[48].mxu0 %vm1549_vm9, %v3612_v20 }
 0x10a   : > { %2653 = vmatprep.mubr.msk.bf16.mxu1 %vm2940_vm10, %v2939_v47  ;;  %2721 = vmatprep.mubr.msk.bf16.mxu0 %vm2940_vm10, %v2939_v47 }
 0x111   : > { %2654 = vmatmul.mubr.msk.bf16.gmra.mrb[48].mxu1 %vm1549_vm9, %v3600_v26  ;;  %2722 = vmatmul.mubr.msk.bf16.gmra.mrb[52].mxu0 %vm1549_vm9, %v3674_v10 }
 0x112   : > { %2657 = vmatprep.mubr.msk.bf16.mxu1 %vm2940_vm10, %v2939_v47  ;;  %2725 = vmatprep.mubr.msk.bf16.mxu0 %vm2940_vm10, %v2939_v47 }
 0x119   : > { %2658 = vmatmul.mubr.msk.bf16.gmra.mrb[52].mxu1 %vm1549_vm9, %v3612_v20  ;;  %2726 = vmatmul.mubr.msk.bf16.gmra.mrb[56].mxu0 %vm1549_vm9, %v3683_v9  ;;  %v3935_v20 = vld [vmem:[%s4200_s2] ss:$0 sm:$0xff] }
 0x11a   : > { %2661 = vmatprep.mubr.msk.bf16.mxu1 %vm2940_vm10, %v2939_v47  ;;  %2729 = vmatprep.mubr.msk.bf16.mxu0 %vm2940_vm10, %v2939_v47 }
 0x121   : > { %2662 = vmatmul.mubr.msk.bf16.gmra.mrb[56].mxu1 %vm1549_vm9, %v3674_v10  ;;  %2730 = vmatmul.mubr.msk.bf16.gmra.mrb[60].mxu0 %vm1549_vm9, %v3745_v2 }
 0x122   : > { %2665 = vmatprep.mubr.msk.bf16.mxu1 %vm2940_vm10, %v2939_v47  ;;  %2733 = vmatprep.mubr.msk.bf16.mxu0 %vm2940_vm10, %v2939_v47 }
 0x129   : > { %2666 = vmatmul.mubr.msk.bf16.gmra.mrb[60].mxu1 %vm1549_vm9, %v3683_v9  ;;  %2734 = vmatmul.mubr.msk.bf16.gmra.mrb[64].mxu0 %vm1549_vm9, %v3754_v52 }
 0x12a   : > { %2669 = vmatprep.mubr.msk.bf16.mxu1 %vm2940_vm10, %v2939_v47  ;;  %2737 = vmatprep.mubr.msk.bf16.mxu0 %vm2940_vm10, %v2939_v47 }
 0x131   : > { %2670 = vmatmul.mubr.msk.bf16.gmra.mrb[64].mxu1 %vm1549_vm9, %v3745_v2  ;;  %2738 = vmatmul.mubr.msk.bf16.gmra.mrb[68].mxu0 %vm1549_vm9, %v3806_v5 }
 0x132   : > { %2673 = vmatprep.mubr.msk.bf16.mxu1 %vm2940_vm10, %v2939_v47  ;;  %2741 = vmatprep.mubr.msk.bf16.mxu0 %vm2940_vm10, %v2939_v47 }
 0x139   : > { %2674 = vmatmul.mubr.msk.bf16.gmra.mrb[68].mxu1 %vm1549_vm9, %v3754_v52  ;;  %2742 = vmatmul.mubr.msk.bf16.gmra.mrb[72].mxu0 %vm1549_vm9, %v1528_v8 }
 0x13a   : > { %2677 = vmatprep.mubr.msk.bf16.mxu1 %vm2940_vm10, %v2939_v47 }
 0x141   : > { %2678 = vmatmul.mubr.msk.bf16.gmra.mrb[72].mxu1 %vm1549_vm9, %v3806_v5 }
 0x168   : > { %v3928_v25 = vpop.f32.mrb[0].mxu0 }
 0x169   : > { %v1636_v29 = vpop.f32.mrb[1].mxu0  ;;  %v1645_v57 = vadd.f32 %v3928_v25, %v3935_v20 }
 0x16a   : > { %v3930_v56 = vpop.f32.mrb[2].mxu0  ;;  %v1637_v35 = vadd.f32 %v3935_v20, %v1636_v29 }
 0x16b   : > { %v1639_v26 = vpop.f32.mrb[3].mxu0 }
 0x16c   : > { %v2603_v55 = vpop.f32.mrb[0].mxu1  ;;  %v1640_v58 = vadd.f32 %v3935_v20, %v1639_v26 }
 0x16d   : > { %v3938_v39 = vadd.f32 %v2603_v55, %v3935_v20  ;;  %v1700_v10 = vpop.f32.mrb[1].mxu1 }
 0x16e   : > { %v3941_v47 = vadd.f32 %v3935_v20, %v1700_v10  ;;  %v2604_v9 = vpop.f32.mrb[2].mxu1 }
 0x16f   : > { %v3944_v63 = vadd.f32 %v2604_v9, %v3935_v20  ;;  %v1703_v46 = vpop.f32.mrb[3].mxu1  ;;  %v1648_v9 = vadd.f32 %v3930_v56, %v3935_v20 }
 0x170   : > { %v3947_v2 = vadd.f32 %v3935_v20, %v1703_v46 }
 0x174   : > { %v3949_v52 = vpop.f32.mrb[4].mxu0 }
 0x175   : > { %v3951_v16 = vpop.f32.mrb[5].mxu0 }
 0x176   : > { %v3953_v50 = vpop.f32.mrb[6].mxu0  ;;  %v1653_v56 = vadd.f32 %v3935_v20, %v3951_v16 }
 0x177   : > { %v3955_v41 = vpop.f32.mrb[7].mxu0 }
 0x17c   : > { %v2607_v6 = vpop.f32.mrb[4].mxu1 }
 0x17d   : > { %v3958_v34 = vadd.f32 %v2607_v6, %v3935_v20  ;;  %v1716_v15 = vpop.f32.mrb[5].mxu1 }
 0x17e   : > { %v3961_v43 = vadd.f32 %v3935_v20, %v1716_v15  ;;  %v2608_v45 = vpop.f32.mrb[6].mxu1 }
 0x17f   : > { %v3964_v12 = vadd.f32 %v2608_v45, %v3935_v20  ;;  %v1719_v54 = vpop.f32.mrb[7].mxu1 }
 0x180   : > { %v3967_v1 = vadd.f32 %v3935_v20, %v1719_v54 }
 0x184   : > { %v3969_v30 = vpop.f32.mrb[8].mxu0 }
 0x185   : > { %v3971_v14 = vpop.f32.mrb[9].mxu0 }
 0x186   : > { %v3973_v3 = vpop.f32.mrb[10].mxu0 }
 0x187   : > { %v3975_v18 = vpop.f32.mrb[11].mxu0 }
 0x18c   : > { %v2611_v33 = vpop.f32.mrb[8].mxu1 }
 0x18d   : > { %v3978_v32 = vadd.f32 %v2611_v33, %v3935_v20  ;;  %v1732_v7 = vpop.f32.mrb[9].mxu1 }
 0x18e   : > { %v3981_v4 = vadd.f32 %v3935_v20, %v1732_v7  ;;  %v2612_v44 = vpop.f32.mrb[10].mxu1 }
 0x18f   : > { %v3984_v13 = vadd.f32 %v2612_v44, %v3935_v20  ;;  %v1735_v24 = vpop.f32.mrb[11].mxu1 }
 0x190   : > { %v3987_v62 = vadd.f32 %v3935_v20, %v1735_v24 }
 0x194   : > { %v3989_v28 = vpop.f32.mrb[12].mxu0 }
 0x195   : > { %v3991_v27 = vpop.f32.mrb[13].mxu0 }
 0x196   : > { %v3993_v49 = vpop.f32.mrb[14].mxu0 }
 0x197   : > { %v3995_v61 = vpop.f32.mrb[15].mxu0 }
 0x19c   : > { %v2615_v38 = vpop.f32.mrb[12].mxu1  ;;  %v2013_v21 = vpop.f32.mrb[16].mxu0 }
 0x19d   : > { %v4007_v36 = vadd.f32 %v2615_v38, %v3935_v20  ;;  %v2132_v17 = vadd.f32 %v2013_v21, %v1637_v35  ;;  %v1748_v60 = vpop.f32.mrb[13].mxu1  ;;  %v2687_v11 = vpop.f32.mrb[17].mxu0 }
 0x19e   : > { %v4010_v40 = vadd.f32 %v3935_v20, %v1748_v60  ;;  %v2616_v37 = vpop.f32.mrb[14].mxu1  ;;  %v2016_v0 = vpop.f32.mrb[18].mxu0 }
 0x19f   : > { %2165 = vst.msk [vmem:[%s4003_s22] sm:$0xff] %vm2164_vm6, %v2132_v17  ;;  %v2266_v19 = vmul.f32 %v2132_v17, %v2132_v17  ;;  %v4015_v48 = vadd.f32 %v2616_v37, %v3935_v20  ;;  %v2133_v31 = vadd.f32 %v2016_v0, %v1640_v58  ;;  %v1751_v22 = vpop.f32.mrb[15].mxu1  ;;  %v2688_v42 = vpop.f32.mrb[19].mxu0  ;;  %v2197_v51 = vsel %vm2164_vm6, %v2132_v17, 0.0 }
 0x1a0   : > { %v4018_v53 = vadd.f32 %v3935_v20, %v1751_v22 }
 0x1a1   : > { %2166 = vst.msk [vmem:[%s4003_s22 + $0x8] sm:$0xff] %vm2164_vm6, %v2133_v31  ;;  %v2198_v23 = vsel %vm2164_vm6, %v2133_v31, 0.0  ;;  %v2267_v5 = vmul.f32 %v2133_v31, %v2133_v31  ;;  %v2298_v8 = vsel %vm2164_vm6, %v2266_v19, 0.0  ;;  %v1656_v31 = vadd.f32 %v3935_v20, %v3955_v41 }
 0x1a2   : > { %v2199_v59 = vadd.f32 %v2198_v23, %v2197_v51 }
 0x1a3   : > { %v2299_v29 = vsel %vm2164_vm6, %v2267_v5, 0.0 }
 0x1a4   : > { %v2300_v26 = vadd.f32 %v2299_v29, %v2298_v8  ;;  %v1812_v55 = vpop.f32.mrb[16].mxu1  ;;  %v2021_v10 = vpop.f32.mrb[20].mxu0 }
 0x1a5   : > { %v1933_v46 = vadd.f32 %v1812_v55, %v1645_v57  ;;  %v2623_v6 = vpop.f32.mrb[17].mxu1  ;;  %v2691_v15 = vpop.f32.mrb[21].mxu0 }
 0x1a6   : > { %v1815_v45 = vpop.f32.mrb[18].mxu1  ;;  %v2024_v54 = vpop.f32.mrb[22].mxu0 }
 0x1a7   : > { %v2134_v33 = vadd.f32 %v2021_v10, %v1933_v46  ;;  %v1934_v7 = vadd.f32 %v1815_v45, %v1648_v9  ;;  %v2624_v25 = vpop.f32.mrb[19].mxu1  ;;  %v2692_v44 = vpop.f32.mrb[23].mxu0  ;;  %v1661_v46 = vadd.f32 %v3949_v52, %v3935_v20 }
 0x1a8   : > { %v1664_v44 = vadd.f32 %v3953_v50, %v3935_v20 }
 0x1a9   : > { %2167 = vst.msk [vmem:[%s4003_s22 + $0x10] sm:$0xff] %vm2164_vm6, %v2134_v33  ;;  %v2200_v24 = vsel %vm2164_vm6, %v2134_v33, 0.0  ;;  %v2268_v35 = vmul.f32 %v2134_v33, %v2134_v33  ;;  %v2135_v38 = vadd.f32 %v2024_v54, %v1934_v7 }
 0x1aa   : > { %v2201_v21 = vadd.f32 %v2200_v24, %v2199_v59 }
 0x1ab   : > { %v2301_v58 = vsel %vm2164_vm6, %v2268_v35, 0.0  ;;  %2168 = vst.msk [vmem:[%s4003_s22 + $0x18] sm:$0xff] %vm2164_vm6, %v2135_v38  ;;  %v2202_v17 = vsel %vm2164_vm6, %v2135_v38, 0.0  ;;  %v2269_v60 = vmul.f32 %v2135_v38, %v2135_v38 }
 0x1ac   : > { %v2302_v11 = vadd.f32 %v2301_v58, %v2300_v26  ;;  %v2203_v37 = vadd.f32 %v2202_v17, %v2201_v21  ;;  %v1820_v0 = vpop.f32.mrb[20].mxu1  ;;  %v2029_v19 = vpop.f32.mrb[24].mxu0 }
 0x1ad   : > { %v2303_v22 = vsel %vm2164_vm6, %v2269_v60, 0.0  ;;  %v1935_v42 = vadd.f32 %v1820_v0, %v1653_v56  ;;  %v2627_v51 = vpop.f32.mrb[21].mxu1  ;;  %v2695_v16 = vpop.f32.mrb[25].mxu0 }
 0x1ae   : > { %v2304_v23 = vadd.f32 %v2303_v22, %v2302_v11  ;;  %v1823_v5 = vpop.f32.mrb[22].mxu1  ;;  %v2032_v59 = vpop.f32.mrb[26].mxu0  ;;  %v1669_v22 = vadd.f32 %v3935_v20, %v3971_v14 }
 0x1af   : > { %v2136_v57 = vadd.f32 %v2029_v19, %v1935_v42  ;;  %v1936_v8 = vadd.f32 %v1823_v5, %v1656_v31  ;;  %v2628_v29 = vpop.f32.mrb[23].mxu1  ;;  %v2696_v26 = vpop.f32.mrb[27].mxu0 }
 0x1b1   : > { %2169 = vst.msk [vmem:[%s4003_s22 + $0x20] sm:$0xff] %vm2164_vm6, %v2136_v57  ;;  %v2204_v55 = vsel %vm2164_vm6, %v2136_v57, 0.0  ;;  %v2270_v10 = vmul.f32 %v2136_v57, %v2136_v57  ;;  %v2137_v9 = vadd.f32 %v2032_v59, %v1936_v8  ;;  %v1672_v8 = vadd.f32 %v3935_v20, %v3975_v18 }
 0x1b2   : > { %v2205_v41 = vadd.f32 %v2204_v55, %v2203_v37 }
 0x1b3   : > { %v2305_v6 = vsel %vm2164_vm6, %v2270_v10, 0.0  ;;  %2170 = vst.msk [vmem:[%s4003_s22 + $0x28] sm:$0xff] %vm2164_vm6, %v2137_v9  ;;  %v2206_v15 = vsel %vm2164_vm6, %v2137_v9, 0.0  ;;  %v2271_v45 = vmul.f32 %v2137_v9, %v2137_v9 }
 0x1b4   : > { %v2306_v54 = vadd.f32 %v2305_v6, %v2304_v23  ;;  %v2207_v33 = vadd.f32 %v2206_v15, %v2205_v41  ;;  %v1828_v7 = vpop.f32.mrb[24].mxu1  ;;  %v2037_v25 = vpop.f32.mrb[28].mxu0 }
 0x1b5   : > { %v2307_v24 = vsel %vm2164_vm6, %v2271_v45, 0.0  ;;  %v1937_v35 = vadd.f32 %v1828_v7, %v1661_v46  ;;  %v2631_v38 = vpop.f32.mrb[25].mxu1  ;;  %v2699_v52 = vpop.f32.mrb[29].mxu0 }
 0x1b6   : > { %v2308_v21 = vadd.f32 %v2307_v24, %v2306_v54  ;;  %v1831_v56 = vpop.f32.mrb[26].mxu1  ;;  %v2040_v58 = vpop.f32.mrb[30].mxu0 }
 0x1b7   : > { %v2138_v17 = vadd.f32 %v2037_v25, %v1937_v35  ;;  %v1938_v60 = vadd.f32 %v1831_v56, %v1664_v44  ;;  %v2632_v11 = vpop.f32.mrb[27].mxu1  ;;  %v2700_v37 = vpop.f32.mrb[31].mxu0  ;;  %v1677_v25 = vadd.f32 %v3969_v30, %v3935_v20 }
 0x1b9   : > { %2171 = vst.msk [vmem:[%s4003_s22 + $0x30] sm:$0xff] %vm2164_vm6, %v2138_v17  ;;  %v2208_v0 = vsel %vm2164_vm6, %v2138_v17, 0.0  ;;  %v2272_v19 = vmul.f32 %v2138_v17, %v2138_v17  ;;  %v2139_v31 = vadd.f32 %v2040_v58, %v1938_v60  ;;  %v1680_v58 = vadd.f32 %v3973_v3, %v3935_v20 }
 0x1ba   : > { %v2209_v50 = vadd.f32 %v2208_v0, %v2207_v33 }
 0x1bb   : > { %v2309_v42 = vsel %vm2164_vm6, %v2272_v19, 0.0  ;;  %2172 = vst.msk [vmem:[%s4003_s22 + $0x38] sm:$0xff] %vm2164_vm6, %v2139_v31  ;;  %v2210_v51 = vsel %vm2164_vm6, %v2139_v31, 0.0  ;;  %v2273_v16 = vmul.f32 %v2139_v31, %v2139_v31 }
 0x1bc   : > { %v2310_v23 = vadd.f32 %v2309_v42, %v2308_v21  ;;  %v2211_v5 = vadd.f32 %v2210_v51, %v2209_v50  ;;  %v1836_v59 = vpop.f32.mrb[28].mxu1  ;;  %v2045_v57 = vpop.f32.mrb[32].mxu0 }
 0x1bd   : > { %v2311_v29 = vsel %vm2164_vm6, %v2273_v16, 0.0  ;;  %v1939_v26 = vadd.f32 %v1836_v59, %v1669_v22  ;;  %v2635_v55 = vpop.f32.mrb[29].mxu1  ;;  %v2703_v14 = vpop.f32.mrb[33].mxu0 }
 0x1be   : > { %v2312_v10 = vadd.f32 %v2311_v29, %v2310_v23  ;;  %v1839_v9 = vpop.f32.mrb[30].mxu1  ;;  %v2048_v41 = vpop.f32.mrb[34].mxu0 }
 0x1bf   : > { %v2140_v46 = vadd.f32 %v2045_v57, %v1939_v26  ;;  %v1940_v6 = vadd.f32 %v1839_v9, %v1672_v8  ;;  %v2636_v15 = vpop.f32.mrb[31].mxu1  ;;  %v2704_v45 = vpop.f32.mrb[35].mxu0 }
 0x1c1   : > { %2173 = vst.msk [vmem:[%s4003_s22 + $0x40] sm:$0xff] %vm2164_vm6, %v2140_v46  ;;  %v2212_v54 = vsel %vm2164_vm6, %v2140_v46, 0.0  ;;  %v2274_v33 = vmul.f32 %v2140_v46, %v2140_v46  ;;  %v2141_v7 = vadd.f32 %v2048_v41, %v1940_v6 }
 0x1c2   : > { %v2213_v18 = vadd.f32 %v2212_v54, %v2211_v5  ;;  %v1685_v5 = vadd.f32 %v3935_v20, %v3991_v27 }
 0x1c3   : > { %v2313_v44 = vsel %vm2164_vm6, %v2274_v33, 0.0  ;;  %2174 = vst.msk [vmem:[%s4003_s22 + $0x48] sm:$0xff] %vm2164_vm6, %v2141_v7  ;;  %v2214_v24 = vsel %vm2164_vm6, %v2141_v7, 0.0  ;;  %v2275_v35 = vmul.f32 %v2141_v7, %v2141_v7 }
 0x1c4   : > { %v2314_v38 = vadd.f32 %v2313_v44, %v2312_v10  ;;  %v2215_v52 = vadd.f32 %v2214_v24, %v2213_v18  ;;  %v1844_v21 = vpop.f32.mrb[32].mxu1  ;;  %v2053_v56 = vpop.f32.mrb[36].mxu0  ;;  %v1688_v10 = vadd.f32 %v3935_v20, %v3995_v61 }
 0x1c5   : > { %v2315_v17 = vsel %vm2164_vm6, %v2275_v35, 0.0  ;;  %v1941_v60 = vadd.f32 %v1844_v21, %v1677_v25  ;;  %v2639_v11 = vpop.f32.mrb[33].mxu1  ;;  %v2707_v30 = vpop.f32.mrb[37].mxu0  ;;  %v1693_v35 = vadd.f32 %v3989_v28, %v3935_v20 }
 0x1c6   : > { %v2316_v37 = vadd.f32 %v2315_v17, %v2314_v38  ;;  %v1847_v0 = vpop.f32.mrb[34].mxu1  ;;  %v2056_v19 = vpop.f32.mrb[38].mxu0  ;;  %v1696_v11 = vadd.f32 %v3993_v49, %v3935_v20 }
 0x1c7   : > { %v2142_v31 = vadd.f32 %v2053_v56, %v1941_v60  ;;  %v1942_v50 = vadd.f32 %v1847_v0, %v1680_v58  ;;  %v2640_v22 = vpop.f32.mrb[35].mxu1  ;;  %v2708_v42 = vpop.f32.mrb[39].mxu0 }
 0x1c9   : > { %2175 = vst.msk [vmem:[%s4003_s22 + $0x50] sm:$0xff] %vm2164_vm6, %v2142_v31  ;;  %v2216_v51 = vsel %vm2164_vm6, %v2142_v31, 0.0  ;;  %v2276_v16 = vmul.f32 %v2142_v31, %v2142_v31  ;;  %v2143_v23 = vadd.f32 %v2056_v19, %v1942_v50 }
 0x1ca   : > { %v2217_v3 = vadd.f32 %v2216_v51, %v2215_v52 }
 0x1cb   : > { %v2317_v59 = vsel %vm2164_vm6, %v2276_v16, 0.0  ;;  %2176 = vst.msk [vmem:[%s4003_s22 + $0x58] sm:$0xff] %vm2164_vm6, %v2143_v23  ;;  %v2218_v57 = vsel %vm2164_vm6, %v2143_v23, 0.0  ;;  %v2277_v8 = vmul.f32 %v2143_v23, %v2143_v23 }
 0x1cc   : > { %v2318_v29 = vadd.f32 %v2317_v59, %v2316_v37  ;;  %v2219_v26 = vadd.f32 %v2218_v57, %v2217_v3  ;;  %v1852_v55 = vpop.f32.mrb[36].mxu1  ;;  %v2061_v14 = vpop.f32.mrb[40].mxu0 }
 0x1cd   : > { %v2319_v9 = vsel %vm2164_vm6, %v2277_v8, 0.0  ;;  %v1943_v41 = vadd.f32 %v1852_v55, %v1685_v5  ;;  %v2643_v46 = vpop.f32.mrb[37].mxu1  ;;  %v2711_v27 = vpop.f32.mrb[41].mxu0 }
 0x1ce   : > { %v2320_v6 = vadd.f32 %v2319_v9, %v2318_v29  ;;  %v1855_v15 = vpop.f32.mrb[38].mxu1  ;;  %v2064_v45 = vpop.f32.mrb[42].mxu0 }
 0x1cf   : > { %v2144_v54 = vadd.f32 %v2061_v14, %v1943_v41  ;;  %v1944_v33 = vadd.f32 %v1855_v15, %v1688_v10  ;;  %v2644_v7 = vpop.f32.mrb[39].mxu1  ;;  %v2712_v18 = vpop.f32.mrb[43].mxu0 }
 0x1d1   : > { %2177 = vst.msk [vmem:[%s4003_s22 + $0x60] sm:$0xff] %vm2164_vm6, %v2144_v54  ;;  %v2220_v25 = vsel %vm2164_vm6, %v2144_v54, 0.0  ;;  %v2278_v44 = vmul.f32 %v2144_v54, %v2144_v54  ;;  %v2145_v24 = vadd.f32 %v2064_v45, %v1944_v33 }
 0x1d2   : > { %v2221_v61 = vadd.f32 %v2220_v25, %v2219_v26 }
 0x1d3   : > { %v2321_v38 = vsel %vm2164_vm6, %v2278_v44, 0.0  ;;  %2178 = vst.msk [vmem:[%s4003_s22 + $0x68] sm:$0xff] %vm2164_vm6, %v2145_v24  ;;  %v2222_v52 = vsel %vm2164_vm6, %v2145_v24, 0.0  ;;  %v2279_v21 = vmul.f32 %v2145_v24, %v2145_v24 }
 0x1d4   : > { %v2322_v56 = vadd.f32 %v2321_v38, %v2320_v6  ;;  %v2223_v58 = vadd.f32 %v2222_v52, %v2221_v61  ;;  %v1860_v17 = vpop.f32.mrb[40].mxu1  ;;  %v2069_v60 = vpop.f32.mrb[44].mxu0 }
 0x1d5   : > { %v2323_v30 = vsel %vm2164_vm6, %v2279_v21, 0.0  ;;  %v1945_v37 = vadd.f32 %v1860_v17, %v1693_v35  ;;  %v2647_v28 = vpop.f32.mrb[41].mxu1  ;;  %v2715_v0 = vpop.f32.mrb[45].mxu0 }
 0x1d6   : > { %v2324_v19 = vadd.f32 %v2323_v30, %v2322_v56  ;;  %v1863_v31 = vpop.f32.mrb[42].mxu1  ;;  %v2072_v50 = vpop.f32.mrb[46].mxu0 }
 0x1d7   : > { %v2146_v22 = vadd.f32 %v2069_v60, %v1945_v37  ;;  %v1946_v42 = vadd.f32 %v1863_v31, %v1696_v11  ;;  %v2648_v51 = vpop.f32.mrb[43].mxu1  ;;  %v2716_v16 = vpop.f32.mrb[47].mxu0 }
 0x1d9   : > { %2179 = vst.msk [vmem:[%s4003_s22 + $0x70] sm:$0xff] %vm2164_vm6, %v2146_v22  ;;  %v2224_v23 = vsel %vm2164_vm6, %v2146_v22, 0.0  ;;  %v2280_v3 = vmul.f32 %v2146_v22, %v2146_v22  ;;  %v2147_v5 = vadd.f32 %v2072_v50, %v1946_v42 }
 0x1da   : > { %v2225_v20 = vadd.f32 %v2224_v23, %v2223_v58 }
 0x1db   : > { %v2325_v49 = vsel %vm2164_vm6, %v2280_v3, 0.0  ;;  %2180 = vst.msk [vmem:[%s4003_s22 + $0x78] sm:$0xff] %vm2164_vm6, %v2147_v5  ;;  %v2226_v59 = vsel %vm2164_vm6, %v2147_v5, 0.0  ;;  %v2281_v57 = vmul.f32 %v2147_v5, %v2147_v5 }
 0x1dc   : > { %v2326_v8 = vadd.f32 %v2325_v49, %v2324_v19  ;;  %v2227_v29 = vadd.f32 %v2226_v59, %v2225_v20  ;;  %v1868_v26 = vpop.f32.mrb[44].mxu1  ;;  %v2077_v55 = vpop.f32.mrb[48].mxu0 }
 0x1dd   : > { %v2327_v14 = vsel %vm2164_vm6, %v2281_v57, 0.0  ;;  %v1947_v10 = vadd.f32 %v1868_v26, %v3941_v47  ;;  %v2651_v9 = vpop.f32.mrb[45].mxu1  ;;  %v2719_v41 = vpop.f32.mrb[49].mxu0 }
 0x1de   : > { %v2328_v46 = vadd.f32 %v2327_v14, %v2326_v8  ;;  %v1871_v27 = vpop.f32.mrb[46].mxu1  ;;  %v2080_v6 = vpop.f32.mrb[50].mxu0 }
 0x1df   : > { %v2148_v15 = vadd.f32 %v2077_v55, %v1947_v10  ;;  %v1948_v45 = vadd.f32 %v1871_v27, %v3947_v2  ;;  %v2652_v54 = vpop.f32.mrb[47].mxu1  ;;  %v2720_v33 = vpop.f32.mrb[51].mxu0 }
 0x1e1   : > { %2181 = vst.msk [vmem:[%s4003_s22 + $0x80] sm:$0xff] %vm2164_vm6, %v2148_v15  ;;  %v2228_v7 = vsel %vm2164_vm6, %v2148_v15, 0.0  ;;  %v2282_v18 = vmul.f32 %v2148_v15, %v2148_v15  ;;  %v2149_v25 = vadd.f32 %v2080_v6, %v1948_v45 }
 0x1e2   : > { %v2229_v44 = vadd.f32 %v2228_v7, %v2227_v29 }
 0x1e3   : > { %v2329_v47 = vsel %vm2164_vm6, %v2282_v18, 0.0  ;;  %2182 = vst.msk [vmem:[%s4003_s22 + $0x88] sm:$0xff] %vm2164_vm6, %v2149_v25  ;;  %v2230_v24 = vsel %vm2164_vm6, %v2149_v25, 0.0  ;;  %v2283_v61 = vmul.f32 %v2149_v25, %v2149_v25 }
 0x1e4   : > { %v2330_v35 = vadd.f32 %v2329_v47, %v2328_v46  ;;  %v2231_v38 = vadd.f32 %v2230_v24, %v2229_v44  ;;  %v1876_v2 = vpop.f32.mrb[48].mxu1  ;;  %v2085_v52 = vpop.f32.mrb[52].mxu0 }
 0x1e5   : > { %v2331_v21 = vsel %vm2164_vm6, %v2283_v61, 0.0  ;;  %v1949_v56 = vadd.f32 %v1876_v2, %v3938_v39  ;;  %v2655_v58 = vpop.f32.mrb[49].mxu1  ;;  %v2723_v17 = vpop.f32.mrb[53].mxu0 }
 0x1e6   : > { %v2332_v60 = vadd.f32 %v2331_v21, %v2330_v35  ;;  %v1879_v11 = vpop.f32.mrb[50].mxu1  ;;  %v2088_v30 = vpop.f32.mrb[54].mxu0 }
 0x1e7   : > { %v2150_v37 = vadd.f32 %v2085_v52, %v1949_v56  ;;  %v1950_v28 = vadd.f32 %v1879_v11, %v3944_v63  ;;  %v2656_v0 = vpop.f32.mrb[51].mxu1  ;;  %v2724_v19 = vpop.f32.mrb[55].mxu0 }
 0x1e9   : > { %2183 = vst.msk [vmem:[%s4003_s22 + $0x90] sm:$0xff] %vm2164_vm6, %v2150_v37  ;;  %v2232_v31 = vsel %vm2164_vm6, %v2150_v37, 0.0  ;;  %v2284_v50 = vmul.f32 %v2150_v37, %v2150_v37  ;;  %v2151_v22 = vadd.f32 %v2088_v30, %v1950_v28 }
 0x1ea   : > { %v2233_v42 = vadd.f32 %v2232_v31, %v2231_v38 }
 0x1eb   : > { %v2333_v39 = vsel %vm2164_vm6, %v2284_v50, 0.0  ;;  %2184 = vst.msk [vmem:[%s4003_s22 + $0x98] sm:$0xff] %vm2164_vm6, %v2151_v22  ;;  %v2234_v51 = vsel %vm2164_vm6, %v2151_v22, 0.0  ;;  %v2285_v16 = vmul.f32 %v2151_v22, %v2151_v22 }
 0x1ec   : > { %v2334_v23 = vadd.f32 %v2333_v39, %v2332_v60  ;;  %v2235_v3 = vadd.f32 %v2234_v51, %v2233_v42  ;;  %v1884_v63 = vpop.f32.mrb[52].mxu1  ;;  %v2093_v5 = vpop.f32.mrb[56].mxu0 }
 0x1ed   : > { %v2335_v20 = vsel %vm2164_vm6, %v2285_v16, 0.0  ;;  %v1951_v49 = vadd.f32 %v1884_v63, %v3961_v43  ;;  %v2659_v59 = vpop.f32.mrb[53].mxu1  ;;  %v2727_v57 = vpop.f32.mrb[57].mxu0 }
 0x1ee   : > { %v2336_v8 = vadd.f32 %v2335_v20, %v2334_v23  ;;  %v1887_v29 = vpop.f32.mrb[54].mxu1  ;;  %v2096_v26 = vpop.f32.mrb[58].mxu0 }
 0x1ef   : > { %v2152_v55 = vadd.f32 %v2093_v5, %v1951_v49  ;;  %v1952_v14 = vadd.f32 %v1887_v29, %v3967_v1  ;;  %v2660_v10 = vpop.f32.mrb[55].mxu1  ;;  %v2728_v9 = vpop.f32.mrb[59].mxu0 }
 0x1f1   : > { %2185 = vst.msk [vmem:[%s4003_s22 + $0xa0] sm:$0xff] %vm2164_vm6, %v2152_v55  ;;  %v2236_v41 = vsel %vm2164_vm6, %v2152_v55, 0.0  ;;  %v2286_v46 = vmul.f32 %v2152_v55, %v2152_v55  ;;  %v2153_v27 = vadd.f32 %v2096_v26, %v1952_v14 }
 0x1f2   : > { %v2237_v6 = vadd.f32 %v2236_v41, %v2235_v3 }
 0x1f3   : > { %v2337_v43 = vsel %vm2164_vm6, %v2286_v46, 0.0  ;;  %2186 = vst.msk [vmem:[%s4003_s22 + $0xa8] sm:$0xff] %vm2164_vm6, %v2153_v27  ;;  %v2238_v15 = vsel %vm2164_vm6, %v2153_v27, 0.0  ;;  %v2287_v45 = vmul.f32 %v2153_v27, %v2153_v27 }
 0x1f4   : > { %v2338_v54 = vadd.f32 %v2337_v43, %v2336_v8  ;;  %v2239_v33 = vadd.f32 %v2238_v15, %v2237_v6  ;;  %v1892_v1 = vpop.f32.mrb[56].mxu1  ;;  %v2101_v7 = vpop.f32.mrb[60].mxu0 }
 0x1f5   : > { %v2339_v18 = vsel %vm2164_vm6, %v2287_v45, 0.0  ;;  %v1953_v25 = vadd.f32 %v1892_v1, %v3958_v34  ;;  %v2663_v44 = vpop.f32.mrb[57].mxu1  ;;  %v2731_v47 = vpop.f32.mrb[61].mxu0 }
 0x1f6   : > { %v2340_v24 = vadd.f32 %v2339_v18, %v2338_v54  ;;  %v1895_v61 = vpop.f32.mrb[58].mxu1  ;;  %v2104_v35 = vpop.f32.mrb[62].mxu0 }
 0x1f7   : > { %v2154_v38 = vadd.f32 %v2101_v7, %v1953_v25  ;;  %v1954_v2 = vadd.f32 %v1895_v61, %v3964_v12  ;;  %v2664_v52 = vpop.f32.mrb[59].mxu1  ;;  %v2732_v21 = vpop.f32.mrb[63].mxu0 }
 0x1f9   : > { %2187 = vst.msk [vmem:[%s4003_s22 + $0xb0] sm:$0xff] %vm2164_vm6, %v2154_v38  ;;  %v2240_v56 = vsel %vm2164_vm6, %v2154_v38, 0.0  ;;  %v2288_v58 = vmul.f32 %v2154_v38, %v2154_v38  ;;  %v2155_v17 = vadd.f32 %v2104_v35, %v1954_v2 }
 0x1fa   : > { %v2241_v60 = vadd.f32 %v2240_v56, %v2239_v33 }
 0x1fb   : > { %v2341_v34 = vsel %vm2164_vm6, %v2288_v58, 0.0  ;;  %2188 = vst.msk [vmem:[%s4003_s22 + $0xb8] sm:$0xff] %vm2164_vm6, %v2155_v17  ;;  %v2242_v11 = vsel %vm2164_vm6, %v2155_v17, 0.0  ;;  %v2289_v30 = vmul.f32 %v2155_v17, %v2155_v17 }
 0x1fc   : > { %v2342_v37 = vadd.f32 %v2341_v34, %v2340_v24  ;;  %v2243_v28 = vadd.f32 %v2242_v11, %v2241_v60  ;;  %v1900_v12 = vpop.f32.mrb[60].mxu1  ;;  %v2109_v0 = vpop.f32.mrb[64].mxu0 }
 0x1fd   : > { %v2343_v19 = vsel %vm2164_vm6, %v2289_v30, 0.0  ;;  %v1955_v31 = vadd.f32 %v1900_v12, %v3981_v4  ;;  %v2667_v50 = vpop.f32.mrb[61].mxu1  ;;  %v2735_v22 = vpop.f32.mrb[65].mxu0 }
 0x1fe   : > { %v2344_v42 = vadd.f32 %v2343_v19, %v2342_v37  ;;  %v1903_v39 = vpop.f32.mrb[62].mxu1  ;;  %v2112_v51 = vpop.f32.mrb[66].mxu0 }
 0x1ff   : > { %v2156_v16 = vadd.f32 %v2109_v0, %v1955_v31  ;;  %v1956_v23 = vadd.f32 %v1903_v39, %v3987_v62  ;;  %v2668_v3 = vpop.f32.mrb[63].mxu1  ;;  %v2736_v63 = vpop.f32.mrb[67].mxu0 }
 0x201   : > { %2189 = vst.msk [vmem:[%s4003_s22 + $0xc0] sm:$0xff] %vm2164_vm6, %v2156_v16  ;;  %v2244_v5 = vsel %vm2164_vm6, %v2156_v16, 0.0  ;;  %v2290_v20 = vmul.f32 %v2156_v16, %v2156_v16  ;;  %v2157_v49 = vadd.f32 %v2112_v51, %v1956_v23 }
 0x202   : > { %v2245_v59 = vadd.f32 %v2244_v5, %v2243_v28 }
 0x203   : > { %v2345_v4 = vsel %vm2164_vm6, %v2290_v20, 0.0  ;;  %2190 = vst.msk [vmem:[%s4003_s22 + $0xc8] sm:$0xff] %vm2164_vm6, %v2157_v49  ;;  %v2246_v57 = vsel %vm2164_vm6, %v2157_v49, 0.0  ;;  %v2291_v8 = vmul.f32 %v2157_v49, %v2157_v49 }
 0x204   : > { %v2346_v29 = vadd.f32 %v2345_v4, %v2344_v42  ;;  %v2247_v26 = vadd.f32 %v2246_v57, %v2245_v59  ;;  %v1908_v62 = vpop.f32.mrb[64].mxu1  ;;  %v2117_v55 = vpop.f32.mrb[68].mxu0 }
 0x205   : > { %v2347_v14 = vsel %vm2164_vm6, %v2291_v8, 0.0  ;;  %v1957_v10 = vadd.f32 %v1908_v62, %v3978_v32  ;;  %v2671_v9 = vpop.f32.mrb[65].mxu1  ;;  %v2739_v41 = vpop.f32.mrb[69].mxu0 }
 0x206   : > { %v2348_v46 = vadd.f32 %v2347_v14, %v2346_v29  ;;  %v1911_v27 = vpop.f32.mrb[66].mxu1  ;;  %v2120_v6 = vpop.f32.mrb[70].mxu0 }
 0x207   : > { %v2158_v43 = vadd.f32 %v2117_v55, %v1957_v10  ;;  %v1958_v15 = vadd.f32 %v1911_v27, %v3984_v13  ;;  %v2672_v45 = vpop.f32.mrb[67].mxu1  ;;  %v2740_v54 = vpop.f32.mrb[71].mxu0 }
 0x209   : > { %2191 = vst.msk [vmem:[%s4003_s22 + $0xd0] sm:$0xff] %vm2164_vm6, %v2158_v43  ;;  %v2248_v33 = vsel %vm2164_vm6, %v2158_v43, 0.0  ;;  %v2292_v1 = vmul.f32 %v2158_v43, %v2158_v43  ;;  %v2159_v7 = vadd.f32 %v2120_v6, %v1958_v15 }
 0x20a   : > { %v2249_v18 = vadd.f32 %v2248_v33, %v2247_v26 }
 0x20b   : > { %v2349_v32 = vsel %vm2164_vm6, %v2292_v1, 0.0  ;;  %2192 = vst.msk [vmem:[%s4003_s22 + $0xd8] sm:$0xff] %vm2164_vm6, %v2159_v7  ;;  %v2250_v25 = vsel %vm2164_vm6, %v2159_v7, 0.0  ;;  %v2293_v44 = vmul.f32 %v2159_v7, %v2159_v7 }
 0x20c   : > { %v2350_v47 = vadd.f32 %v2349_v32, %v2348_v46  ;;  %v2251_v24 = vadd.f32 %v2250_v25, %v2249_v18  ;;  %v1916_v13 = vpop.f32.mrb[68].mxu1  ;;  %v2125_v61 = vpop.f32.mrb[72].mxu0 }
 0x20d   : > { %v2351_v35 = vsel %vm2164_vm6, %v2293_v44, 0.0  ;;  %v1959_v38 = vadd.f32 %v1916_v13, %v4010_v40  ;;  %v2675_v2 = vpop.f32.mrb[69].mxu1  ;;  %v2743_v52 = vpop.f32.mrb[73].mxu0 }
 0x20e   : > { %v2352_v21 = vadd.f32 %v2351_v35, %v2350_v47  ;;  %v1919_v56 = vpop.f32.mrb[70].mxu1  ;;  %v2128_v58 = vpop.f32.mrb[74].mxu0 }
 0x20f   : > { %v2160_v17 = vadd.f32 %v2125_v61, %v1959_v38  ;;  %v1960_v60 = vadd.f32 %v1919_v56, %v4018_v53  ;;  %v2676_v34 = vpop.f32.mrb[71].mxu1  ;;  %v2744_v11 = vpop.f32.mrb[75].mxu0 }
 0x211   : > { %2193 = vst.msk [vmem:[%s4003_s22 + $0xe0] sm:$0xff] %vm2164_vm6, %v2160_v17  ;;  %v2252_v30 = vsel %vm2164_vm6, %v2160_v17, 0.0  ;;  %v2294_v37 = vmul.f32 %v2160_v17, %v2160_v17  ;;  %v2161_v28 = vadd.f32 %v2128_v58, %v1960_v60 }
 0x212   : > { %v2253_v12 = vadd.f32 %v2252_v30, %v2251_v24 }
 0x213   : > { %v2353_v40 = vsel %vm2164_vm6, %v2294_v37, 0.0  ;;  %2194 = vst.msk [vmem:[%s4003_s22 + $0xe8] sm:$0xff] %vm2164_vm6, %v2161_v28  ;;  %v2254_v0 = vsel %vm2164_vm6, %v2161_v28, 0.0  ;;  %v2295_v19 = vmul.f32 %v2161_v28, %v2161_v28 }
 0x214   : > { %v2354_v31 = vadd.f32 %v2353_v40, %v2352_v21  ;;  %v2255_v53 = vadd.f32 %v2254_v0, %v2253_v12  ;;  %v1924_v50 = vpop.f32.mrb[72].mxu1 }
 0x215   : > { %v2355_v22 = vsel %vm2164_vm6, %v2295_v19, 0.0  ;;  %v1961_v42 = vadd.f32 %v1924_v50, %v4007_v36  ;;  %v2679_v39 = vpop.f32.mrb[73].mxu1 }
 0x216   : > { %v2356_v51 = vadd.f32 %v2355_v22, %v2354_v31  ;;  %v1927_v16 = vpop.f32.mrb[74].mxu1 }
 0x217   : > { %2195 = vst.msk [vmem:[%s4003_s22 + $0xf0] sm:$0xff] %vm2164_vm6, %v1961_v42  ;;  %v2256_v23 = vsel %vm2164_vm6, %v1961_v42, 0.0  ;;  %v2296_v3 = vmul.f32 %v1961_v42, %v1961_v42  ;;  %v1962_v63 = vadd.f32 %v1927_v16, %v4015_v48  ;;  %v2680_v5 = vpop.f32.mrb[75].mxu1 }
 0x218   : > { %v2257_v20 = vadd.f32 %v2256_v23, %v2255_v53 }
 0x219   : > { %v2357_v49 = vsel %vm2164_vm6, %v2296_v3, 0.0  ;;  %2196 = vst.msk [vmem:[%s4003_s22 + $0xf8] sm:$0xff] %vm2164_vm6, %v1962_v63  ;;  %v2258_v59 = vsel %vm2164_vm6, %v1962_v63, 0.0  ;;  %v2297_v36 = vmul.f32 %v1962_v63, %v1962_v63 }
 0x21a   : > { %v2358_v4 = vadd.f32 %v2357_v49, %v2356_v51  ;;  %v2259_v57 = vadd.f32 %v2258_v59, %v2257_v20 }
 0x21b   : > { %v2359_v8 = vsel %vm2164_vm6, %v2297_v36, 0.0 }
 0x21c   : > { %v2260_v29 = vrot.slane %v2259_v57, 4  ;;  %v2360_v26 = vadd.f32 %v2359_v8, %v2358_v4 }
 0x21e   : > { %v2261_v62 = vadd.f32 %v2260_v29, %v2259_v57  ;;  %v2361_v55 = vrot.slane %v2360_v26, 4 }
 0x220   : > { %v2262_v14 = vrot.slane %v2261_v62, 2  ;;  %v2362_v48 = vadd.f32 %v2361_v55, %v2360_v26 }
 0x222   : > { %v2263_v10 = vadd.f32 %v2262_v14, %v2261_v62  ;;  %v2363_v9 = vrot.slane %v2362_v48, 2 }
 0x224   : > { %v2264_v41 = vrot.slane %v2263_v10, 1  ;;  %v2364_v46 = vadd.f32 %v2363_v9, %v2362_v48 }
 0x226   : > { %v2365_v27 = vrot.slane %v2364_v46, 1  ;;  %v2265_v6 = vadd.f32 %v2264_v41, %v2263_v10 }
 0x228   : > { %v2366_v43 = vadd.f32 %v2365_v27, %v2364_v46 }
 0x22a   : > { %v2367_v15 = vsel %vm805_vm11, %v2265_v6, %v2366_v43 }
 0x22b   : > { %2369 = vst.msk [vmem:[%s290_s25] sm:$0x3] %vm2368_vm8, %v2367_v15 }
 0x22c PF: > { %s19_s24 = sadd.s32 1, %s2935_s24  }
 0x22d   : > { %p16_p4 = scmp.ge.s32.totalorder %s19_s24, 4  }
 0x22f   :  { %18 = sbr.rel (!%p16_p4) target bundleno = 1 (0x1), region = 88 }

// kernel: unet_up_block.5
= control target key start
LH: loop header
LB: loop body
LE: loop exit
PB: predicated region body
PF: predicated region fallthrough
CT: control target
= control target key end

     0   :  { %s3127_s26 = smov 0   ;;  %s4443_s0 = inlined_call_operand.vmem [shape: f32[2,256,4], index: 0, kind: input, shape index: {}]   ;;  %s4444_s1 = inlined_call_operand.vmem [shape: bf16[3,12,4], index: 1, kind: input, shape index: {}]   ;;  %s4445_s2 = inlined_call_operand.vmem [shape: f32[1,4], index: 2, kind: input, shape index: {}]   ;;  %s4446_s3 = inlined_call_operand.vmem [shape: f32[1,4], index: 3, kind: input, shape index: {}]   ;;  %s4447_s4 = inlined_call_operand.vmem [shape: f32[1,4], index: 4, kind: input, shape index: {}]   ;;  %s4448_s5 = inlined_call_operand.<no memory space> [shape: f32[1], index: 5, kind: input, shape index: {}]   ;;  %s4449_s6 = inlined_call_operand.vmem [shape: f32[2,256,4], index: 6, kind: output, shape index: {0}]   ;;  %s4450_s7 = inlined_call_operand.vmem [shape: f32[2,2,4], index: 7, kind: output, shape index: {1}]  }
   0x1   :  { %13 = sst [smem:[#allocation2]] %s4448_s5 }
   0x2 LB: > { %s2616_s27 = sadd.s32 4294967295, %s3078_s26   ;;  %p2620_p0 = scmp.ge.s32.totalorder %s3078_s26, 1  ;;  %s3078_s26 = sphi %s3127_s26, %s19_s26  }
   0x3   : > { %p241_p1 = scmp.lt.s32.totalorder %s3078_s26, 3 }
   0x5   : > { %p242_p2 = pnand %p2620_p0, %p241_p1 }
   0x6   : > { %p277_p3 = scmp.lt.s32.totalorder (!%p242_p2), %s2616_s27, 1  ;;  %s402_s28 = sld [smem:[#allocation2]] (!%p242_p2)  ;;  %v500_v0 = vlaneseq (!%p242_p2)  ;;  %v3141_v1 = vld [vmem:[%s4446_s3] ss:$0 sm:$0xff] (!%p242_p2)  ;;  %vm1206_vm4 = vcmask (!%p242_p2), 1046528  }
   0x7   : > { %245 = sbr.rel (%p242_p2) target bundleno = 577 (0x241), region = 44  ;;  %v3153_v2 = vld [vmem:[%s4447_s4] ss:$0 sm:$0xff] (!%p242_p2)  ;;  %s3080_s13 = smov (!%p242_p2), 4  }
   0x8   : > { %v3158_v6 = vshrl.u32 (!%p242_p2), %v500_v0, 7  ;;  %s3081_s14 = smov (!%p242_p2), 8  }
   0xa   : > { %v502_v24 = vadd.s32 (!%p242_p2), 8, %v3158_v6  ;;  %v3190_v33 = vadd.s32 (!%p242_p2), 24, %v3158_v6  ;;  %v3196_v36 = vadd.s32 (!%p242_p2), 136, %v3158_v6  ;;  %v3205_v41 = vadd.s32 (!%p242_p2), 152, %v3158_v6 }
   0xb   : > { %v3212_v44 = vadd.s32 (!%p242_p2), 40, %v3158_v6  ;;  %v3215_v45 = vadd.s32 (!%p242_p2), 56, %v3158_v6  ;;  %v3223_v49 = vadd.s32 (!%p242_p2), 168, %v3158_v6 }
   0xc   : > { %v3166_v13 = vstv (!%p242_p2), %s402_s28  ;;  %v544_v52 = vand.u32 (!%p242_p2), 15, %v502_v24  ;;  %v558_v53 = vand.u32 (!%p242_p2), 15, %v3190_v33 }
   0xe   : > { %s4506_s27 = smov (!%p277_p3, %s2616_s27), 1  ;;  %vm3245_vm9 = vcmp.le.s32.totalorder %v544_v52, 14  ;;  %vm3291_vm15 = vcmp.le.s32.totalorder %v558_v53, 14 }
   0xf   : > { %s2684_s5 = sshll.u32 %s4506_s27, 8  ;;  %s2625_s28 = sshll.u32 %s4506_s27, 1 }
  0x10   : > { %s3148_s10 = scalar_lea.vmem %s4443_s0, %s2684_s5  ;;  %s4248_s25 = scalar_lea.vmem %s4449_s6, %s2684_s5 }
  0x11   : > { %v310_v3 = vld [vmem:[%s3148_s10 + $0x90] sm:$0xff]  ;;  %v311_v4 = vld [vmem:[%s3148_s10 + $0x98] sm:$0xff]  ;;  %v292_v5 = vld [vmem:[%s3148_s10] sm:$0xff]  ;;  %s290_s30 = scalar_lea.vmem %s4450_s7, %s2625_s28 }
  0x12   : > { %v349_v7 = vmul.f32 %v3141_v1, %v310_v3  ;;  %v350_v8 = vmul.f32 %v3141_v1, %v311_v4  ;;  %v293_v9 = vld [vmem:[%s3148_s10 + $0x8] sm:$0xff]  ;;  %v331_v10 = vmul.f32 %v3141_v1, %v292_v5  ;;  %v298_v11 = vld [vmem:[%s3148_s10 + $0x30] sm:$0xff]  ;;  %v299_v12 = vld [vmem:[%s3148_s10 + $0x38] sm:$0xff] }
  0x13   : > { %v332_v14 = vmul.f32 %v3141_v1, %v293_v9  ;;  %v337_v15 = vmul.f32 %v3141_v1, %v298_v11  ;;  %v338_v16 = vmul.f32 %v3141_v1, %v299_v12  ;;  %v294_v23 = vld [vmem:[%s3148_s10 + $0x10] sm:$0xff]  ;;  %v295_v27 = vld [vmem:[%s3148_s10 + $0x18] sm:$0xff]  ;;  %v308_v40 = vld [vmem:[%s3148_s10 + $0x80] sm:$0xff] }
  0x14   : > { %v388_v17 = vadd.f32 %v3153_v2, %v349_v7  ;;  %v389_v18 = vadd.f32 %v3153_v2, %v350_v8  ;;  %v370_v19 = vadd.f32 %v3153_v2, %v331_v10  ;;  %v333_v32 = vmul.f32 %v3141_v1, %v294_v23  ;;  %v309_v43 = vld [vmem:[%s3148_s10 + $0x88] sm:$0xff]  ;;  %v296_v57 = vld [vmem:[%s3148_s10 + $0x20] sm:$0xff] }
  0x15   : > { %v371_v20 = vadd.f32 %v3153_v2, %v332_v14  ;;  %v376_v21 = vadd.f32 %v3153_v2, %v337_v15  ;;  %v377_v22 = vadd.f32 %v3153_v2, %v338_v16  ;;  %v334_v35 = vmul.f32 %v3141_v1, %v295_v27  ;;  %v297_v5 = vld [vmem:[%s3148_s10 + $0x28] sm:$0xff]  ;;  %v312_v33 = vld [vmem:[%s3148_s10 + $0xa0] sm:$0xff] }
  0x16   : > { %vm421_vm0 = vcmp.ge.f32.partialorder %v388_v17, 0.0  ;;  %vm422_vm1 = vcmp.ge.f32.partialorder %v389_v18, 0.0  ;;  %v454_v25 = vmul.f32 %v3166_v13, %v388_v17  ;;  %v455_v26 = vmul.f32 %v3166_v13, %v389_v18 }
  0x17   : > { %vm403_vm2 = vcmp.ge.f32.partialorder %v370_v19, 0.0  ;;  %vm404_vm3 = vcmp.ge.f32.partialorder %v371_v20, 0.0  ;;  %v436_v28 = vmul.f32 %v3166_v13, %v370_v19  ;;  %v437_v29 = vmul.f32 %v3166_v13, %v371_v20 }
  0x18   : > { %v3184_v30 = vsel %vm421_vm0, %v388_v17, %v454_v25  ;;  %v3186_v31 = vsel %vm422_vm1, %v389_v18, %v455_v26  ;;  %vm409_vm5 = vcmp.ge.f32.partialorder %v376_v21, 0.0  ;;  %v442_v39 = vmul.f32 %v3166_v13, %v376_v21 }
  0x19   : > { %v2924_v34 = vpack.i.bf16 %v3186_v31, %v3184_v30  ;;  %v3198_v37 = vsel %vm403_vm2, %v370_v19, %v436_v28  ;;  %v3200_v38 = vsel %vm404_vm3, %v371_v20, %v437_v29  ;;  %vm410_vm6 = vcmp.ge.f32.partialorder %v377_v22, 0.0 }
  0x1a   : > { %v2909_v42 = vpack.i.bf16 %v3200_v38, %v3198_v37  ;;  %v443_v46 = vmul.f32 %v3166_v13, %v377_v22  ;;  %v3219_v47 = vsel %vm409_vm5, %v376_v21, %v442_v39  ;;  %v372_v48 = vadd.f32 %v3153_v2, %v333_v32 }
  0x1b   : > { %2925 = vrot.lane.b32.xlu1 %v2924_v34, %s3080_s13  ;;  %v373_v50 = vadd.f32 %v3153_v2, %v334_v35  ;;  %v347_v51 = vmul.f32 %v3141_v1, %v308_v40  ;;  %v348_v56 = vmul.f32 %v3141_v1, %v309_v43  ;;  %v1208_v58 = vrot.slane %v3200_v38, 1 }
  0x1c   : > { %2910 = vrot.lane.b32.xlu0 %v2909_v42, %s3080_s13  ;;  %v3229_v54 = vsel %vm410_vm6, %v377_v22, %v443_v46  ;;  %vm405_vm7 = vcmp.ge.f32.partialorder %v372_v48, 0.0  ;;  %v438_v55 = vmul.f32 %v3166_v13, %v372_v48  ;;  %v1207_v59 = vrot.slane %v3198_v37, 1 }
  0x1d   : > { %v2934_v60 = vpack.i.bf16 %v3229_v54, %v3219_v47  ;;  %vm406_vm8 = vcmp.ge.f32.partialorder %v373_v50, 0.0  ;;  %v439_v61 = vmul.f32 %v3166_v13, %v373_v50  ;;  %v386_v63 = vadd.f32 %v3153_v2, %v347_v51 }
  0x1e   : > { %v3239_v62 = vsel %vm405_vm7, %v372_v48, %v438_v55  ;;  %v387_v0 = vadd.f32 %v3153_v2, %v348_v56  ;;  %v335_v7 = vmul.f32 %v3141_v1, %v296_v57  ;;  %v656_v8 = vand.u32 15, %v3196_v36  ;;  %v300_v57 = vld [vmem:[%s3148_s10 + $0x40] sm:$0xff] }
  0x1f   : > { %2935 = vrot.lane.b32.xlu1 %v2934_v60, %s3080_s13  ;;  %v1210_v3 = vrot.slane %v3239_v62, 1  ;;  %v3252_v9 = vsel %vm406_vm8, %v373_v50, %v439_v61  ;;  %vm419_vm10 = vcmp.ge.f32.partialorder %v386_v63, 0.0  ;;  %v452_v10 = vmul.f32 %v3166_v13, %v386_v63 }
  0x20   : > { %vm420_vm11 = vcmp.ge.f32.partialorder %v387_v0, 0.0  ;;  %v1242_v11 = vrot.slane %v3184_v30, 1  ;;  %v2914_v12 = vpack.i.bf16 %v3252_v9, %v3239_v62  ;;  %v453_v14 = vmul.f32 %v3166_v13, %v387_v0 }
  0x21   : > { %v1209_v15 = vsel %vm1206_vm4, %v1207_v59, %v1208_v58  ;;  %v3260_v16 = vsel %vm419_vm10, %v386_v63, %v452_v10  ;;  %v1211_v17 = vsel %vm1206_vm4, %v1208_v58, %v1210_v3  ;;  %v336_v18 = vmul.f32 %v3141_v1, %v297_v5  ;;  %v313_v63 = vld [vmem:[%s3148_s10 + $0xa8] sm:$0xff] }
  0x22   : > { %v374_v19 = vadd.f32 %v3153_v2, %v335_v7  ;;  %v1244_v20 = vrot.slane %v3186_v31, 1  ;;  %2915 = vrot.lane.b32.xlu0 %v2914_v12, %s3080_s13  ;;  %v3267_v21 = vsel %vm420_vm11, %v387_v0, %v453_v14  ;;  %v1238_v22 = vrot.slane %v3260_v16, 1  ;;  %v314_v7 = vld [vmem:[%s3148_s10 + $0xb0] sm:$0xff] }
  0x23   : > { %v1368_v23 = vsel %vm3245_vm9, %v1211_v17, 0.0  ;;  %v1212_v24 = vrot.slane %v3252_v9, 1  ;;  %v1240_v25 = vrot.slane %v3267_v21, 1  ;;  %v2919_v26 = vpack.i.bf16 %v3267_v21, %v3260_v16 }
  0x24   : > { %v2939_v27 = vpack.i.bf16 %v1368_v23, %v1209_v15  ;;  %v1218_v28 = vrot.slane %v3219_v47, 1  ;;  %v375_v29 = vadd.f32 %v3153_v2, %v336_v18  ;;  %vm407_vm12 = vcmp.ge.f32.partialorder %v374_v19, 0.0 }
  0x25   : > { %v440_v32 = vmul.f32 %v3166_v13, %v374_v19  ;;  %v1220_v34 = vrot.slane %v3229_v54, 1  ;;  %vm1191_vm13 = vcmp.le.s32.totalorder %v656_v8, 14  ;;  %v1241_v35 = vsel %vm1206_vm4, %v1238_v22, %v1240_v25  ;;  %v315_v8 = vld [vmem:[%s3148_s10 + $0xb8] sm:$0xff] }
  0x26   : > { %2940 = vrot.lane.b32.xlu1 %v2939_v27, %s3081_s14  ;;  %v1243_v36 = vsel %vm1206_vm4, %v1240_v25, %v1242_v11  ;;  %2920 = vrot.lane.b32.xlu0 %v2919_v26, %s3080_s13  ;;  %vm408_vm14 = vcmp.ge.f32.partialorder %v375_v29, 0.0  ;;  %v441_v39 = vmul.f32 %v3166_v13, %v375_v29  ;;  %v1213_v48 = vsel %vm1206_vm4, %v1210_v3, %v1212_v24 }
  0x27   : > { %v3288_v40 = vsel %vm407_vm12, %v374_v19, %v440_v32  ;;  %v1384_v42 = vsel %vm1191_vm13, %v1243_v36, 0.0  ;;  %v351_v50 = vmul.f32 %v3141_v1, %v312_v33  ;;  %v670_v55 = vand.u32 15, %v3205_v41  ;;  %v316_v19 = vld [vmem:[%s3148_s10 + $0xc0] sm:$0xff] }
  0x28   : > { %v1214_v43 = vrot.slane %v3288_v40, 1  ;;  %v3297_v51 = vsel %vm408_vm14, %v375_v29, %v441_v39  ;;  %v2949_v52 = vpack.i.bf16 %v1384_v42, %v1241_v35  ;;  %v572_v56 = vand.u32 15, %v3212_v44 }
  0x29   : > { %v1216_v53 = vrot.slane %v3297_v51, 1  ;;  %v2929_v58 = vpack.i.bf16 %v3297_v51, %v3288_v40  ;;  %v1245_v60 = vsel %vm1206_vm4, %v1242_v11, %v1244_v20  ;;  %v390_v41 = vadd.f32 %v3153_v2, %v351_v50 }
  0x2a   : > { %v1215_v59 = vsel %vm1206_vm4, %v1212_v24, %v1214_v43  ;;  %vm3312_vm0 = vcmp.le.s32.totalorder %v670_v55, 14  ;;  %vm1179_vm1 = vcmp.le.s32.totalorder %v572_v56, 14  ;;  %v339_v5 = vmul.f32 %v3141_v1, %v300_v57 }
  0x2b   : > { %v1370_v61 = vsel %vm3291_vm15, %v1215_v59, 0.0  ;;  %2930 = vrot.lane.b32.xlu0 %v2929_v58, %s3080_s13  ;;  %v1217_v3 = vsel %vm1206_vm4, %v1214_v43, %v1216_v53  ;;  %v1219_v4 = vsel %vm1206_vm4, %v1216_v53, %v1218_v28  ;;  %vm423_vm2 = vcmp.ge.f32.partialorder %v390_v41, 0.0 }
  0x2c   : > { %v2944_v0 = vpack.i.bf16 %v1370_v61, %v1213_v48  ;;  %v456_v10 = vmul.f32 %v3166_v13, %v390_v41  ;;  %v1372_v11 = vsel %vm1179_vm1, %v1219_v4, 0.0  ;;  %v586_v12 = vand.u32 15, %v3215_v45  ;;  %v302_v61 = vld [vmem:[%s3148_s10 + $0x50] sm:$0xff] }
  0x2d   : > { %v2959_v14 = vpack.i.bf16 %v1372_v11, %v1217_v3  ;;  %v378_v15 = vadd.f32 %v3153_v2, %v339_v5  ;;  %v1221_v17 = vsel %vm1206_vm4, %v1218_v28, %v1220_v34  ;;  %v352_v18 = vmul.f32 %v3141_v1, %v313_v63  ;;  %v306_v63 = vld [vmem:[%s3148_s10 + $0x70] sm:$0xff] }
  0x2e   : > { %2945 = vrot.lane.b32.xlu1 %v2944_v0, %s3081_s14  ;;  %v3332_v23 = vsel %vm423_vm2, %v390_v41, %v456_v10  ;;  %vm3334_vm3 = vcmp.le.s32.totalorder %v586_v12, 14  ;;  %v353_v45 = vmul.f32 %v3141_v1, %v314_v7  ;;  %v354_v25 = vmul.f32 %v3141_v1, %v315_v8  ;;  %v303_v41 = vld [vmem:[%s3148_s10 + $0x58] sm:$0xff] }
  0x2f   : > { %2950 = vrot.lane.b32.xlu0 %v2949_v52, %s3081_s14  ;;  %v1246_v26 = vrot.slane %v3332_v23, 1  ;;  %vm411_vm5 = vcmp.ge.f32.partialorder %v378_v15, 0.0  ;;  %v444_v27 = vmul.f32 %v3166_v13, %v378_v15  ;;  %v391_v28 = vadd.f32 %v3153_v2, %v352_v18 }
  0x30   : > { %v392_v29 = vadd.f32 %v3153_v2, %v353_v45  ;;  %v393_v32 = vadd.f32 %v3153_v2, %v354_v25  ;;  %v684_v33 = vand.u32 15, %v3223_v49  ;;  %v355_v35 = vmul.f32 %v3141_v1, %v316_v19 }
  0x31   : > { %v1247_v36 = vsel %vm1206_vm4, %v1244_v20, %v1246_v26  ;;  %v3351_v39 = vsel %vm411_vm5, %v378_v15, %v444_v27  ;;  %vm424_vm6 = vcmp.ge.f32.partialorder %v391_v28, 0.0  ;;  %v457_v42 = vmul.f32 %v3166_v13, %v391_v28 }
  0x32   : > { %v1386_v43 = vsel %vm3312_vm0, %v1247_v36, 0.0  ;;  %v1222_v46 = vrot.slane %v3351_v39, 1  ;;  %vm425_vm7 = vcmp.ge.f32.partialorder %v392_v29, 0.0  ;;  %vm426_vm8 = vcmp.ge.f32.partialorder %v393_v32, 0.0 }
  0x33   : > { %v2954_v49 = vpack.i.bf16 %v1386_v43, %v1245_v60  ;;  %2960 = vrot.lane.b32.xlu0 %v2959_v14, %s3081_s14  ;;  %v3358_v48 = vsel %vm424_vm6, %v391_v28, %v457_v42  ;;  %v458_v20 = vmul.f32 %v3166_v13, %v392_v29  ;;  %v459_v50 = vmul.f32 %v3166_v13, %v393_v32  ;;  %v301_v60 = vld [vmem:[%s3148_s10 + $0x48] sm:$0xff]  ;;  %v304_v28 = vld [vmem:[%s3148_s10 + $0x60] sm:$0xff] }
  0x34   : > { %v1223_v52 = vsel %vm1206_vm4, %v1220_v34, %v1222_v46  ;;  %v1248_v55 = vrot.slane %v3358_v48, 1  ;;  %v2969_v56 = vpack.i.bf16 %v3358_v48, %v3332_v23  ;;  %v524_v57 = vadd.s32 184, %v3158_v6 }
  0x35   : > { %2955 = vrot.lane.b32.xlu1 %v2954_v49, %s3081_s14  ;;  %v1374_v53 = vsel %vm3334_vm3, %v1223_v52, 0.0  ;;  %v3374_v58 = vsel %vm425_vm7, %v392_v29, %v458_v20  ;;  %v3376_v59 = vsel %vm426_vm8, %v393_v32, %v459_v50  ;;  %vm3382_vm9 = vcmp.le.s32.totalorder %v684_v33, 14 }
  0x36   : > { %v2964_v34 = vpack.i.bf16 %v1374_v53, %v1221_v17  ;;  %v1252_v44 = vrot.slane %v3376_v59, 1  ;;  %v2974_v0 = vpack.i.bf16 %v3376_v59, %v3374_v58  ;;  %v1250_v3 = vrot.slane %v3374_v58, 1 }
  0x37   : > { %2970 = vrot.lane.b32.xlu0 %v2969_v56, %s3080_s13  ;;  %v1249_v4 = vsel %vm1206_vm4, %v1246_v26, %v1248_v55  ;;  %v394_v5 = vadd.f32 %v3153_v2, %v355_v35  ;;  %v698_v7 = vand.u32 15, %v524_v57  ;;  %v340_v8 = vmul.f32 %v3141_v1, %v301_v60  ;;  %v317_v60 = vld [vmem:[%s3148_s10 + $0xc8] sm:$0xff] }
  0x38   : > { %v341_v10 = vmul.f32 %v3141_v1, %v302_v61  ;;  %v342_v11 = vmul.f32 %v3141_v1, %v303_v41  ;;  %v1251_v12 = vsel %vm1206_vm4, %v1248_v55, %v1250_v3  ;;  %v1253_v15 = vsel %vm1206_vm4, %v1250_v3, %v1252_v44  ;;  %v318_v61 = vld [vmem:[%s3148_s10 + $0xd0] sm:$0xff]  ;;  %v319_v41 = vld [vmem:[%s3148_s10 + $0xd8] sm:$0xff] }
  0x39   : > { %2965 = vrot.lane.b32.xlu1 %v2964_v34, %s3081_s14  ;;  %vm427_vm10 = vcmp.ge.f32.partialorder %v394_v5, 0.0  ;;  %v460_v14 = vmul.f32 %v3166_v13, %v394_v5  ;;  %v1388_v17 = vsel %vm3382_vm9, %v1251_v12, 0.0  ;;  %vm3401_vm11 = vcmp.le.s32.totalorder %v698_v7, 14 }
  0x3a   : > { %v379_v19 = vadd.f32 %v3153_v2, %v340_v8  ;;  %v380_v24 = vadd.f32 %v3153_v2, %v341_v10  ;;  %v2979_v45 = vpack.i.bf16 %v1388_v17, %v1249_v4  ;;  %v381_v26 = vadd.f32 %v3153_v2, %v342_v11 }
  0x3b   : > { %v3407_v25 = vsel %vm427_vm10, %v394_v5, %v460_v14  ;;  %v510_v27 = vadd.s32 72, %v3158_v6  ;;  %v343_v49 = vmul.f32 %v3141_v1, %v304_v28  ;;  %v512_v20 = vadd.s32 88, %v3158_v6 }
  0x3c   : > { %v1254_v29 = vrot.slane %v3407_v25, 1  ;;  %vm412_vm12 = vcmp.ge.f32.partialorder %v379_v19, 0.0  ;;  %v445_v32 = vmul.f32 %v3166_v13, %v379_v19  ;;  %vm413_vm13 = vcmp.ge.f32.partialorder %v380_v24, 0.0  ;;  %2980 = vrot.lane.b32.xlu0 %v2979_v45, %s3081_s14 }
  0x3d   : > { %2975 = vrot.lane.b32.xlu1 %v2974_v0, %s3080_s13  ;;  %vm414_vm14 = vcmp.ge.f32.partialorder %v381_v26, 0.0  ;;  %v446_v33 = vmul.f32 %v3166_v13, %v380_v24  ;;  %v447_v35 = vmul.f32 %v3166_v13, %v381_v26  ;;  %v600_v36 = vand.u32 15, %v510_v27  ;;  %v320_v27 = vld [vmem:[%s3148_s10 + $0xe0] sm:$0xff] }
  0x3e   : > { %v1255_v42 = vsel %vm1206_vm4, %v1252_v44, %v1254_v29  ;;  %v3421_v43 = vsel %vm412_vm12, %v379_v19, %v445_v32  ;;  %v382_v4 = vadd.f32 %v3153_v2, %v343_v49  ;;  %v614_v5 = vand.u32 15, %v512_v20 }
  0x3f   : > { %v1390_v50 = vsel %vm3401_vm11, %v1255_v42, 0.0  ;;  %v1224_v52 = vrot.slane %v3421_v43, 1  ;;  %v2989_v55 = vpack.i.bf16 %v3421_v43, %v3351_v39  ;;  %v3430_v57 = vsel %vm413_vm13, %v380_v24, %v446_v33 }
  0x40   : > { %v2984_v56 = vpack.i.bf16 %v1390_v50, %v1253_v15  ;;  %v3432_v53 = vsel %vm414_vm14, %v381_v26, %v447_v35  ;;  %vm3441_vm15 = vcmp.le.s32.totalorder %v600_v36, 14  ;;  %v1226_v0 = vrot.slane %v3430_v57, 1 }
  0x41   : > { %2990 = vrot.lane.b32.xlu0 %v2989_v55, %s3080_s13  ;;  %v1228_v34 = vrot.slane %v3432_v53, 1  ;;  %v2994_v44 = vpack.i.bf16 %v3432_v53, %v3430_v57  ;;  %v1225_v3 = vsel %vm1206_vm4, %v1222_v46, %v1224_v52  ;;  %v356_v7 = vmul.f32 %v3141_v1, %v317_v60 }
  0x42   : > { %2985 = vrot.lane.b32.xlu1 %v2984_v56, %s3081_s14  ;;  %v357_v8 = vmul.f32 %v3141_v1, %v318_v61  ;;  %v358_v10 = vmul.f32 %v3141_v1, %v319_v41  ;;  %v526_v11 = vadd.s32 200, %v3158_v6  ;;  %v1227_v12 = vsel %vm1206_vm4, %v1224_v52, %v1226_v0 }
  0x43   : > { %vm415_vm0 = vcmp.ge.f32.partialorder %v382_v4, 0.0  ;;  %v448_v14 = vmul.f32 %v3166_v13, %v382_v4  ;;  %v1376_v46 = vsel %vm3441_vm15, %v1227_v12, 0.0  ;;  %vm3459_vm1 = vcmp.le.s32.totalorder %v614_v5, 14 }
  0x44   : > { %v395_v17 = vadd.f32 %v3153_v2, %v356_v7  ;;  %v396_v18 = vadd.f32 %v3153_v2, %v357_v8  ;;  %v2999_v19 = vpack.i.bf16 %v1376_v46, %v1225_v3  ;;  %v1229_v45 = vsel %vm1206_vm4, %v1226_v0, %v1228_v34  ;;  %v307_v0 = vld [vmem:[%s3148_s10 + $0x78] sm:$0xff] }
  0x45   : > { %v3466_v24 = vsel %vm415_vm0, %v382_v4, %v448_v14  ;;  %v397_v26 = vadd.f32 %v3153_v2, %v358_v10  ;;  %v712_v33 = vand.u32 15, %v526_v11  ;;  %v359_v20 = vmul.f32 %v3141_v1, %v320_v27 }
  0x46   : > { %2995 = vrot.lane.b32.xlu1 %v2994_v44, %s3080_s13  ;;  %v1230_v28 = vrot.slane %v3466_v24, 1  ;;  %vm428_vm2 = vcmp.ge.f32.partialorder %v395_v17, 0.0  ;;  %v461_v32 = vmul.f32 %v3166_v13, %v395_v17  ;;  %3000 = vrot.lane.b32.xlu0 %v2999_v19, %s3081_s14  ;;  %vm429_vm3 = vcmp.ge.f32.partialorder %v396_v18, 0.0  ;;  %v305_v44 = vld [vmem:[%s3148_s10 + $0x68] sm:$0xff] }
  0x47   : > { %vm430_vm5 = vcmp.ge.f32.partialorder %v397_v26, 0.0  ;;  %v462_v35 = vmul.f32 %v3166_v13, %v396_v18  ;;  %v463_v36 = vmul.f32 %v3166_v13, %v397_v26  ;;  %v528_v56 = vadd.s32 216, %v3158_v6 }
  0x48   : > { %v1231_v42 = vsel %vm1206_vm4, %v1228_v34, %v1230_v28  ;;  %v3479_v49 = vsel %vm428_vm2, %v395_v17, %v461_v32  ;;  %v398_v34 = vadd.f32 %v3153_v2, %v359_v20  ;;  %v1019_v3 = vrot.slane %v3186_v31, 7 }
  0x49   : > { %v1378_v50 = vsel %vm3459_vm1, %v1231_v42, 0.0  ;;  %v1256_v52 = vrot.slane %v3479_v49, 1  ;;  %v3009_v55 = vpack.i.bf16 %v3479_v49, %v3407_v25  ;;  %v3488_v61 = vsel %vm429_vm3, %v396_v18, %v462_v35 }
  0x4a   : > { %v3004_v60 = vpack.i.bf16 %v1378_v50, %v1229_v45  ;;  %v3490_v41 = vsel %vm430_vm5, %v397_v26, %v463_v36  ;;  %vm3501_vm6 = vcmp.le.s32.totalorder %v712_v33, 14  ;;  %v1258_v8 = vrot.slane %v3488_v61, 1 }
  0x4b   : > { %3010 = vrot.lane.b32.xlu0 %v3009_v55, %s3080_s13  ;;  %v1260_v4 = vrot.slane %v3490_v41, 1  ;;  %v3014_v5 = vpack.i.bf16 %v3490_v41, %v3488_v61  ;;  %v1257_v10 = vsel %vm1206_vm4, %v1254_v29, %v1256_v52  ;;  %vm431_vm7 = vcmp.ge.f32.partialorder %v398_v34, 0.0 }
  0x4c   : > { %3005 = vrot.lane.b32.xlu1 %v3004_v60, %s3081_s14  ;;  %v464_v11 = vmul.f32 %v3166_v13, %v398_v34  ;;  %v726_v12 = vand.u32 15, %v528_v56  ;;  %v344_v14 = vmul.f32 %v3141_v1, %v305_v44  ;;  %v345_v46 = vmul.f32 %v3141_v1, %v306_v63 }
  0x4d   : > { %v346_v15 = vmul.f32 %v3141_v1, %v307_v0  ;;  %v1259_v17 = vsel %vm1206_vm4, %v1256_v52, %v1258_v8  ;;  %v1261_v19 = vsel %vm1206_vm4, %v1258_v8, %v1260_v4  ;;  %v514_v45 = vadd.s32 104, %v3158_v6  ;;  %v321_v8 = vld [vmem:[%s3148_s10 + $0xe8] sm:$0xff] }
  0x4e   : > { %v3515_v18 = vsel %vm431_vm7, %v398_v34, %v464_v11  ;;  %v1392_v29 = vsel %vm3501_vm6, %v1259_v17, 0.0  ;;  %vm3521_vm8 = vcmp.le.s32.totalorder %v726_v12, 14  ;;  %v383_v32 = vadd.f32 %v3153_v2, %v344_v14 }
  0x4f   : > { %v1262_v27 = vrot.slane %v3515_v18, 1  ;;  %v3019_v33 = vpack.i.bf16 %v1392_v29, %v1257_v10  ;;  %v384_v35 = vadd.f32 %v3153_v2, %v345_v46  ;;  %v385_v36 = vadd.f32 %v3153_v2, %v346_v15  ;;  %v322_v10 = vld [vmem:[%s3148_s10 + $0xf0] sm:$0xff]  ;;  %v323_v15 = vld [vmem:[%s3148_s10 + $0xf8] sm:$0xff] }
  0x50   : > { %3015 = vrot.lane.b32.xlu1 %v3014_v5, %s3080_s13  ;;  %v628_v42 = vand.u32 15, %v514_v45  ;;  %vm416_vm9 = vcmp.ge.f32.partialorder %v383_v32, 0.0  ;;  %v449_v50 = vmul.f32 %v3166_v13, %v383_v32  ;;  %v516_v52 = vadd.s32 120, %v3158_v6 }
  0x51   : > { %v1263_v20 = vsel %vm1206_vm4, %v1260_v4, %v1262_v27  ;;  %3020 = vrot.lane.b32.xlu0 %v3019_v33, %s3081_s14  ;;  %vm417_vm10 = vcmp.ge.f32.partialorder %v384_v35, 0.0  ;;  %vm418_vm11 = vcmp.ge.f32.partialorder %v385_v36, 0.0  ;;  %v450_v56 = vmul.f32 %v3166_v13, %v384_v35 }
  0x52   : > { %v1394_v55 = vsel %vm3521_vm8, %v1263_v20, 0.0  ;;  %vm981_vm12 = vcmask 1040384   ;;  %v1017_v60 = vrot.slane %v3184_v30, 7  ;;  %v3540_v44 = vsel %vm416_vm9, %v383_v32, %v449_v50 }
  0x53   : > { %v3024_v34 = vpack.i.bf16 %v1394_v55, %v1261_v19  ;;  %v451_v63 = vmul.f32 %v3166_v13, %v385_v36  ;;  %v993_v0 = vrot.slane %v3219_v47, 7  ;;  %v1232_v4 = vrot.slane %v3540_v44, 1 }
  0x54   : > { %v3029_v5 = vpack.i.bf16 %v3540_v44, %v3466_v24  ;;  %v3547_v7 = vsel %vm417_vm10, %v384_v35, %v450_v56  ;;  %vm3555_vm13 = vcmp.le.s32.totalorder %v628_v42, 14  ;;  %v642_v46 = vand.u32 15, %v516_v52 }
  0x55   : > { %3025 = vrot.lane.b32.xlu1 %v3024_v34, %s3081_s14  ;;  %v3552_v11 = vsel %vm418_vm11, %v385_v36, %v451_v63  ;;  %v1234_v12 = vrot.slane %v3547_v7, 1  ;;  %v1015_v17 = vrot.slane %v3267_v21, 7  ;;  %v1233_v29 = vsel %vm1206_vm4, %v1230_v28, %v1232_v4 }
  0x56   : > { %3030 = vrot.lane.b32.xlu0 %v3029_v5, %s3080_s13  ;;  %v1236_v19 = vrot.slane %v3552_v11, 1  ;;  %v3034_v45 = vpack.i.bf16 %v3552_v11, %v3547_v7  ;;  %vm1189_vm14 = vcmp.le.s32.totalorder %v642_v46, 14  ;;  %v360_v32 = vmul.f32 %v3141_v1, %v321_v8 }
  0x57   : > { %v1235_v26 = vsel %vm1206_vm4, %v1232_v4, %v1234_v12  ;;  %v361_v33 = vmul.f32 %v3141_v1, %v322_v10  ;;  %v362_v20 = vmul.f32 %v3141_v1, %v323_v15  ;;  %v530_v63 = vadd.s32 232, %v3158_v6 }
  0x58   : > { %v1380_v35 = vsel %vm3555_vm13, %v1235_v26, 0.0  ;;  %v1237_v36 = vsel %vm1206_vm4, %v1234_v12, %v1236_v19  ;;  %v1239_v42 = vsel %vm1206_vm4, %v1236_v19, %v1238_v22  ;;  %v399_v52 = vadd.f32 %v3153_v2, %v360_v32 }
  0x59   : > { %3035 = vrot.lane.b32.xlu1 %v3034_v45, %s3080_s13  ;;  %v3039_v28 = vpack.i.bf16 %v1380_v35, %v1233_v29  ;;  %v1382_v50 = vsel %vm1189_vm14, %v1239_v42, 0.0  ;;  %v400_v55 = vadd.f32 %v3153_v2, %v361_v33  ;;  %v401_v34 = vadd.f32 %v3153_v2, %v362_v20 }
  0x5a   : > { %v3044_v56 = vpack.i.bf16 %v1382_v50, %v1237_v36  ;;  %v532_v4 = vadd.s32 248, %v3158_v6  ;;  %vm432_vm15 = vcmp.ge.f32.partialorder %v399_v52, 0.0  ;;  %v465_v1 = vmul.f32 %v3166_v13, %v399_v52 }
  0x5b   : > { %3040 = vrot.lane.b32.xlu0 %v3039_v28, %s3081_s14  ;;  %vm433_vm0 = vcmp.ge.f32.partialorder %v400_v55, 0.0  ;;  %v466_v22 = vmul.f32 %v3166_v13, %v400_v55  ;;  %vm434_vm1 = vcmp.ge.f32.partialorder %v401_v34, 0.0  ;;  %v467_v5 = vmul.f32 %v3166_v13, %v401_v34 }
  0x5c   : > { %v740_v8 = vand.u32 15, %v530_v63  ;;  %v754_v10 = vand.u32 15, %v532_v4  ;;  %v995_v12 = vrot.slane %v3229_v54, 7  ;;  %v3590_v2 = vsel %vm432_vm15, %v399_v52, %v465_v1 }
  0x5d   : > { %3045 = vrot.lane.b32.xlu1 %v3044_v56, %s3081_s14  ;;  %v3592_v14 = vsel %vm433_vm0, %v400_v55, %v466_v22  ;;  %v3599_v46 = vsel %vm981_vm12, %v1015_v17, %v1017_v60  ;;  %v991_v15 = vrot.slane %v3297_v51, 7  ;;  %v1264_v13 = vrot.slane %v3590_v2, 1 }
  0x5e   : > { %v3049_v19 = vpack.i.bf16 %v3590_v2, %v3515_v18  ;;  %v3605_v45 = vsel %vm434_vm1, %v401_v34, %v467_v5  ;;  %v987_v29 = vrot.slane %v3252_v9, 7  ;;  %v985_v26 = vrot.slane %v3239_v62, 7 }
  0x5f   : > { %v3054_v32 = vpack.i.bf16 %v3605_v45, %v3592_v14  ;;  %v1266_v33 = vrot.slane %v3592_v14, 1  ;;  %vm1203_vm2 = vcmp.le.s32.totalorder %v740_v8, 14  ;;  %v1265_v51 = vsel %vm1206_vm4, %v1262_v27, %v1264_v13 }
  0x60   : > { %3050 = vrot.lane.b32.xlu0 %v3049_v19, %s3080_s13  ;;  %vm1205_vm3 = vcmp.le.s32.totalorder %v754_v10, 14  ;;  %v1268_v35 = vrot.slane %v3605_v45, 1  ;;  %v1013_v36 = vrot.slane %v3260_v16, 7  ;;  %v1011_v9 = vrot.slane %v3552_v11, 7 }
  0x61   : > { %3055 = vrot.lane.b32.xlu1 %v3054_v32, %s3080_s13  ;;  %v1267_v62 = vsel %vm1206_vm4, %v1264_v13, %v1266_v33  ;;  %v3626_v42 = vsel %vm981_vm12, %v1017_v60, %v1019_v3  ;;  %v3633_v16 = vsel %vm981_vm12, %v991_v15, %v993_v0  ;;  %v983_v50 = vrot.slane %v3200_v38, 7 }
  0x62   : > { %v1396_v20 = vsel %vm1203_vm2, %v1267_v62, 0.0  ;;  %v1269_v27 = vsel %vm1206_vm4, %v1266_v33, %v1268_v35  ;;  %v1302_v28 = vsel %vm1206_vm4, %v1268_v35, 0.0  ;;  %v989_v52 = vrot.slane %v3288_v40, 7  ;;  %v3069_v40 = vld [vmem:[%s4444_s1 + $0x8] sm:$0x3f]  }
  0x63   : > { %v3059_v55 = vpack.i.bf16 %v1396_v20, %v1265_v51  ;;  %v1398_v56 = vsel %vm1205_vm3, %v1302_v28, 0.0  ;;  %v3642_v60 = vsel %vm981_vm12, %v993_v0, %v995_v12  ;;  %v982_v34 = vrot.slane %v3198_v37, 7 }
  0x64   : > { %v3064_v30 = vpack.i.bf16 %v1398_v56, %v1269_v27  ;;  %v3647_v63 = vsel %vm981_vm12, %v983_v50, %v985_v26  ;;  %v3650_v38 = vsel %vm981_vm12, %v985_v26, %v987_v29  ;;  %v3659_v47 = vsel %vm981_vm12, %v1011_v9, %v1013_v36 }
  0x65   : > { %3060 = vrot.lane.b32.xlu0 %v3059_v55, %s3081_s14  ;;  %v3664_v0 = vsel %vm981_vm12, %v1013_v36, %v1015_v17  ;;  %v3667_v4 = vsel %vm981_vm12, %v987_v29, %v989_v52  ;;  %v3670_v1 = vsel %vm981_vm12, %v989_v52, %v991_v15  ;;  %v1023_v22 = vrot.slane %v3358_v48, 7 }
  0x66   : > { %3065 = vrot.lane.b32.xlu1 %v3064_v30, %s3081_s14  ;;  %v1025_v5 = vrot.slane %v3374_v58, 7  ;;  %vm1769_vm4 = vcmask 1045504   ;;  %v1027_v8 = vrot.slane %v3376_v59, 7  ;;  %v3679_v21 = vsel %vm981_vm12, %v982_v34, %v983_v50 }
  0x67   : > { %2895 = vmatprep.subr.msk.bf16.mxu0 %vm1769_vm4, %v3069_v40  ;;  %2896 = vmatprep.subr.msk.bf16.mxu1 %vm1769_vm4, %v3069_v40  ;;  %v999_v17 = vrot.slane %v3421_v43, 7  ;;  %v1771_v10 = vsel %vm1769_vm4, %v3069_v40, 0  ;;  %v1001_v48 = vrot.slane %v3430_v57, 7  ;;  %v1021_v58 = vrot.slane %v3332_v23, 7 }
  0x68   : > { %2736 = vmatpush3.bf16.msra.mxu0 %v1771_v10  ;;  %2894 = vmatpush3.bf16.msra.mxu1 %v1771_v10  ;;  %v3687_v59 = vsel %vm981_vm12, %v1023_v22, %v1025_v5  ;;  %v1003_v15 = vrot.slane %v3432_v53, 7  ;;  %v3691_v13 = vsel %vm981_vm12, %v1025_v5, %v1027_v8  ;;  %v997_v19 = vrot.slane %v3351_v39, 7 }
  0x69   : > { %v3697_v43 = vsel %vm981_vm12, %v1019_v3, %v1021_v58  ;;  %v3700_v57 = vsel %vm981_vm12, %v1021_v58, %v1023_v22  ;;  %v1031_v23 = vrot.slane %v3479_v49, 7  ;;  %v1033_v29 = vrot.slane %v3488_v61, 7 }
  0x6a   : > { %v3707_v53 = vsel %vm981_vm12, %v995_v12, %v997_v19  ;;  %v3710_v26 = vsel %vm981_vm12, %v997_v19, %v999_v17  ;;  %v1035_v31 = vrot.slane %v3490_v41, 7  ;;  %v3714_v39 = vsel %vm981_vm12, %v999_v17, %v1001_v48 }
  0x6b   : > { %v3717_v3 = vsel %vm981_vm12, %v1001_v48, %v1003_v15  ;;  %v1007_v49 = vrot.slane %v3540_v44, 7  ;;  %v1009_v61 = vrot.slane %v3547_v7, 7  ;;  %v3082_v32 = vmov 0.0  }
  0x6c   : > { %2831 = vmatprep.subr.bf16.mxu0 %v3082_v32  ;;  %2769 = vmatprep.subr.bf16.mxu1 %v3082_v32  ;;  %v1029_v54 = vrot.slane %v3407_v25, 7  ;;  %v3725_v12 = vsel %vm981_vm12, %v1031_v23, %v1033_v29  ;;  %v3728_v41 = vsel %vm981_vm12, %v1033_v29, %v1035_v31  ;;  %v1005_v7 = vrot.slane %v3466_v24, 7 }
  0x6d   : > { %v1039_v51 = vrot.slane %v3590_v2, 7  ;;  %v1043_v35 = vrot.slane %v3605_v45, 7  ;;  %v1041_v25 = vrot.slane %v3592_v14, 7  ;;  %v3741_v36 = vsel %vm981_vm12, %v1007_v49, %v1009_v61 }
  0x6e   : > { %v3731_v33 = vsel %vm981_vm12, %v1027_v8, %v1029_v54  ;;  %v3734_v44 = vsel %vm981_vm12, %v1029_v54, %v1031_v23  ;;  %v3744_v62 = vsel %vm981_vm12, %v1003_v15, %v1005_v7  ;;  %v3747_v20 = vsel %vm981_vm12, %v1005_v7, %v1007_v49 }
  0x6f   : > { %v3752_v27 = vsel %vm981_vm12, %v1009_v61, %v1011_v9  ;;  %v1037_v24 = vrot.slane %v3515_v18, 7  ;;  %v3756_v2 = vsel %vm981_vm12, %v1039_v51, %v1041_v25  ;;  %v3759_v14 = vsel %vm981_vm12, %v1041_v25, %v1043_v35 }
  0x70   : > { %v537_v9 = vand.u32 15, %v3158_v6  ;;  %v503_v18 = vadd.s32 16, %v3158_v6  ;;  %v1077_v56 = vsel %vm981_vm12, 0.0, %v982_v34  ;;  %v517_v40 = vadd.s32 128, %v3158_v6 }
  0x71   : > { %v3762_v45 = vsel %vm981_vm12, %v1035_v31, %v1037_v24  ;;  %v3765_v28 = vsel %vm981_vm12, %v1037_v24, %v1039_v51  ;;  %v519_v8 = vadd.s32 144, %v3158_v6  ;;  %vm1623_vm6 = vcmask 31744  }
  0x72   : > { %vm3773_vm5 = vcmp.ge.s32.totalorder %v537_v9, 1  ;;  %v551_v10 = vand.u32 15, %v503_v18  ;;  %v505_v58 = vadd.s32 32, %v3158_v6  ;;  %vm1656_vm7 = vcmask 64512  }
  0x73   : > { %v1142_v17 = vsel %vm3773_vm5, %v1077_v56, 0.0  ;;  %v649_v15 = vand.u32 15, %v517_v40  ;;  %v663_v31 = vand.u32 15, %v519_v8  ;;  %vm1720_vm8 = vcmask 97280  }
  0x74   : > { %v507_v54 = vadd.s32 48, %v3158_v6  ;;  %vm3791_vm9 = vcmp.ge.s32.totalorder %v551_v10, 1  ;;  %v565_v51 = vand.u32 15, %v505_v58 }
  0x75   : > { %vm3797_vm10 = vcmp.ge.s32.totalorder %v649_v15, 1  ;;  %vm3806_vm11 = vcmp.ge.s32.totalorder %v663_v31, 1  ;;  %v1144_v56 = vsel %vm3791_vm9, %v3647_v63, 0.0 }
  0x76   : > { %v579_v40 = vand.u32 15, %v507_v54  ;;  %vm3816_vm13 = vcmp.ge.s32.totalorder %v565_v51, 1 }
  0x78   : > { %vm3846_vm14 = vcmp.ge.s32.totalorder %v579_v40, 1 }
  0x8d   : > { %v3767_v50 = vpop.permute.xlu1 %2925 }
  0x8e   : > { %v2911_v11 = vpop.permute.xlu0 %2910  ;;  %v2927_v15 = vunpack.i.l.bf16 %v3767_v50 }
  0x8f   : > { %v2913_v22 = vunpack.i.h.bf16 %v2911_v11  ;;  %v2912_v5 = vunpack.i.l.bf16 %v2911_v11 }
  0x91   : > { %v3770_v52 = vpop.permute.xlu1 %2935  ;;  %v1624_v23 = vsel %vm1623_vm6, %v1142_v17, %v2912_v5  ;;  %v1625_v29 = vsel %vm1623_vm6, %v3679_v21, %v2913_v22  ;;  %v3070_v21 = vld [vmem:[%s4444_s1 + $0x10] sm:$0x3f]   ;;  %v1158_v22 = vsel %vm3797_vm10, %v3659_v47, 0.0 }
  0x92   : > { %v2138_v58 = vsel %vm1769_vm4, %v3070_v21, 0  ;;  %v2928_v21 = vunpack.i.h.bf16 %v3767_v50 }
  0x94   : > { %v2916_v30 = vpop.permute.xlu0 %2915 }
  0x95   : > { %v2918_v24 = vunpack.i.h.bf16 %v2916_v30  ;;  %v2917_v11 = vunpack.i.l.bf16 %v2916_v30 }
  0x97   : > { %v1627_v63 = vsel %vm1623_vm6, %v3650_v38, %v2918_v24  ;;  %v1160_v38 = vsel %vm3806_vm11, %v3599_v46, 0.0 }
  0x98   : > { %v2941_v48 = vpop.permute.xlu1 %2940  ;;  %v2921_v37 = vpop.permute.xlu0 %2920  ;;  %v1642_v55 = vsel %vm1623_vm6, %v1160_v38, %v2927_v15  ;;  %v2937_v15 = vunpack.i.l.bf16 %v3770_v52 }
  0x99   : > { %v2943_v19 = vunpack.i.h.bf16 %v2941_v48  ;;  %v2942_v34 = vunpack.i.l.bf16 %v2941_v48  ;;  %v2923_v9 = vunpack.i.h.bf16 %v2921_v37  ;;  %v2922_v5 = vunpack.i.l.bf16 %v2921_v37 }
  0x9a   : > { %v521_v48 = vadd.s32 160, %v3158_v6 }
  0x9b   : > { %v1657_v49 = vsel %vm1656_vm7, %v1624_v23, %v2942_v34  ;;  %v1658_v61 = vsel %vm1656_vm7, %v1625_v29, %v2943_v19  ;;  %v1626_v19 = vsel %vm1623_vm6, %v1144_v56, %v2917_v11  ;;  %v1641_v47 = vsel %vm1623_vm6, %v3664_v0, %v2923_v9 }
  0x9c   : > { %v3795_v35 = vpack.c.bf16 %v1658_v61, %v1657_v49  ;;  %v1640_v49 = vsel %vm1623_vm6, %v1158_v22, %v2922_v5  ;;  %v1146_v0 = vsel %vm3816_vm13, %v3667_v4, 0.0  ;;  %v523_v4 = vadd.s32 176, %v3158_v6  ;;  %v3071_v5 = vld [vmem:[%s4444_s1] sm:$0x3f]  }
  0x9d   : > { %v2931_v18 = vpop.permute.xlu0 %2930  ;;  %v677_v40 = vand.u32 15, %v521_v48  ;;  %vm3083_vm13 = vmmov 0  }
  0x9e   : > { %2737 = vmatprep.mubr.msk.bf16.mxu0 %vm1720_vm8, %v3795_v35  ;;  %v2933_v61 = vunpack.i.h.bf16 %v2931_v18  ;;  %v2932_v54 = vunpack.i.l.bf16 %v2931_v18 }
  0x9f   : > { %vm3875_vm15 = vcmp.ge.s32.totalorder %v677_v40, 1 }
  0xa0   : > { %v2946_v8 = vpop.permute.xlu1 %2945  ;;  %v1629_v50 = vsel %vm1623_vm6, %v3670_v1, %v2933_v61  ;;  %v1628_v56 = vsel %vm1623_vm6, %v1146_v0, %v2932_v54  ;;  %v1643_v1 = vsel %vm1623_vm6, %v3626_v42, %v2928_v21  ;;  %v1162_v21 = vsel %vm3875_vm15, %v3697_v43, 0.0 }
  0xa1   : > { %v2948_v17 = vunpack.i.h.bf16 %v2946_v8  ;;  %v2947_v10 = vunpack.i.l.bf16 %v2946_v8  ;;  %v2951_v37 = vpop.permute.xlu0 %2950 }
  0xa2   : > { %v2953_v29 = vunpack.i.h.bf16 %v2951_v37  ;;  %v2952_v31 = vunpack.i.l.bf16 %v2951_v37 }
  0xa3   : > { %v1660_v34 = vsel %vm1656_vm7, %v1627_v63, %v2948_v17  ;;  %v1659_v23 = vsel %vm1656_vm7, %v1626_v19, %v2947_v10  ;;  %v1148_v19 = vsel %vm3846_vm14, %v3633_v16, 0.0  ;;  %v509_v16 = vadd.s32 64, %v3158_v6 }
  0xa4   : > { %v3831_v7 = vpack.c.bf16 %v1660_v34, %v1659_v23  ;;  %v1673_v51 = vsel %vm1656_vm7, %v1640_v49, %v2952_v31  ;;  %v1674_v25 = vsel %vm1656_vm7, %v1641_v47, %v2953_v29  ;;  %v691_v49 = vand.u32 15, %v523_v4 }
  0xa5   : > { %v2961_v24 = vpop.permute.xlu0 %2960  ;;  %v3844_v11 = vpack.c.bf16 %v1674_v25, %v1673_v51  ;;  %v1630_v61 = vsel %vm1623_vm6, %v1148_v19, %v2937_v15  ;;  %v593_v43 = vand.u32 15, %v509_v16 }
  0xa6   : > { %2738 = vmatmul.mubr.msk.bf16.vlgmr.msra.gmra.mrb[0].mxu0 %vm1720_vm8, %v3831_v7  ;;  %v2963_v46 = vunpack.i.h.bf16 %v2961_v24  ;;  %v2962_v18 = vunpack.i.l.bf16 %v2961_v24  ;;  %vm3895_vm0 = vcmp.ge.s32.totalorder %v691_v49, 1 }
  0xa7   : > { %2832 = vmatpush3.bf16.msra.mxu0 %v2138_v58  ;;  %v2956_v22 = vpop.permute.xlu1 %2955  ;;  %2753 = vmatprep.mubr.msk.bf16.mxu1 %vm1720_vm8, %v3844_v11  ;;  %v2938_v58 = vunpack.i.h.bf16 %v3770_v52  ;;  %v1942_v52 = vsel %vm1769_vm4, %v3071_v5, 0  ;;  %vm3917_vm1 = vcmp.ge.s32.totalorder %v593_v43, 1 }
  0xa8   : > { %v2958_v30 = vunpack.i.h.bf16 %v2956_v22  ;;  %v2957_v8 = vunpack.i.l.bf16 %v2956_v22  ;;  %v1661_v17 = vsel %vm1656_vm7, %v1628_v56, %v2962_v18  ;;  %v1662_v10 = vsel %vm1656_vm7, %v1629_v50, %v2963_v46 }
  0xa9   : > { %v3866_v63 = vpack.c.bf16 %v1662_v10, %v1661_v17  ;;  %v2971_v48 = vpop.permute.xlu0 %2970  ;;  %v1631_v54 = vsel %vm1623_vm6, %v3642_v60, %v2938_v58 }
  0xaa   : > { %v1676_v47 = vsel %vm1656_vm7, %v1643_v1, %v2958_v30  ;;  %v1675_v37 = vsel %vm1656_vm7, %v1642_v55, %v2957_v8  ;;  %v2973_v38 = vunpack.i.h.bf16 %v2971_v48  ;;  %v2972_v0 = vunpack.i.l.bf16 %v2971_v48 }
  0xab   : > { %v3873_v34 = vpack.c.bf16 %v1676_v47, %v1675_v37  ;;  %v2966_v23 = vpop.permute.xlu1 %2965  ;;  %2741 = vmatprep.mubr.msk.bf16.mxu0 %vm1720_vm8, %v3866_v63  ;;  %v1164_v30 = vsel %vm3895_vm0, %v3687_v59, 0.0 }
  0xac   : > { %v2968_v29 = vunpack.i.h.bf16 %v2966_v23  ;;  %v2967_v31 = vunpack.i.l.bf16 %v2966_v23  ;;  %v1645_v55 = vsel %vm1623_vm6, %v3700_v57, %v2973_v38  ;;  %v1644_v50 = vsel %vm1623_vm6, %v1162_v21, %v2972_v0 }
  0xad   : > { %2754 = vmatmul.mubr.msk.bf16.vlgmr.msra.gmra.mrb[0].mxu1 %vm1720_vm8, %v3873_v34  ;;  %v511_v57 = vadd.s32 80, %v3158_v6 }
  0xae   : > { %v1664_v51 = vsel %vm1656_vm7, %v1631_v54, %v2968_v29  ;;  %v1663_v25 = vsel %vm1656_vm7, %v1630_v61, %v2967_v31  ;;  %2770 = vmatpush3.bf16.msra.mxu1 %v1942_v52  ;;  %v2981_v46 = vpop.permute.xlu0 %2980  ;;  %v525_v29 = vadd.s32 192, %v3158_v6 }
  0xaf   : > { %v3893_v24 = vpack.c.bf16 %v1664_v51, %v1663_v25  ;;  %v2976_v9 = vpop.permute.xlu1 %2975  ;;  %v2983_v18 = vunpack.i.h.bf16 %v2981_v46  ;;  %v2982_v4 = vunpack.i.l.bf16 %v2981_v46  ;;  %v607_v37 = vand.u32 15, %v511_v57 }
  0xb0   : > { %v2978_v56 = vunpack.i.h.bf16 %v2976_v9  ;;  %v2977_v22 = vunpack.i.l.bf16 %v2976_v9  ;;  %v705_v51 = vand.u32 15, %v525_v29  ;;  %v527_v25 = vadd.s32 208, %v3158_v6 }
  0xb1   : > { %2742 = vmatmul.mubr.msk.bf16.gmra.mrb[4].mxu0 %vm1720_vm8, %v3893_v24  ;;  %v1677_v40 = vsel %vm1656_vm7, %v1644_v50, %v2982_v4  ;;  %v1678_v5 = vsel %vm1656_vm7, %v1645_v55, %v2983_v18  ;;  %vm3931_vm2 = vcmp.ge.s32.totalorder %v607_v37, 1 }
  0xb2   : > { %v3909_v8 = vpack.c.bf16 %v1678_v5, %v1677_v40  ;;  %v1647_v15 = vsel %vm1623_vm6, %v3691_v13, %v2978_v56  ;;  %v1646_v48 = vsel %vm1623_vm6, %v1164_v30, %v2977_v22  ;;  %v1150_v13 = vsel %vm3917_vm1, %v3707_v53, 0.0 }
  0xb3   : > { %v2991_v10 = vpop.permute.xlu0 %2990  ;;  %v1152_v60 = vsel %vm3931_vm2, %v3714_v39, 0.0  ;;  %v719_v43 = vand.u32 15, %v527_v25  ;;  %vm3951_vm3 = vcmp.ge.s32.totalorder %v705_v51, 1  ;;  %v513_v39 = vadd.s32 96, %v3158_v6 }
  0xb4   : > { %v2986_v17 = vpop.permute.xlu1 %2985  ;;  %2757 = vmatprep.mubr.msk.bf16.mxu1 %vm1720_vm8, %v3909_v8  ;;  %v2993_v42 = vunpack.i.h.bf16 %v2991_v10  ;;  %v2992_v52 = vunpack.i.l.bf16 %v2991_v10 }
  0xb5   : > { %v2988_v1 = vunpack.i.h.bf16 %v2986_v17  ;;  %v2987_v58 = vunpack.i.l.bf16 %v2986_v17  ;;  %vm3963_vm4 = vcmp.ge.s32.totalorder %v719_v43, 1  ;;  %v621_v19 = vand.u32 15, %v513_v39 }
  0xb6   : > { %v1633_v38 = vsel %vm1623_vm6, %v3710_v26, %v2993_v42  ;;  %v1632_v0 = vsel %vm1623_vm6, %v1150_v13, %v2992_v52  ;;  %v1168_v29 = vsel %vm3963_vm4, %v3725_v12, 0.0 }
  0xb7   : > { %v1679_v59 = vsel %vm1656_vm7, %v1646_v48, %v2987_v58  ;;  %v1680_v47 = vsel %vm1656_vm7, %v1647_v15, %v2988_v1  ;;  %v515_v15 = vadd.s32 112, %v3158_v6  ;;  %vm3983_vm5 = vcmp.ge.s32.totalorder %v621_v19, 1 }
  0xb8   : > { %v3923_v23 = vpack.c.bf16 %v1680_v47, %v1679_v59  ;;  %v2996_v31 = vpop.permute.xlu1 %2995  ;;  %v3001_v49 = vpop.permute.xlu0 %3000 }
  0xb9   : > { %v3003_v61 = vunpack.i.h.bf16 %v3001_v49  ;;  %v3002_v54 = vunpack.i.l.bf16 %v3001_v49  ;;  %v2998_v53 = vunpack.i.h.bf16 %v2996_v31  ;;  %v2997_v21 = vunpack.i.l.bf16 %v2996_v31 }
  0xba   : > { %2758 = vmatmul.mubr.msk.bf16.gmra.mrb[4].mxu1 %vm1720_vm8, %v3923_v23  ;;  %v635_v16 = vand.u32 15, %v515_v15 }
  0xbb   : > { %v1665_v9 = vsel %vm1656_vm7, %v1632_v0, %v3002_v54  ;;  %v1666_v46 = vsel %vm1656_vm7, %v1633_v38, %v3003_v61  ;;  %v1635_v56 = vsel %vm1623_vm6, %v3717_v3, %v2998_v53  ;;  %v1634_v22 = vsel %vm1623_vm6, %v1152_v60, %v2997_v21 }
  0xbc   : > { %v3944_v18 = vpack.c.bf16 %v1666_v46, %v1665_v9  ;;  %v1166_v3 = vsel %vm3951_vm3, %v3731_v33, 0.0  ;;  %v529_v21 = vadd.s32 224, %v3158_v6  ;;  %v531_v9 = vadd.s32 240, %v3158_v6 }
  0xbd   : > { %v3011_v55 = vpop.permute.xlu0 %3010  ;;  %vm3995_vm9 = vcmp.ge.s32.totalorder %v635_v16, 1 }
  0xbe   : > { %v3006_v4 = vpop.permute.xlu1 %3005  ;;  %2745 = vmatprep.mubr.msk.bf16.mxu0 %vm1720_vm8, %v3944_v18  ;;  %v3013_v17 = vunpack.i.h.bf16 %v3011_v55  ;;  %v3012_v10 = vunpack.i.l.bf16 %v3011_v55  ;;  %v1156_v6 = vsel %vm3995_vm9, %v3741_v36, 0.0 }
  0xbf   : > { %v3008_v26 = vunpack.i.h.bf16 %v3006_v4  ;;  %v3007_v50 = vunpack.i.l.bf16 %v3006_v4 }
  0xc0   : > { %v1649_v52 = vsel %vm1623_vm6, %v3734_v44, %v3013_v17  ;;  %v1648_v33 = vsel %vm1623_vm6, %v1166_v3, %v3012_v10  ;;  %v733_v17 = vand.u32 15, %v529_v21 }
  0xc1   : > { %v1667_v5 = vsel %vm1656_vm7, %v1634_v22, %v3007_v50  ;;  %v1668_v30 = vsel %vm1656_vm7, %v1635_v56, %v3008_v26  ;;  %v1154_v26 = vsel %vm3983_vm5, %v3744_v62, 0.0  ;;  %v747_v62 = vand.u32 15, %v531_v9 }
  0xc2   : > { %v3958_v57 = vpack.c.bf16 %v1668_v30, %v1667_v5  ;;  %v3016_v1 = vpop.permute.xlu1 %3015  ;;  %vm4021_vm10 = vcmp.ge.s32.totalorder %v733_v17, 1 }
  0xc3   : > { %v3021_v48 = vpop.permute.xlu0 %3020  ;;  %v3018_v59 = vunpack.i.h.bf16 %v3016_v1  ;;  %v3017_v47 = vunpack.i.l.bf16 %v3016_v1  ;;  %vm4027_vm11 = vcmp.ge.s32.totalorder %v747_v62, 1 }
  0xc4   : > { %2746 = vmatmul.mubr.msk.bf16.gmra.mrb[8].mxu0 %vm1720_vm8, %v3958_v57  ;;  %v3023_v37 = vunpack.i.h.bf16 %v3021_v48  ;;  %v3022_v42 = vunpack.i.l.bf16 %v3021_v48 }
  0xc5   : > { %v1651_v44 = vsel %vm1623_vm6, %v3728_v41, %v3018_v59  ;;  %v1650_v51 = vsel %vm1623_vm6, %v1168_v29, %v3017_v47  ;;  %v1170_v29 = vsel %vm4021_vm10, %v3762_v45, 0.0 }
  0xc6   : > { %v1681_v13 = vsel %vm1656_vm7, %v1648_v33, %v3022_v42  ;;  %v1682_v31 = vsel %vm1656_vm7, %v1649_v52, %v3023_v37 }
  0xc7   : > { %v3026_v49 = vpop.permute.xlu1 %3025  ;;  %v3978_v61 = vpack.c.bf16 %v1682_v31, %v1681_v13 }
  0xc8   : > { %v3028_v54 = vunpack.i.h.bf16 %v3026_v49  ;;  %v3027_v38 = vunpack.i.l.bf16 %v3026_v49  ;;  %v3031_v0 = vpop.permute.xlu0 %3030  ;;  %v1172_v49 = vsel %vm4027_vm11, %v3756_v2, 0.0 }
  0xc9   : > { %2761 = vmatprep.mubr.msk.bf16.mxu1 %vm1720_vm8, %v3978_v61  ;;  %v3033_v41 = vunpack.i.h.bf16 %v3031_v0  ;;  %v3032_v60 = vunpack.i.l.bf16 %v3031_v0 }
  0xca   : > { %v1683_v12 = vsel %vm1656_vm7, %v1650_v51, %v3027_v38  ;;  %v1684_v53 = vsel %vm1656_vm7, %v1651_v44, %v3028_v54 }
  0xcb   : > { %v3993_v46 = vpack.c.bf16 %v1684_v53, %v1683_v12  ;;  %v3036_v55 = vpop.permute.xlu1 %3035  ;;  %v1637_v39 = vsel %vm1623_vm6, %v3747_v20, %v3033_v41  ;;  %v1636_v5 = vsel %vm1623_vm6, %v1154_v26, %v3032_v60 }
  0xcc   : > { %v3038_v50 = vunpack.i.h.bf16 %v3036_v55  ;;  %v3037_v43 = vunpack.i.l.bf16 %v3036_v55 }
  0xcd   : > { %2762 = vmatmul.mubr.msk.bf16.gmra.mrb[8].mxu1 %vm1720_vm8, %v3993_v46  ;;  %v3041_v56 = vpop.permute.xlu0 %3040 }
  0xce   : > { %v3043_v22 = vunpack.i.h.bf16 %v3041_v56  ;;  %v3042_v40 = vunpack.i.l.bf16 %v3041_v56  ;;  %v1639_v15 = vsel %vm1623_vm6, %v3752_v27, %v3038_v50  ;;  %v1638_v36 = vsel %vm1623_vm6, %v1156_v6, %v3037_v43 }
  0xcf   : > { %v3046_v30 = vpop.permute.xlu1 %3045 }
  0xd0   : > { %v1669_v10 = vsel %vm1656_vm7, %v1636_v5, %v3042_v40  ;;  %v1670_v1 = vsel %vm1656_vm7, %v1637_v39, %v3043_v22  ;;  %v3048_v3 = vunpack.i.h.bf16 %v3046_v30  ;;  %v3047_v58 = vunpack.i.l.bf16 %v3046_v30 }
  0xd1   : > { %v4015_v48 = vpack.c.bf16 %v1670_v1, %v1669_v10 }
  0xd2   : > { %v1671_v20 = vsel %vm1656_vm7, %v1638_v36, %v3047_v58  ;;  %v1672_v19 = vsel %vm1656_vm7, %v1639_v15, %v3048_v3  ;;  %v3051_v59 = vpop.permute.xlu0 %3050 }
  0xd3   : > { %v4019_v47 = vpack.c.bf16 %v1672_v19, %v1671_v20  ;;  %v3056_v42 = vpop.permute.xlu1 %3055  ;;  %2749 = vmatprep.mubr.msk.bf16.mxu0 %vm1720_vm8, %v4015_v48  ;;  %v3053_v52 = vunpack.i.h.bf16 %v3051_v59  ;;  %v3052_v33 = vunpack.i.l.bf16 %v3051_v59 }
  0xd4   : > { %v3058_v13 = vunpack.i.h.bf16 %v3056_v42  ;;  %v3057_v31 = vunpack.i.l.bf16 %v3056_v42 }
  0xd5   : > { %2750 = vmatmul.mubr.msk.bf16.gmra.mrb[12].mxu0 %vm1720_vm8, %v4019_v47  ;;  %v1653_v44 = vsel %vm1623_vm6, %v3765_v28, %v3053_v52  ;;  %v1652_v51 = vsel %vm1623_vm6, %v1170_v29, %v3052_v33 }
  0xd6   : > { %2833 = vmatprep.mubr.msk.bf16.mxu0 %vm3083_vm13, %v3082_v32  ;;  %v1655_v12 = vsel %vm1623_vm6, %v3759_v14, %v3058_v13  ;;  %v1654_v53 = vsel %vm1623_vm6, %v1172_v49, %v3057_v31 }
  0xd7   : > { %v3061_v16 = vpop.permute.xlu0 %3060 }
  0xd8   : > { %v3063_v54 = vunpack.i.h.bf16 %v3061_v16  ;;  %v3062_v38 = vunpack.i.l.bf16 %v3061_v16  ;;  %v3066_v0 = vpop.permute.xlu1 %3065 }
  0xd9   : > { %v3068_v45 = vunpack.i.h.bf16 %v3066_v0  ;;  %v3067_v25 = vunpack.i.l.bf16 %v3066_v0 }
  0xda   : > { %v1685_v21 = vsel %vm1656_vm7, %v1652_v51, %v3062_v38  ;;  %v1686_v2 = vsel %vm1656_vm7, %v1653_v44, %v3063_v54 }
  0xdb   : > { %v4049_v9 = vpack.c.bf16 %v1686_v2, %v1685_v21  ;;  %v1687_v41 = vsel %vm1656_vm7, %v1654_v53, %v3067_v25  ;;  %v1688_v60 = vsel %vm1656_vm7, %v1655_v12, %v3068_v45  ;;  %vm2528_vm7 = vcmask 25600  }
  0xdc   : > { %v1704_v28 = vpack.c.bf16 %v1688_v60, %v1687_v41 }
  0xdd   : > { %2765 = vmatprep.mubr.msk.bf16.mxu1 %vm1720_vm8, %v4049_v9  ;;  %2834 = vmatmul.mubr.msk.bf16.vlgmr.msra.gmra.mrb[16].mxu0 %vm1720_vm8, %v3831_v7 }
  0xde   : > { %2766 = vmatmul.mubr.msk.bf16.gmra.mrb[12].mxu1 %vm1720_vm8, %v1704_v28  ;;  %2837 = vmatprep.mubr.msk.bf16.mxu0 %vm3083_vm13, %v3082_v32 }
  0xdf   : > { %2771 = vmatprep.mubr.msk.bf16.mxu1 %vm3083_vm13, %v3082_v32 }
  0xe5   : > { %2838 = vmatmul.mubr.msk.bf16.gmra.mrb[20].mxu0 %vm1720_vm8, %v3866_v63 }
  0xe6   : > { %2772 = vmatmul.mubr.msk.bf16.vlgmr.msra.gmra.mrb[16].mxu1 %vm1720_vm8, %v3795_v35  ;;  %2841 = vmatprep.mubr.msk.bf16.mxu0 %vm3083_vm13, %v3082_v32 }
  0xe7   : > { %2775 = vmatprep.mubr.msk.bf16.mxu1 %vm3083_vm13, %v3082_v32 }
  0xed   : > { %2842 = vmatmul.mubr.msk.bf16.gmra.mrb[24].mxu0 %vm1720_vm8, %v3893_v24 }
  0xee   : > { %2776 = vmatmul.mubr.msk.bf16.gmra.mrb[20].mxu1 %vm1720_vm8, %v3831_v7  ;;  %2845 = vmatprep.mubr.msk.bf16.mxu0 %vm3083_vm13, %v3082_v32 }
  0xef   : > { %2779 = vmatprep.mubr.msk.bf16.mxu1 %vm3083_vm13, %v3082_v32 }
  0xf5   : > { %2846 = vmatmul.mubr.msk.bf16.gmra.mrb[28].mxu0 %vm1720_vm8, %v3944_v18 }
  0xf6   : > { %2780 = vmatmul.mubr.msk.bf16.gmra.mrb[24].mxu1 %vm1720_vm8, %v3866_v63  ;;  %2849 = vmatprep.mubr.msk.bf16.mxu0 %vm3083_vm13, %v3082_v32  ;;  %v4180_v63 = vld [vmem:[%s4445_s2] ss:$0 sm:$0xff] }
  0xf7   : > { %2783 = vmatprep.mubr.msk.bf16.mxu1 %vm3083_vm13, %v3082_v32 }
  0xfd   : > { %2850 = vmatmul.mubr.msk.bf16.gmra.mrb[32].mxu0 %vm1720_vm8, %v3958_v57 }
  0xfe   : > { %2784 = vmatmul.mubr.msk.bf16.gmra.mrb[28].mxu1 %vm1720_vm8, %v3893_v24  ;;  %2853 = vmatprep.mubr.msk.bf16.mxu0 %vm3083_vm13, %v3082_v32 }
  0xff   : > { %2787 = vmatprep.mubr.msk.bf16.mxu1 %vm3083_vm13, %v3082_v32 }
 0x105   : > { %2854 = vmatmul.mubr.msk.bf16.gmra.mrb[36].mxu0 %vm1720_vm8, %v4015_v48 }
 0x106   : > { %2788 = vmatmul.mubr.msk.bf16.gmra.mrb[32].mxu1 %vm1720_vm8, %v3944_v18  ;;  %2857 = vmatprep.mubr.msk.bf16.mxu0 %vm3083_vm13, %v3082_v32 }
 0x107   : > { %2791 = vmatprep.mubr.msk.bf16.mxu1 %vm3083_vm13, %v3082_v32 }
 0x10d   : > { %2858 = vmatmul.mubr.msk.bf16.gmra.mrb[40].mxu0 %vm1720_vm8, %v4019_v47 }
 0x10e   : > { %2792 = vmatmul.mubr.msk.bf16.gmra.mrb[36].mxu1 %vm1720_vm8, %v3958_v57  ;;  %2861 = vmatprep.mubr.msk.bf16.mxu0 %vm3083_vm13, %v3082_v32 }
 0x10f   : > { %2795 = vmatprep.mubr.msk.bf16.mxu1 %vm3083_vm13, %v3082_v32 }
 0x115   : > { %2862 = vmatmul.mubr.msk.bf16.gmra.mrb[44].mxu0 %vm1720_vm8, %v3844_v11 }
 0x116   : > { %2796 = vmatmul.mubr.msk.bf16.gmra.mrb[40].mxu1 %vm1720_vm8, %v4015_v48  ;;  %2865 = vmatprep.mubr.msk.bf16.mxu0 %vm3083_vm13, %v3082_v32 }
 0x117   : > { %2799 = vmatprep.mubr.msk.bf16.mxu1 %vm3083_vm13, %v3082_v32 }
 0x11d   : > { %2866 = vmatmul.mubr.msk.bf16.gmra.mrb[48].mxu0 %vm1720_vm8, %v3873_v34 }
 0x11e   : > { %2800 = vmatmul.mubr.msk.bf16.gmra.mrb[44].mxu1 %vm1720_vm8, %v4019_v47  ;;  %2869 = vmatprep.mubr.msk.bf16.mxu0 %vm3083_vm13, %v3082_v32 }
 0x11f   : > { %2803 = vmatprep.mubr.msk.bf16.mxu1 %vm3083_vm13, %v3082_v32 }
 0x125   : > { %2870 = vmatmul.mubr.msk.bf16.gmra.mrb[52].mxu0 %vm1720_vm8, %v3909_v8 }
 0x126   : > { %2804 = vmatmul.mubr.msk.bf16.gmra.mrb[48].mxu1 %vm1720_vm8, %v3844_v11  ;;  %2873 = vmatprep.mubr.msk.bf16.mxu0 %vm3083_vm13, %v3082_v32 }
 0x127   : > { %2807 = vmatprep.mubr.msk.bf16.mxu1 %vm3083_vm13, %v3082_v32 }
 0x12d   : > { %2874 = vmatmul.mubr.msk.bf16.gmra.mrb[56].mxu0 %vm1720_vm8, %v3923_v23 }
 0x12e   : > { %2808 = vmatmul.mubr.msk.bf16.gmra.mrb[52].mxu1 %vm1720_vm8, %v3873_v34  ;;  %2877 = vmatprep.mubr.msk.bf16.mxu0 %vm3083_vm13, %v3082_v32 }
 0x12f   : > { %2811 = vmatprep.mubr.msk.bf16.mxu1 %vm3083_vm13, %v3082_v32 }
 0x135   : > { %2878 = vmatmul.mubr.msk.bf16.gmra.mrb[60].mxu0 %vm1720_vm8, %v3978_v61 }
 0x136   : > { %2812 = vmatmul.mubr.msk.bf16.gmra.mrb[56].mxu1 %vm1720_vm8, %v3909_v8  ;;  %2881 = vmatprep.mubr.msk.bf16.mxu0 %vm3083_vm13, %v3082_v32 }
 0x137   : > { %2815 = vmatprep.mubr.msk.bf16.mxu1 %vm3083_vm13, %v3082_v32 }
 0x13d   : > { %2882 = vmatmul.mubr.msk.bf16.gmra.mrb[64].mxu0 %vm1720_vm8, %v3993_v46 }
 0x13e   : > { %2816 = vmatmul.mubr.msk.bf16.gmra.mrb[60].mxu1 %vm1720_vm8, %v3923_v23  ;;  %2885 = vmatprep.mubr.msk.bf16.mxu0 %vm3083_vm13, %v3082_v32 }
 0x13f   : > { %2819 = vmatprep.mubr.msk.bf16.mxu1 %vm3083_vm13, %v3082_v32 }
 0x145   : > { %2886 = vmatmul.mubr.msk.bf16.gmra.mrb[68].mxu0 %vm1720_vm8, %v4049_v9 }
 0x146   : > { %2820 = vmatmul.mubr.msk.bf16.gmra.mrb[64].mxu1 %vm1720_vm8, %v3978_v61  ;;  %2889 = vmatprep.mubr.msk.bf16.mxu0 %vm3083_vm13, %v3082_v32 }
 0x147   : > { %2823 = vmatprep.mubr.msk.bf16.mxu1 %vm3083_vm13, %v3082_v32 }
 0x14d   : > { %2890 = vmatmul.mubr.msk.bf16.gmra.mrb[72].mxu0 %vm1720_vm8, %v1704_v28 }
 0x14e   : > { %2824 = vmatmul.mubr.msk.bf16.gmra.mrb[68].mxu1 %vm1720_vm8, %v3993_v46 }
 0x14f   : > { %2827 = vmatprep.mubr.msk.bf16.mxu1 %vm3083_vm13, %v3082_v32 }
 0x156   : > { %2828 = vmatmul.mubr.msk.bf16.gmra.mrb[72].mxu1 %vm1720_vm8, %v4049_v9 }
 0x179   : > { %v4173_v14 = vpop.f32.mrb[0].mxu0 }
 0x17a   : > { %v1807_v35 = vpop.f32.mrb[1].mxu0 }
 0x17b   : > { %v4175_v7 = vpop.f32.mrb[2].mxu0  ;;  %v1808_v27 = vadd.f32 %v4180_v63, %v1807_v35  ;;  %v1816_v35 = vadd.f32 %v4173_v14, %v4180_v63 }
 0x17c   : > { %v1810_v11 = vpop.f32.mrb[3].mxu0 }
 0x17d   : > { %v1811_v33 = vadd.f32 %v4180_v63, %v1810_v11 }
 0x180   : > { %v2755_v34 = vpop.f32.mrb[0].mxu1 }
 0x181   : > { %v4183_v24 = vadd.f32 %v2755_v34, %v4180_v63  ;;  %v1871_v8 = vpop.f32.mrb[1].mxu1 }
 0x182   : > { %v4186_v32 = vadd.f32 %v4180_v63, %v1871_v8  ;;  %v2756_v23 = vpop.f32.mrb[2].mxu1 }
 0x183   : > { %v4189_v18 = vadd.f32 %v2756_v23, %v4180_v63  ;;  %v1874_v57 = vpop.f32.mrb[3].mxu1 }
 0x184   : > { %v4192_v61 = vadd.f32 %v4180_v63, %v1874_v57  ;;  %v4194_v46 = vpop.f32.mrb[4].mxu0  ;;  %v1819_v57 = vadd.f32 %v4175_v7, %v4180_v63 }
 0x185   : > { %v4196_v4 = vpop.f32.mrb[5].mxu0 }
 0x186   : > { %v4198_v55 = vpop.f32.mrb[6].mxu0 }
 0x187   : > { %v4200_v26 = vpop.f32.mrb[7].mxu0 }
 0x18d   : > { %v2759_v50 = vpop.f32.mrb[4].mxu1 }
 0x18e   : > { %v4203_v43 = vadd.f32 %v2759_v50, %v4180_v63  ;;  %v1887_v56 = vpop.f32.mrb[5].mxu1 }
 0x18f   : > { %v4206_v6 = vadd.f32 %v4180_v63, %v1887_v56  ;;  %v2760_v22 = vpop.f32.mrb[6].mxu1 }
 0x190   : > { %v4209_v40 = vadd.f32 %v2760_v22, %v4180_v63  ;;  %v1890_v39 = vpop.f32.mrb[7].mxu1 }
 0x191   : > { %v4212_v5 = vadd.f32 %v4180_v63, %v1890_v39 }
 0x197   : > { %v4214_v30 = vpop.f32.mrb[8].mxu0 }
 0x198   : > { %v4216_v17 = vpop.f32.mrb[9].mxu0 }
 0x199   : > { %v4218_v62 = vpop.f32.mrb[10].mxu0 }
 0x19a   : > { %v4220_v10 = vpop.f32.mrb[11].mxu0 }
 0x1a0   : > { %v2763_v1 = vpop.f32.mrb[8].mxu1 }
 0x1a1   : > { %v4223_v3 = vadd.f32 %v2763_v1, %v4180_v63  ;;  %v1903_v58 = vpop.f32.mrb[9].mxu1 }
 0x1a2   : > { %v4226_v15 = vadd.f32 %v4180_v63, %v1903_v58  ;;  %v2764_v36 = vpop.f32.mrb[10].mxu1 }
 0x1a3   : > { %v4229_v48 = vadd.f32 %v2764_v36, %v4180_v63  ;;  %v1906_v20 = vpop.f32.mrb[11].mxu1 }
 0x1a4   : > { %v4232_v19 = vadd.f32 %v4180_v63, %v1906_v20 }
 0x1a8   : > { %v4234_v59 = vpop.f32.mrb[12].mxu0 }
 0x1a9   : > { %v4236_v47 = vpop.f32.mrb[13].mxu0 }
 0x1aa   : > { %v4238_v37 = vpop.f32.mrb[14].mxu0 }
 0x1ab   : > { %v4240_v42 = vpop.f32.mrb[15].mxu0 }
 0x1b0   : > { %v2174_v52 = vpop.f32.mrb[16].mxu0 }
 0x1b1   : > { %v2767_v29 = vpop.f32.mrb[12].mxu1  ;;  %v2293_v13 = vadd.f32 %v2174_v52, %v1808_v27  ;;  %v2835_v31 = vpop.f32.mrb[17].mxu0 }
 0x1b2   : > { %v4252_v49 = vadd.f32 %v2767_v29, %v4180_v63  ;;  %v1919_v16 = vpop.f32.mrb[13].mxu1  ;;  %v2177_v54 = vpop.f32.mrb[18].mxu0  ;;  %v1824_v29 = vadd.f32 %v4180_v63, %v4196_v4 }
 0x1b3   : > { %2325 = vst.msk [vmem:[%s4248_s25] sm:$0xff] %vm1623_vm6, %v2293_v13  ;;  %v2426_v38 = vmul.f32 %v2293_v13, %v2293_v13  ;;  %v4257_v0 = vadd.f32 %v4180_v63, %v1919_v16  ;;  %v2768_v44 = vpop.f32.mrb[14].mxu1  ;;  %v2294_v51 = vadd.f32 %v2177_v54, %v1811_v33  ;;  %v2836_v45 = vpop.f32.mrb[19].mxu0  ;;  %v2357_v53 = vsel %vm1623_vm6, %v2293_v13, 0.0 }
 0x1b4   : > { %v4260_v25 = vadd.f32 %v2768_v44, %v4180_v63  ;;  %v1922_v12 = vpop.f32.mrb[15].mxu1  ;;  %v1827_v45 = vadd.f32 %v4180_v63, %v4200_v26  ;;  %v1832_v26 = vadd.f32 %v4194_v46, %v4180_v63 }
 0x1b5   : > { %2326 = vst.msk [vmem:[%s4248_s25 + $0x8] sm:$0xff] %vm1623_vm6, %v2294_v51  ;;  %v2358_v21 = vsel %vm1623_vm6, %v2294_v51, 0.0  ;;  %v2427_v2 = vmul.f32 %v2294_v51, %v2294_v51  ;;  %v4267_v9 = vadd.f32 %v4180_v63, %v1922_v12  ;;  %v2458_v60 = vsel %vm1623_vm6, %v2426_v38, 0.0 }
 0x1b6   : > { %v2359_v41 = vadd.f32 %v2358_v21, %v2357_v53 }
 0x1b7   : > { %v2459_v28 = vsel %vm1623_vm6, %v2427_v2, 0.0 }
 0x1b8   : > { %v2460_v11 = vadd.f32 %v2459_v28, %v2458_v60  ;;  %v2182_v34 = vpop.f32.mrb[20].mxu0 }
 0x1b9   : > { %v1978_v8 = vpop.f32.mrb[16].mxu1  ;;  %v2839_v23 = vpop.f32.mrb[21].mxu0 }
 0x1ba   : > { %v2099_v50 = vadd.f32 %v1978_v8, %v1816_v35  ;;  %v2773_v56 = vpop.f32.mrb[17].mxu1  ;;  %v2185_v22 = vpop.f32.mrb[22].mxu0 }
 0x1bb   : > { %v1981_v39 = vpop.f32.mrb[18].mxu1  ;;  %v2840_v1 = vpop.f32.mrb[23].mxu0 }
 0x1bc   : > { %v2295_v58 = vadd.f32 %v2182_v34, %v2099_v50  ;;  %v2100_v36 = vadd.f32 %v1981_v39, %v1819_v57  ;;  %v2774_v20 = vpop.f32.mrb[19].mxu1 }
 0x1be   : > { %2327 = vst.msk [vmem:[%s4248_s25 + $0x10] sm:$0xff] %vm1623_vm6, %v2295_v58  ;;  %v2360_v14 = vsel %vm1623_vm6, %v2295_v58, 0.0  ;;  %v2428_v27 = vmul.f32 %v2295_v58, %v2295_v58  ;;  %v2296_v52 = vadd.f32 %v2185_v22, %v2100_v36 }
 0x1bf   : > { %v2361_v33 = vadd.f32 %v2360_v14, %v2359_v41  ;;  %v1835_v14 = vadd.f32 %v4198_v55, %v4180_v63  ;;  %v1840_v55 = vadd.f32 %v4180_v63, %v4216_v17 }
 0x1c0   : > { %v2461_v7 = vsel %vm1623_vm6, %v2428_v27, 0.0  ;;  %2328 = vst.msk [vmem:[%s4248_s25 + $0x18] sm:$0xff] %vm1623_vm6, %v2296_v52  ;;  %v2362_v13 = vsel %vm1623_vm6, %v2296_v52, 0.0  ;;  %v2429_v31 = vmul.f32 %v2296_v52, %v2296_v52  ;;  %v2190_v16 = vpop.f32.mrb[24].mxu0 }
 0x1c1   : > { %v2462_v54 = vadd.f32 %v2461_v7, %v2460_v11  ;;  %v2363_v38 = vadd.f32 %v2362_v13, %v2361_v33  ;;  %v1986_v44 = vpop.f32.mrb[20].mxu1  ;;  %v2843_v51 = vpop.f32.mrb[25].mxu0 }
 0x1c2   : > { %v2463_v12 = vsel %vm1623_vm6, %v2429_v31, 0.0  ;;  %v2101_v53 = vadd.f32 %v1986_v44, %v1824_v29  ;;  %v2777_v4 = vpop.f32.mrb[21].mxu1  ;;  %v2193_v21 = vpop.f32.mrb[26].mxu0 }
 0x1c3   : > { %v2464_v2 = vadd.f32 %v2463_v12, %v2462_v54  ;;  %v1989_v41 = vpop.f32.mrb[22].mxu1  ;;  %v2844_v60 = vpop.f32.mrb[27].mxu0 }
 0x1c4   : > { %v2297_v28 = vadd.f32 %v2190_v16, %v2101_v53  ;;  %v2102_v35 = vadd.f32 %v1989_v41, %v1827_v45  ;;  %v2778_v34 = vpop.f32.mrb[23].mxu1 }
 0x1c6   : > { %2329 = vst.msk [vmem:[%s4248_s25 + $0x20] sm:$0xff] %vm1623_vm6, %v2297_v28  ;;  %v2364_v11 = vsel %vm1623_vm6, %v2297_v28, 0.0  ;;  %v2430_v8 = vmul.f32 %v2297_v28, %v2297_v28  ;;  %v2298_v23 = vadd.f32 %v2193_v21, %v2102_v35  ;;  %v1843_v35 = vadd.f32 %v4180_v63, %v4220_v10 }
 0x1c7   : > { %v2365_v57 = vadd.f32 %v2364_v11, %v2363_v38  ;;  %v1848_v10 = vadd.f32 %v4214_v30, %v4180_v63 }
 0x1c8   : > { %v2465_v50 = vsel %vm1623_vm6, %v2430_v8, 0.0  ;;  %2330 = vst.msk [vmem:[%s4248_s25 + $0x28] sm:$0xff] %vm1623_vm6, %v2298_v23  ;;  %v2366_v56 = vsel %vm1623_vm6, %v2298_v23, 0.0  ;;  %v2431_v22 = vmul.f32 %v2298_v23, %v2298_v23  ;;  %v2198_v39 = vpop.f32.mrb[28].mxu0 }
 0x1c9   : > { %v2466_v1 = vadd.f32 %v2465_v50, %v2464_v2  ;;  %v2367_v58 = vadd.f32 %v2366_v56, %v2365_v57  ;;  %v1994_v36 = vpop.f32.mrb[24].mxu1  ;;  %v2847_v20 = vpop.f32.mrb[29].mxu0 }
 0x1ca   : > { %v2467_v27 = vsel %vm1623_vm6, %v2431_v22, 0.0  ;;  %v2103_v52 = vadd.f32 %v1994_v36, %v1832_v26  ;;  %v2781_v46 = vpop.f32.mrb[25].mxu1  ;;  %v2201_v33 = vpop.f32.mrb[30].mxu0 }
 0x1cb   : > { %v2468_v29 = vadd.f32 %v2467_v27, %v2466_v1  ;;  %v1997_v7 = vpop.f32.mrb[26].mxu1  ;;  %v2848_v13 = vpop.f32.mrb[31].mxu0 }
 0x1cc   : > { %v2299_v31 = vadd.f32 %v2198_v39, %v2103_v52  ;;  %v2104_v16 = vadd.f32 %v1997_v7, %v1835_v14  ;;  %v2782_v54 = vpop.f32.mrb[27].mxu1  ;;  %v1851_v13 = vadd.f32 %v4218_v62, %v4180_v63  ;;  %v1856_v62 = vadd.f32 %v4180_v63, %v4236_v47 }
 0x1ce   : > { %2331 = vst.msk [vmem:[%s4248_s25 + $0x30] sm:$0xff] %vm1623_vm6, %v2299_v31  ;;  %v2368_v38 = vsel %vm1623_vm6, %v2299_v31, 0.0  ;;  %v2432_v44 = vmul.f32 %v2299_v31, %v2299_v31  ;;  %v2300_v51 = vadd.f32 %v2201_v33, %v2104_v16 }
 0x1cf   : > { %v2369_v45 = vadd.f32 %v2368_v38, %v2367_v58 }
 0x1d0   : > { %v2469_v12 = vsel %vm1623_vm6, %v2432_v44, 0.0  ;;  %2332 = vst.msk [vmem:[%s4248_s25 + $0x38] sm:$0xff] %vm1623_vm6, %v2300_v51  ;;  %v2370_v53 = vsel %vm1623_vm6, %v2300_v51, 0.0  ;;  %v2433_v4 = vmul.f32 %v2300_v51, %v2300_v51  ;;  %v2206_v21 = vpop.f32.mrb[32].mxu0 }
 0x1d1   : > { %v2470_v2 = vadd.f32 %v2469_v12, %v2468_v29  ;;  %v2371_v41 = vadd.f32 %v2370_v53, %v2369_v45  ;;  %v2002_v60 = vpop.f32.mrb[28].mxu1  ;;  %v2851_v28 = vpop.f32.mrb[33].mxu0 }
 0x1d2   : > { %v2471_v34 = vsel %vm1623_vm6, %v2433_v4, 0.0  ;;  %v2105_v11 = vadd.f32 %v2002_v60, %v1840_v55  ;;  %v2785_v17 = vpop.f32.mrb[29].mxu1  ;;  %v2209_v8 = vpop.f32.mrb[34].mxu0 }
 0x1d3   : > { %v2472_v23 = vadd.f32 %v2471_v34, %v2470_v2  ;;  %v2005_v57 = vpop.f32.mrb[30].mxu1  ;;  %v2852_v26 = vpop.f32.mrb[35].mxu0 }
 0x1d4   : > { %v2301_v50 = vadd.f32 %v2206_v21, %v2105_v11  ;;  %v2106_v56 = vadd.f32 %v2005_v57, %v1843_v35  ;;  %v2786_v22 = vpop.f32.mrb[31].mxu1 }
 0x1d6   : > { %2333 = vst.msk [vmem:[%s4248_s25 + $0x40] sm:$0xff] %vm1623_vm6, %v2301_v50  ;;  %v2372_v39 = vsel %vm1623_vm6, %v2301_v50, 0.0  ;;  %v2434_v1 = vmul.f32 %v2301_v50, %v2301_v50  ;;  %v2302_v58 = vadd.f32 %v2209_v8, %v2106_v56 }
 0x1d7   : > { %v2373_v36 = vadd.f32 %v2372_v39, %v2371_v41 }
 0x1d8   : > { %v2473_v20 = vsel %vm1623_vm6, %v2434_v1, 0.0  ;;  %2334 = vst.msk [vmem:[%s4248_s25 + $0x48] sm:$0xff] %vm1623_vm6, %v2302_v58  ;;  %v2374_v14 = vsel %vm1623_vm6, %v2302_v58, 0.0  ;;  %v2435_v27 = vmul.f32 %v2302_v58, %v2302_v58  ;;  %v2214_v52 = vpop.f32.mrb[36].mxu0 }
 0x1d9   : > { %v2474_v46 = vadd.f32 %v2473_v20, %v2472_v23  ;;  %v2375_v33 = vadd.f32 %v2374_v14, %v2373_v36  ;;  %v2010_v29 = vpop.f32.mrb[32].mxu1  ;;  %v2855_v7 = vpop.f32.mrb[37].mxu0  ;;  %v1859_v23 = vadd.f32 %v4180_v63, %v4240_v42  ;;  %v1864_v42 = vadd.f32 %v4234_v59, %v4180_v63 }
 0x1da   : > { %v2475_v31 = vsel %vm1623_vm6, %v2435_v27, 0.0  ;;  %v2107_v16 = vadd.f32 %v2010_v29, %v1848_v10  ;;  %v2789_v30 = vpop.f32.mrb[33].mxu1  ;;  %v2217_v54 = vpop.f32.mrb[38].mxu0 }
 0x1db   : > { %v2476_v38 = vadd.f32 %v2475_v31, %v2474_v46  ;;  %v2013_v44 = vpop.f32.mrb[34].mxu1  ;;  %v2856_v51 = vpop.f32.mrb[39].mxu0  ;;  %v1867_v30 = vadd.f32 %v4238_v37, %v4180_v63 }
 0x1dc   : > { %v2303_v45 = vadd.f32 %v2214_v52, %v2107_v16  ;;  %v2108_v55 = vadd.f32 %v2013_v44, %v1851_v13  ;;  %v2790_v12 = vpop.f32.mrb[35].mxu1 }
 0x1de   : > { %2335 = vst.msk [vmem:[%s4248_s25 + $0x50] sm:$0xff] %vm1623_vm6, %v2303_v45  ;;  %v2376_v53 = vsel %vm1623_vm6, %v2303_v45, 0.0  ;;  %v2436_v4 = vmul.f32 %v2303_v45, %v2303_v45  ;;  %v2304_v21 = vadd.f32 %v2217_v54, %v2108_v55 }
 0x1df   : > { %v2377_v2 = vadd.f32 %v2376_v53, %v2375_v33 }
 0x1e0   : > { %v2477_v41 = vsel %vm1623_vm6, %v2436_v4, 0.0  ;;  %2336 = vst.msk [vmem:[%s4248_s25 + $0x58] sm:$0xff] %vm1623_vm6, %v2304_v21  ;;  %v2378_v60 = vsel %vm1623_vm6, %v2304_v21, 0.0  ;;  %v2437_v28 = vmul.f32 %v2304_v21, %v2304_v21  ;;  %v2222_v35 = vpop.f32.mrb[40].mxu0 }
 0x1e1   : > { %v2478_v34 = vadd.f32 %v2477_v41, %v2476_v38  ;;  %v2379_v11 = vadd.f32 %v2378_v60, %v2377_v2  ;;  %v2018_v17 = vpop.f32.mrb[36].mxu1  ;;  %v2859_v8 = vpop.f32.mrb[41].mxu0 }
 0x1e2   : > { %v2479_v57 = vsel %vm1623_vm6, %v2437_v28, 0.0  ;;  %v2109_v26 = vadd.f32 %v2018_v17, %v1856_v62  ;;  %v2793_v47 = vpop.f32.mrb[37].mxu1  ;;  %v2225_v50 = vpop.f32.mrb[42].mxu0 }
 0x1e3   : > { %v2480_v56 = vadd.f32 %v2479_v57, %v2478_v34  ;;  %v2021_v22 = vpop.f32.mrb[38].mxu1  ;;  %v2860_v39 = vpop.f32.mrb[43].mxu0 }
 0x1e4   : > { %v2305_v1 = vadd.f32 %v2222_v35, %v2109_v26  ;;  %v2110_v58 = vadd.f32 %v2021_v22, %v1859_v23  ;;  %v2794_v36 = vpop.f32.mrb[39].mxu1 }
 0x1e6   : > { %2337 = vst.msk [vmem:[%s4248_s25 + $0x60] sm:$0xff] %vm1623_vm6, %v2305_v1  ;;  %v2380_v10 = vsel %vm1623_vm6, %v2305_v1, 0.0  ;;  %v2438_v20 = vmul.f32 %v2305_v1, %v2305_v1  ;;  %v2306_v14 = vadd.f32 %v2225_v50, %v2110_v58 }
 0x1e7   : > { %v2381_v27 = vadd.f32 %v2380_v10, %v2379_v11 }
 0x1e8   : > { %v2481_v52 = vsel %vm1623_vm6, %v2438_v20, 0.0  ;;  %2338 = vst.msk [vmem:[%s4248_s25 + $0x68] sm:$0xff] %vm1623_vm6, %v2306_v14  ;;  %v2382_v46 = vsel %vm1623_vm6, %v2306_v14, 0.0  ;;  %v2439_v33 = vmul.f32 %v2306_v14, %v2306_v14  ;;  %v2230_v29 = vpop.f32.mrb[44].mxu0 }
 0x1e9   : > { %v2482_v7 = vadd.f32 %v2481_v52, %v2480_v56  ;;  %v2383_v13 = vadd.f32 %v2382_v46, %v2381_v27  ;;  %v2026_v31 = vpop.f32.mrb[40].mxu1  ;;  %v2863_v16 = vpop.f32.mrb[45].mxu0 }
 0x1ea   : > { %v2483_v54 = vsel %vm1623_vm6, %v2439_v33, 0.0  ;;  %v2111_v59 = vadd.f32 %v2026_v31, %v1864_v42  ;;  %v2797_v38 = vpop.f32.mrb[41].mxu1  ;;  %v2233_v44 = vpop.f32.mrb[46].mxu0 }
 0x1eb   : > { %v2484_v51 = vadd.f32 %v2483_v54, %v2482_v7  ;;  %v2029_v45 = vpop.f32.mrb[42].mxu1  ;;  %v2864_v55 = vpop.f32.mrb[47].mxu0 }
 0x1ec   : > { %v2307_v12 = vadd.f32 %v2230_v29, %v2111_v59  ;;  %v2112_v53 = vadd.f32 %v2029_v45, %v1867_v30  ;;  %v2798_v4 = vpop.f32.mrb[43].mxu1 }
 0x1ee   : > { %2339 = vst.msk [vmem:[%s4248_s25 + $0x70] sm:$0xff] %vm1623_vm6, %v2307_v12  ;;  %v2384_v21 = vsel %vm1623_vm6, %v2307_v12, 0.0  ;;  %v2440_v2 = vmul.f32 %v2307_v12, %v2307_v12  ;;  %v2308_v62 = vadd.f32 %v2233_v44, %v2112_v53 }
 0x1ef   : > { %v2385_v41 = vadd.f32 %v2384_v21, %v2383_v13 }
 0x1f0   : > { %v2485_v63 = vsel %vm1623_vm6, %v2440_v2, 0.0  ;;  %2340 = vst.msk [vmem:[%s4248_s25 + $0x78] sm:$0xff] %vm1623_vm6, %v2308_v62  ;;  %v2386_v37 = vsel %vm1623_vm6, %v2308_v62, 0.0  ;;  %v2441_v60 = vmul.f32 %v2308_v62, %v2308_v62  ;;  %v2238_v28 = vpop.f32.mrb[48].mxu0 }
 0x1f1   : > { %v2486_v35 = vadd.f32 %v2485_v63, %v2484_v51  ;;  %v2387_v34 = vadd.f32 %v2386_v37, %v2385_v41  ;;  %v2034_v11 = vpop.f32.mrb[44].mxu1  ;;  %v2867_v17 = vpop.f32.mrb[49].mxu0 }
 0x1f2   : > { %v2487_v8 = vsel %vm1623_vm6, %v2441_v60, 0.0  ;;  %v2113_v23 = vadd.f32 %v2034_v11, %v4186_v32  ;;  %v2801_v57 = vpop.f32.mrb[45].mxu1  ;;  %v2241_v26 = vpop.f32.mrb[50].mxu0 }
 0x1f3   : > { %v2488_v47 = vadd.f32 %v2487_v8, %v2486_v35  ;;  %v2037_v50 = vpop.f32.mrb[46].mxu1  ;;  %v2868_v56 = vpop.f32.mrb[51].mxu0 }
 0x1f4   : > { %v2309_v22 = vadd.f32 %v2238_v28, %v2113_v23  ;;  %v2114_v39 = vadd.f32 %v2037_v50, %v4192_v61  ;;  %v2802_v1 = vpop.f32.mrb[47].mxu1 }
 0x1f6   : > { %2341 = vst.msk [vmem:[%s4248_s25 + $0x80] sm:$0xff] %vm1623_vm6, %v2309_v22  ;;  %v2388_v58 = vsel %vm1623_vm6, %v2309_v22, 0.0  ;;  %v2442_v36 = vmul.f32 %v2309_v22, %v2309_v22  ;;  %v2310_v10 = vadd.f32 %v2241_v26, %v2114_v39 }
 0x1f7   : > { %v2389_v20 = vadd.f32 %v2388_v58, %v2387_v34 }
 0x1f8   : > { %v2489_v14 = vsel %vm1623_vm6, %v2442_v36, 0.0  ;;  %2342 = vst.msk [vmem:[%s4248_s25 + $0x88] sm:$0xff] %vm1623_vm6, %v2310_v10  ;;  %v2390_v32 = vsel %vm1623_vm6, %v2310_v10, 0.0  ;;  %v2443_v27 = vmul.f32 %v2310_v10, %v2310_v10  ;;  %v2246_v42 = vpop.f32.mrb[52].mxu0 }
 0x1f9   : > { %v2490_v52 = vadd.f32 %v2489_v14, %v2488_v47  ;;  %v2391_v46 = vadd.f32 %v2390_v32, %v2389_v20  ;;  %v2042_v61 = vpop.f32.mrb[48].mxu1  ;;  %v2871_v33 = vpop.f32.mrb[53].mxu0 }
 0x1fa   : > { %v2491_v29 = vsel %vm1623_vm6, %v2443_v27, 0.0  ;;  %v2115_v7 = vadd.f32 %v2042_v61, %v4183_v24  ;;  %v2805_v13 = vpop.f32.mrb[49].mxu1  ;;  %v2249_v31 = vpop.f32.mrb[54].mxu0 }
 0x1fb   : > { %v2492_v16 = vadd.f32 %v2491_v29, %v2490_v52  ;;  %v2045_v30 = vpop.f32.mrb[50].mxu1  ;;  %v2872_v54 = vpop.f32.mrb[55].mxu0 }
 0x1fc   : > { %v2311_v59 = vadd.f32 %v2246_v42, %v2115_v7  ;;  %v2116_v38 = vadd.f32 %v2045_v30, %v4189_v18  ;;  %v2806_v44 = vpop.f32.mrb[51].mxu1 }
 0x1fe   : > { %2343 = vst.msk [vmem:[%s4248_s25 + $0x90] sm:$0xff] %vm1623_vm6, %v2311_v59  ;;  %v2392_v51 = vsel %vm1623_vm6, %v2311_v59, 0.0  ;;  %v2444_v45 = vmul.f32 %v2311_v59, %v2311_v59  ;;  %v2312_v55 = vadd.f32 %v2249_v31, %v2116_v38 }
 0x1ff   : > { %v2393_v12 = vadd.f32 %v2392_v51, %v2391_v46 }
 0x200   : > { %v2493_v53 = vsel %vm1623_vm6, %v2444_v45, 0.0  ;;  %2344 = vst.msk [vmem:[%s4248_s25 + $0x98] sm:$0xff] %vm1623_vm6, %v2312_v55  ;;  %v2394_v24 = vsel %vm1623_vm6, %v2312_v55, 0.0  ;;  %v2445_v4 = vmul.f32 %v2312_v55, %v2312_v55  ;;  %v2254_v21 = vpop.f32.mrb[56].mxu0 }
 0x201   : > { %v2494_v2 = vadd.f32 %v2493_v53, %v2492_v16  ;;  %v2395_v62 = vadd.f32 %v2394_v24, %v2393_v12  ;;  %v2050_v18 = vpop.f32.mrb[52].mxu1  ;;  %v2875_v41 = vpop.f32.mrb[57].mxu0 }
 0x202   : > { %v2495_v63 = vsel %vm1623_vm6, %v2445_v4, 0.0  ;;  %v2117_v37 = vadd.f32 %v2050_v18, %v4206_v6  ;;  %v2809_v60 = vpop.f32.mrb[53].mxu1  ;;  %v2257_v28 = vpop.f32.mrb[58].mxu0 }
 0x203   : > { %v2496_v35 = vadd.f32 %v2495_v63, %v2494_v2  ;;  %v2053_v34 = vpop.f32.mrb[54].mxu1  ;;  %v2876_v11 = vpop.f32.mrb[59].mxu0 }
 0x204   : > { %v2313_v17 = vadd.f32 %v2254_v21, %v2117_v37  ;;  %v2118_v8 = vadd.f32 %v2053_v34, %v4212_v5  ;;  %v2810_v23 = vpop.f32.mrb[55].mxu1 }
 0x206   : > { %2345 = vst.msk [vmem:[%s4248_s25 + $0xa0] sm:$0xff] %vm1623_vm6, %v2313_v17  ;;  %v2396_v57 = vsel %vm1623_vm6, %v2313_v17, 0.0  ;;  %v2446_v26 = vmul.f32 %v2313_v17, %v2313_v17  ;;  %v2314_v47 = vadd.f32 %v2257_v28, %v2118_v8 }
 0x207   : > { %v2397_v50 = vadd.f32 %v2396_v57, %v2395_v62 }
 0x208   : > { %v2497_v56 = vsel %vm1623_vm6, %v2446_v26, 0.0  ;;  %2346 = vst.msk [vmem:[%s4248_s25 + $0xa8] sm:$0xff] %vm1623_vm6, %v2314_v47  ;;  %v2398_v6 = vsel %vm1623_vm6, %v2314_v47, 0.0  ;;  %v2447_v22 = vmul.f32 %v2314_v47, %v2314_v47  ;;  %v2262_v39 = vpop.f32.mrb[60].mxu0 }
 0x209   : > { %v2498_v1 = vadd.f32 %v2497_v56, %v2496_v35  ;;  %v2399_v58 = vadd.f32 %v2398_v6, %v2397_v50  ;;  %v2058_v5 = vpop.f32.mrb[56].mxu1  ;;  %v2879_v36 = vpop.f32.mrb[61].mxu0 }
 0x20a   : > { %v2499_v10 = vsel %vm1623_vm6, %v2447_v22, 0.0  ;;  %v2119_v20 = vadd.f32 %v2058_v5, %v4203_v43  ;;  %v2813_v14 = vpop.f32.mrb[57].mxu1  ;;  %v2265_v32 = vpop.f32.mrb[62].mxu0 }
 0x20b   : > { %v2500_v27 = vadd.f32 %v2499_v10, %v2498_v1  ;;  %v2061_v42 = vpop.f32.mrb[58].mxu1  ;;  %v2880_v52 = vpop.f32.mrb[63].mxu0 }
 0x20c   : > { %v2315_v46 = vadd.f32 %v2262_v39, %v2119_v20  ;;  %v2120_v61 = vadd.f32 %v2061_v42, %v4209_v40  ;;  %v2814_v33 = vpop.f32.mrb[59].mxu1 }
 0x20e   : > { %2347 = vst.msk [vmem:[%s4248_s25 + $0xb0] sm:$0xff] %vm1623_vm6, %v2315_v46  ;;  %v2400_v29 = vsel %vm1623_vm6, %v2315_v46, 0.0  ;;  %v2448_v7 = vmul.f32 %v2315_v46, %v2315_v46  ;;  %v2316_v13 = vadd.f32 %v2265_v32, %v2120_v61 }
 0x20f   : > { %v2401_v31 = vadd.f32 %v2400_v29, %v2399_v58 }
 0x210   : > { %v2501_v16 = vsel %vm1623_vm6, %v2448_v7, 0.0  ;;  %2348 = vst.msk [vmem:[%s4248_s25 + $0xb8] sm:$0xff] %vm1623_vm6, %v2316_v13  ;;  %v2402_v43 = vsel %vm1623_vm6, %v2316_v13, 0.0  ;;  %v2449_v30 = vmul.f32 %v2316_v13, %v2316_v13  ;;  %v2270_v54 = vpop.f32.mrb[64].mxu0 }
 0x211   : > { %v2502_v59 = vadd.f32 %v2501_v16, %v2500_v27  ;;  %v2403_v38 = vadd.f32 %v2402_v43, %v2401_v31  ;;  %v2066_v40 = vpop.f32.mrb[60].mxu1  ;;  %v2883_v44 = vpop.f32.mrb[65].mxu0 }
 0x212   : > { %v2503_v51 = vsel %vm1623_vm6, %v2449_v30, 0.0  ;;  %v2121_v45 = vadd.f32 %v2066_v40, %v4226_v15  ;;  %v2817_v55 = vpop.f32.mrb[61].mxu1  ;;  %v2273_v12 = vpop.f32.mrb[66].mxu0 }
 0x213   : > { %v2504_v53 = vadd.f32 %v2503_v51, %v2502_v59  ;;  %v2069_v24 = vpop.f32.mrb[62].mxu1  ;;  %v2884_v4 = vpop.f32.mrb[67].mxu0 }
 0x214   : > { %v2317_v21 = vadd.f32 %v2270_v54, %v2121_v45  ;;  %v2122_v2 = vadd.f32 %v2069_v24, %v4232_v19  ;;  %v2818_v62 = vpop.f32.mrb[63].mxu1 }
 0x216   : > { %2349 = vst.msk [vmem:[%s4248_s25 + $0xc0] sm:$0xff] %vm1623_vm6, %v2317_v21  ;;  %v2404_v18 = vsel %vm1623_vm6, %v2317_v21, 0.0  ;;  %v2450_v41 = vmul.f32 %v2317_v21, %v2317_v21  ;;  %v2318_v63 = vadd.f32 %v2273_v12, %v2122_v2 }
 0x217   : > { %v2405_v37 = vadd.f32 %v2404_v18, %v2403_v38 }
 0x218   : > { %v2505_v60 = vsel %vm1623_vm6, %v2450_v41, 0.0  ;;  %2350 = vst.msk [vmem:[%s4248_s25 + $0xc8] sm:$0xff] %vm1623_vm6, %v2318_v63  ;;  %v2406_v15 = vsel %vm1623_vm6, %v2318_v63, 0.0  ;;  %v2451_v28 = vmul.f32 %v2318_v63, %v2318_v63  ;;  %v2278_v35 = vpop.f32.mrb[68].mxu0 }
 0x219   : > { %v2506_v34 = vadd.f32 %v2505_v60, %v2504_v53  ;;  %v2407_v11 = vadd.f32 %v2406_v15, %v2405_v37  ;;  %v2074_v19 = vpop.f32.mrb[64].mxu1  ;;  %v2887_v17 = vpop.f32.mrb[69].mxu0 }
 0x21a   : > { %v2507_v8 = vsel %vm1623_vm6, %v2451_v28, 0.0  ;;  %v2123_v23 = vadd.f32 %v2074_v19, %v4223_v3  ;;  %v2821_v57 = vpop.f32.mrb[65].mxu1  ;;  %v2281_v26 = vpop.f32.mrb[70].mxu0 }
 0x21b   : > { %v2508_v47 = vadd.f32 %v2507_v8, %v2506_v34  ;;  %v2077_v50 = vpop.f32.mrb[66].mxu1  ;;  %v2888_v56 = vpop.f32.mrb[71].mxu0 }
 0x21c   : > { %v2319_v6 = vadd.f32 %v2278_v35, %v2123_v23  ;;  %v2124_v22 = vadd.f32 %v2077_v50, %v4229_v48  ;;  %v2822_v39 = vpop.f32.mrb[67].mxu1 }
 0x21e   : > { %2351 = vst.msk [vmem:[%s4248_s25 + $0xd0] sm:$0xff] %vm1623_vm6, %v2319_v6  ;;  %v2408_v1 = vsel %vm1623_vm6, %v2319_v6, 0.0  ;;  %v2452_v58 = vmul.f32 %v2319_v6, %v2319_v6  ;;  %v2320_v5 = vadd.f32 %v2281_v26, %v2124_v22 }
 0x21f   : > { %v2409_v36 = vadd.f32 %v2408_v1, %v2407_v11 }
 0x220   : > { %v2509_v10 = vsel %vm1623_vm6, %v2452_v58, 0.0  ;;  %2352 = vst.msk [vmem:[%s4248_s25 + $0xd8] sm:$0xff] %vm1623_vm6, %v2320_v5  ;;  %v2410_v3 = vsel %vm1623_vm6, %v2320_v5, 0.0  ;;  %v2453_v20 = vmul.f32 %v2320_v5, %v2320_v5  ;;  %v2286_v14 = vpop.f32.mrb[72].mxu0 }
 0x221   : > { %v2510_v32 = vadd.f32 %v2509_v10, %v2508_v47  ;;  %v2411_v27 = vadd.f32 %v2410_v3, %v2409_v36  ;;  %v2082_v48 = vpop.f32.mrb[68].mxu1  ;;  %v2891_v42 = vpop.f32.mrb[73].mxu0 }
 0x222   : > { %v2511_v52 = vsel %vm1623_vm6, %v2453_v20, 0.0  ;;  %v2125_v46 = vadd.f32 %v2082_v48, %v4257_v0  ;;  %v2825_v61 = vpop.f32.mrb[69].mxu1  ;;  %v2289_v33 = vpop.f32.mrb[74].mxu0 }
 0x223   : > { %v2512_v29 = vadd.f32 %v2511_v52, %v2510_v32  ;;  %v2085_v7 = vpop.f32.mrb[70].mxu1  ;;  %v2892_v13 = vpop.f32.mrb[75].mxu0 }
 0x224   : > { %v2321_v31 = vadd.f32 %v2286_v14, %v2125_v46  ;;  %v2126_v16 = vadd.f32 %v2085_v7, %v4267_v9  ;;  %v2826_v43 = vpop.f32.mrb[71].mxu1 }
 0x226   : > { %2353 = vst.msk [vmem:[%s4248_s25 + $0xe0] sm:$0xff] %vm1623_vm6, %v2321_v31  ;;  %v2412_v30 = vsel %vm1623_vm6, %v2321_v31, 0.0  ;;  %v2454_v54 = vmul.f32 %v2321_v31, %v2321_v31  ;;  %v2322_v59 = vadd.f32 %v2289_v33, %v2126_v16 }
 0x227   : > { %v2413_v38 = vadd.f32 %v2412_v30, %v2411_v27 }
 0x228   : > { %v2513_v40 = vsel %vm1623_vm6, %v2454_v54, 0.0  ;;  %2354 = vst.msk [vmem:[%s4248_s25 + $0xe8] sm:$0xff] %vm1623_vm6, %v2322_v59  ;;  %v2414_v0 = vsel %vm1623_vm6, %v2322_v59, 0.0  ;;  %v2455_v44 = vmul.f32 %v2322_v59, %v2322_v59 }
 0x229   : > { %v2514_v51 = vadd.f32 %v2513_v40, %v2512_v29  ;;  %v2415_v45 = vadd.f32 %v2414_v0, %v2413_v38  ;;  %v2090_v9 = vpop.f32.mrb[72].mxu1 }
 0x22a   : > { %v2515_v55 = vsel %vm1623_vm6, %v2455_v44, 0.0  ;;  %v2127_v12 = vadd.f32 %v2090_v9, %v4252_v49  ;;  %v2829_v53 = vpop.f32.mrb[73].mxu1 }
 0x22b   : > { %v2516_v24 = vadd.f32 %v2515_v55, %v2514_v51  ;;  %v2093_v4 = vpop.f32.mrb[74].mxu1 }
 0x22c   : > { %2355 = vst.msk [vmem:[%s4248_s25 + $0xf0] sm:$0xff] %vm1623_vm6, %v2127_v12  ;;  %v2416_v21 = vsel %vm1623_vm6, %v2127_v12, 0.0  ;;  %v2456_v2 = vmul.f32 %v2127_v12, %v2127_v12  ;;  %v2128_v62 = vadd.f32 %v2093_v4, %v4260_v25  ;;  %v2830_v18 = vpop.f32.mrb[75].mxu1 }
 0x22d   : > { %v2417_v41 = vadd.f32 %v2416_v21, %v2415_v45 }
 0x22e   : > { %v2517_v63 = vsel %vm1623_vm6, %v2456_v2, 0.0  ;;  %2356 = vst.msk [vmem:[%s4248_s25 + $0xf8] sm:$0xff] %vm1623_vm6, %v2128_v62  ;;  %v2418_v37 = vsel %vm1623_vm6, %v2128_v62, 0.0  ;;  %v2457_v49 = vmul.f32 %v2128_v62, %v2128_v62 }
 0x22f   : > { %v2518_v60 = vadd.f32 %v2517_v63, %v2516_v24  ;;  %v2419_v15 = vadd.f32 %v2418_v37, %v2417_v41 }
 0x230   : > { %v2519_v28 = vsel %vm1623_vm6, %v2457_v49, 0.0 }
 0x231   : > { %v2420_v35 = vrot.slane %v2419_v15, 4  ;;  %v2520_v34 = vadd.f32 %v2519_v28, %v2518_v60 }
 0x233   : > { %v2421_v11 = vadd.f32 %v2420_v35, %v2419_v15  ;;  %v2521_v19 = vrot.slane %v2520_v34, 4 }
 0x235   : > { %v2422_v17 = vrot.slane %v2421_v11, 2  ;;  %v2522_v25 = vadd.f32 %v2521_v19, %v2520_v34 }
 0x237   : > { %v2423_v8 = vadd.f32 %v2422_v17, %v2421_v11  ;;  %v2523_v23 = vrot.slane %v2522_v25, 2 }
 0x239   : > { %v2424_v57 = vrot.slane %v2423_v8, 1  ;;  %v2524_v26 = vadd.f32 %v2523_v23, %v2522_v25 }
 0x23b   : > { %v2525_v47 = vrot.slane %v2524_v26, 1  ;;  %v2425_v50 = vadd.f32 %v2424_v57, %v2423_v8 }
 0x23d   : > { %v2526_v56 = vadd.f32 %v2525_v47, %v2524_v26 }
 0x23f   : > { %v2527_v6 = vsel %vm981_vm12, %v2425_v50, %v2526_v56 }
 0x240   : > { %2529 = vst.msk [vmem:[%s290_s30] sm:$0x3] %vm2528_vm7, %v2527_v6 }
 0x241 PF: > { %s19_s26 = sadd.s32 1, %s3078_s26  }
 0x242   : > { %p16_p4 = scmp.ge.s32.totalorder %s19_s26, 4  }
 0x244   :  { %18 = sbr.rel (!%p16_p4) target bundleno = 2 (0x2), region = 88 }

</bundles_post_ra>
